<compile_context>
chip_gen: v7x
topology: tpu7x:2x2x1
jax: 0.10.0
libtpu: 0.0.40
codegen_flags: <defaults>
</compile_context>

<pallas_src>
import functools
import math

import jax
import jax.numpy as jnp
from jax import lax
from jax.experimental import pallas as pl
from jax.experimental.pallas import tpu as pltpu


# ----------------------------- Pallas kernel -------------------------------


def _arinv_kernel(
    x_ref,      # (TB, 2*obs)            f32
    w0_ref,     # (2*obs, H)             bf16
    b0_ref,     # (1, H)                 f32
    wh_ref,     # (3, H, H)              bf16
    bh_ref,     # (3, H)                 f32
    wa1s_ref,   # (H, A*AEH)             bf16  (all heads' state-part, concat on out)
    ba1_ref,    # (1, A*AEH)             f32
    wa1z_ref,   # (A, OUT_LIN, AEH)      bf16  (head i's lin_mod-part; zeros for i=0)
    wa2_ref,    # (A, AEH, NB_PAD)       bf16  (bin axis padded to 128)
    ba2_ref,    # (A, NB_PAD)            f32   (padded lanes = -1e30)
    wlin_ref,   # (max(A-1,1), A-1|1, OUT_LIN) f32  (row j = weights for input a_j)
    blin_ref,   # (max(A-1,1), OUT_LIN)  f32
    gum_ref,    # (TB, A*NB_PAD)         f32   gumbel noise
    unif_ref,   # (TB, A)                f32   uniform noise (within-bin)
    out_ref,    # (TB, OUT_PAD)          f32   lane-dense output slab
    *,
    action_dim,
    nb_pad,
    aeh,
    out_lin,
    out_pad,
    low_act,
    bin_size,
    deterministic,
):
    f32 = jnp.float32
    bf16 = jnp.bfloat16
    A = action_dim
    TB = x_ref.shape[0]

    # ---- state_embed: (Linear+ReLU)x3 + Linear.  bf16 MXU, f32 accumulate ----
    h = jnp.dot(x_ref[...].astype(bf16), w0_ref[...],
                preferred_element_type=f32) + b0_ref[...]
    h = jnp.maximum(h, 0.0)
    for k in range(3):
        h = jnp.dot(h.astype(bf16), wh_ref[k],
                    preferred_element_type=f32) + bh_ref[pl.ds(k, 1), :]
        if k < 2:
            h = jnp.maximum(h, 0.0)
    state_d = h.astype(bf16)                                   # (TB, H)

    # ---- hoisted state-only part of all A heads: one matmul (TB, A*AEH) -----
    hid_all = jnp.dot(state_d, wa1s_ref[...],
                      preferred_element_type=f32) + ba1_ref[...]

    lane = lax.broadcasted_iota(jnp.int32, (TB, nb_pad), 1)
    u_all = unif_ref[...]                                      # (TB, A) f32

    # ---- autoregressive heads (unrolled; only the lin_mod path is sequential)
    a_cols = []
    for i in range(A):
        hid = hid_all[:, i * aeh:(i + 1) * aeh]                # lane-aligned slice

        if i > 0:
            # lin_mod[i-1](a_0..a_{i-1}): contraction dim = i (<=3) -> VPU FMAs.
            wrows = wlin_ref[i - 1]                            # (A-1, OUT_LIN) f32
            z = blin_ref[pl.ds(i - 1, 1), :]                   # (1, OUT_LIN)
            for j in range(i):
                z = z + a_cols[j] * wrows[j:j + 1, :]          # (TB, OUT_LIN)
            hid = hid + jnp.dot(z.astype(bf16), wa1z_ref[i],
                                preferred_element_type=f32)
        hid = jnp.maximum(hid, 0.0)

        logits = jnp.dot(hid.astype(bf16), wa2_ref[i],
                         preferred_element_type=f32) + ba2_ref[pl.ds(i, 1), :]

        # Categorical(logits).sample() via Gumbel-max (padded lanes hold -1e30).
        s = logits + gum_ref[:, pl.ds(i * nb_pad, nb_pad)]
        m = jnp.max(s, axis=-1, keepdims=True)
        l_i = jnp.min(jnp.where(s >= m, lane, nb_pad),
                      axis=-1, keepdims=True).astype(f32)      # (TB, 1)

        if deterministic:
            frac = jnp.full((TB, 1), 0.5, f32)
        else:
            frac = u_all[:, i:i + 1]                           # (TB, 1)
        a_cols.append(low_act + (l_i + frac) * bin_size)

    # ---- single lane-dense store --------------------------------------------
    pieces = a_cols
    if out_pad > A:
        pieces = pieces + [jnp.zeros((TB, out_pad - A), f32)]
    out_ref[...] = jnp.concatenate(pieces, axis=1).astype(out_ref.dtype)


# ------------------------------ host wrapper --------------------------------


def arinv_forward(params, comb_state, gumbel2d, unif, *,
                  action_dim, num_bins=80, nb_pad=128,
                  low_act=-1.0, up_act=1.0, deterministic=False, tb=None):
    B, two_obs = comb_state.shape
    A = action_dim
    aeh = params["wa1z"].shape[2]
    out_lin = params["wa1z"].shape[1]
    out_pad = ((max(A, 1) + 127) // 128) * 128     # lane-dense output slab
    bin_size = (up_act - low_act) / num_bins

    if tb is None:
        tb = B if B <= 128 else 128                # big M per matmul, grid>=2 when B>=256
    assert B % tb == 0

    def full(arr):
        n = arr.ndim
        return pl.BlockSpec(arr.shape, lambda b, _n=n: (0,) * _n)

    kernel = functools.partial(
        _arinv_kernel,
        action_dim=A, nb_pad=nb_pad, aeh=aeh, out_lin=out_lin, out_pad=out_pad,
        low_act=low_act, bin_size=bin_size, deterministic=deterministic,
    )

    out_padded = pl.pallas_call(
        kernel,
        out_shape=jax.ShapeDtypeStruct((B, out_pad), jnp.float32),
        grid_spec=pltpu.PrefetchScalarGridSpec(
            num_scalar_prefetch=0,
            grid=(B // tb,),
            in_specs=[
                pl.BlockSpec((tb, two_obs), lambda b: (b, 0)),       # comb_state
                full(params["w0"]), full(params["b0"]),
                full(params["wh"]), full(params["bh"]),
                full(params["wa1s"]), full(params["ba1"]),
                full(params["wa1z"]),
                full(params["wa2"]), full(params["ba2"]),
                full(params["wlin"]), full(params["blin"]),
                pl.BlockSpec((tb, A * nb_pad), lambda b: (b, 0)),    # gumbel
                pl.BlockSpec((tb, A), lambda b: (b, 0)),             # uniform
            ],
            out_specs=pl.BlockSpec((tb, out_pad), lambda b: (b, 0)),
        ),
        compiler_params=pltpu.CompilerParams(
            dimension_semantics=("parallel",)),
    )(comb_state, params["w0"], params["b0"], params["wh"], params["bh"],
      params["wa1s"], params["ba1"], params["wa1z"],
      params["wa2"], params["ba2"], params["wlin"], params["blin"],
      gumbel2d, unif)

    return out_padded[:, :A]


# ------------------------- deterministic param init -------------------------


def init_params(key, hidden_dim, observation_dim, action_dim,
                action_embed_hid=128, out_lin=128, num_bins=80, nb_pad=128,
                weight_dtype=jnp.bfloat16):
    H, A, AEH = hidden_dim, action_dim, action_embed_hid
    ks = iter(jax.random.split(key, 6 * action_dim + 10))

    def linear(out_f, in_f):
        bound = 1.0 / math.sqrt(in_f)
        w = jax.random.uniform(next(ks), (out_f, in_f), jnp.float32, -bound, bound)
        b = jax.random.uniform(next(ks), (out_f,), jnp.float32, -bound, bound)
        return w, b

    w0, b0 = linear(H, 2 * observation_dim)
    wh_l, bh_l = zip(*[linear(H, H) for _ in range(3)])

    NEG = -1e30
    wa1s_cols, ba1_cols, wa1z_l, wa2_l, ba2_l = [], [], [], [], []
    for i in range(A):
        in_f = H if i == 0 else H + out_lin
        w1, bb1 = linear(AEH, in_f)
        wa1s_cols.append(w1[:, :H].T)                              # (H, AEH)
        wa1z_l.append(jnp.zeros((out_lin, AEH), jnp.float32) if i == 0
                      else w1[:, H:].T)                            # (OUT_LIN, AEH)
        ba1_cols.append(bb1)
        w2, bb2 = linear(num_bins, AEH)
        w2p = jnp.zeros((AEH, nb_pad), jnp.float32).at[:, :num_bins].set(w2.T)
        b2p = jnp.full((nb_pad,), NEG, jnp.float32).at[:num_bins].set(bb2)
        wa2_l.append(w2p)
        ba2_l.append(b2p)

    wlin_l, blin_l = [], []
    for i in range(1, A):
        wl, bl = linear(out_lin, i)                                # (OUT_LIN, i)
        wl_pad = jnp.zeros((A - 1, out_lin), jnp.float32).at[:i, :].set(wl.T)
        wlin_l.append(wl_pad)
        blin_l.append(bl)
    if A == 1:  # keep shapes valid (kernel never reads them)
        wlin_l.append(jnp.zeros((1, out_lin), jnp.float32))
        blin_l.append(jnp.zeros((out_lin,), jnp.float32))

    wd = weight_dtype
    return dict(
        w0=w0.T.astype(wd), b0=b0[None, :],
        wh=jnp.stack([w.T for w in wh_l]).astype(wd), bh=jnp.stack(bh_l),
        wa1s=jnp.concatenate(wa1s_cols, axis=1).astype(wd),        # (H, A*AEH)
        ba1=jnp.concatenate(ba1_cols)[None, :],                    # (1, A*AEH)
        wa1z=jnp.stack(wa1z_l).astype(wd),                         # (A, OUT_LIN, AEH)
        wa2=jnp.stack(wa2_l).astype(wd),                           # (A, AEH, NB_PAD)
        ba2=jnp.stack(ba2_l),                                      # (A, NB_PAD)
        wlin=jnp.stack(wlin_l),                                    # (A-1, A-1, OUT_LIN)
        blin=jnp.stack(blin_l),                                    # (A-1, OUT_LIN)
    )


# ------------------------------ pure-JAX reference ---------------------------


def reference_forward(params, x, gum2d, unif, *, action_dim, num_bins, nb_pad,
                      low_act, up_act, deterministic):
    f32, bf16 = jnp.float32, jnp.bfloat16
    A = action_dim
    aeh = params["wa1z"].shape[2]
    bin_size = (up_act - low_act) / num_bins

    h = jnp.dot(x.astype(bf16), params["w0"], preferred_element_type=f32) + params["b0"]
    h = jnp.maximum(h, 0.0)
    for k in range(3):
        h = jnp.dot(h.astype(bf16), params["wh"][k],
                    preferred_element_type=f32) + params["bh"][k:k + 1, :]
        if k < 2:
            h = jnp.maximum(h, 0.0)
    state_d = h.astype(bf16)

    hid_all = jnp.dot(state_d, params["wa1s"],
                      preferred_element_type=f32) + params["ba1"]

    a_cols = []
    for i in range(A):
        hid = hid_all[:, i * aeh:(i + 1) * aeh]
        if i > 0:
            wrows = params["wlin"][i - 1]
            z = params["blin"][i - 1:i, :]
            for j in range(i):
                z = z + a_cols[j] * wrows[j:j + 1, :]
            hid = hid + jnp.dot(z.astype(bf16), params["wa1z"][i],
                                preferred_element_type=f32)
        hid = jnp.maximum(hid, 0.0)
        logits = jnp.dot(hid.astype(bf16), params["wa2"][i],
                         preferred_element_type=f32) + params["ba2"][i:i + 1, :]

        s = logits[:, :num_bins] + gum2d[:, i * nb_pad:i * nb_pad + num_bins]
        l_i = jnp.argmax(s, axis=-1).astype(f32)[:, None]
        frac = 0.5 if deterministic else unif[:, i:i + 1]
        a_cols.append(low_act + (l_i + frac) * bin_size)
    return jnp.concatenate(a_cols, axis=1)


# ----------------------------------- main ------------------------------------


if __name__ == "__main__":
    hidden_dim = 32
    observation_dim = 8
    action_dim = 4
    num_bins = 80
    NB_PAD = 128
    low_act, up_act = -1.0, 1.0
    B = 256                       # tb=128 -> grid of 2 (both TCs on v7x)

    key = jax.random.PRNGKey(0)
    kp, kx, kg, ku = jax.random.split(key, 4)

    params = init_params(kp, hidden_dim, observation_dim, action_dim,
                         num_bins=num_bins, nb_pad=NB_PAD)
    comb_state = jax.random.normal(kx, (B, 2 * observation_dim), jnp.float32)
    gumbel2d = jax.random.gumbel(kg, (B, action_dim * NB_PAD), jnp.float32)
    unif = jax.random.uniform(ku, (B, action_dim), jnp.float32)

    actions = arinv_forward(
        params, comb_state, gumbel2d, unif,
        action_dim=action_dim, num_bins=num_bins, nb_pad=NB_PAD,
        low_act=low_act, up_act=up_act, deterministic=False)
    actions = jax.block_until_ready(actions)

    ref = reference_forward(
        params, comb_state, gumbel2d, unif,
        action_dim=action_dim, num_bins=num_bins, nb_pad=NB_PAD,
        low_act=low_act, up_act=up_act, deterministic=False)

    assert actions.shape == (B, action_dim)
    assert jnp.all(actions >= low_act) and jnp.all(actions <= up_act)
    assert jnp.allclose(actions, ref, atol=1e-5, rtol=1e-5)
    print("KERNEL_OK")
</pallas_src>

<mosaic_0001>
module attributes {stable_mosaic.version = 11 : i64} {
  func.func @_arinv_kernel(%arg0: i32, %arg1: memref<128x16xf32, #tpu.memory_space<vmem>>, %arg2: memref<16x32xbf16, #tpu.memory_space<vmem>>, %arg3: memref<1x32xf32, #tpu.memory_space<vmem>>, %arg4: memref<3x32x32xbf16, #tpu.memory_space<vmem>>, %arg5: memref<3x32xf32, #tpu.memory_space<vmem>>, %arg6: memref<32x512xbf16, #tpu.memory_space<vmem>>, %arg7: memref<1x512xf32, #tpu.memory_space<vmem>>, %arg8: memref<4x128x128xbf16, #tpu.memory_space<vmem>>, %arg9: memref<4x128x128xbf16, #tpu.memory_space<vmem>>, %arg10: memref<4x128xf32, #tpu.memory_space<vmem>>, %arg11: memref<3x3x128xf32, #tpu.memory_space<vmem>>, %arg12: memref<3x128xf32, #tpu.memory_space<vmem>>, %arg13: memref<128x512xf32, #tpu.memory_space<vmem>>, %arg14: memref<128x4xf32, #tpu.memory_space<vmem>>, %arg15: memref<128x128xf32, #tpu.memory_space<vmem>>) attributes {dimension_semantics = [#tpu.dimension_semantics<parallel>], iteration_bounds = array<i64: 2>, scalar_prefetch = 0 : i64, scratch_operands = 0 : i64, tpu.core_type = #tpu.core_type<tc>, window_params = [{transform_indices = @transform_0, window_bounds = array<i64: 128, 16>}, {pipeline_mode = #tpu.pipeline_mode<synchronous>, transform_indices = @transform_1, window_bounds = array<i64: 16, 32>}, {pipeline_mode = #tpu.pipeline_mode<synchronous>, transform_indices = @transform_2, window_bounds = array<i64: 1, 32>}, {pipeline_mode = #tpu.pipeline_mode<synchronous>, transform_indices = @transform_3, window_bounds = array<i64: 3, 32, 32>}, {pipeline_mode = #tpu.pipeline_mode<synchronous>, transform_indices = @transform_4, window_bounds = array<i64: 3, 32>}, {pipeline_mode = #tpu.pipeline_mode<synchronous>, transform_indices = @transform_5, window_bounds = array<i64: 32, 512>}, {pipeline_mode = #tpu.pipeline_mode<synchronous>, transform_indices = @transform_6, window_bounds = array<i64: 1, 512>}, {pipeline_mode = #tpu.pipeline_mode<synchronous>, transform_indices = @transform_7, window_bounds = array<i64: 4, 128, 128>}, {pipeline_mode = #tpu.pipeline_mode<synchronous>, transform_indices = @transform_8, window_bounds = array<i64: 4, 128, 128>}, {pipeline_mode = #tpu.pipeline_mode<synchronous>, transform_indices = @transform_9, window_bounds = array<i64: 4, 128>}, {pipeline_mode = #tpu.pipeline_mode<synchronous>, transform_indices = @transform_10, window_bounds = array<i64: 3, 3, 128>}, {pipeline_mode = #tpu.pipeline_mode<synchronous>, transform_indices = @transform_11, window_bounds = array<i64: 3, 128>}, {transform_indices = @transform_12, window_bounds = array<i64: 128, 512>}, {transform_indices = @transform_13, window_bounds = array<i64: 128, 4>}, {transform_indices = @transform_14, window_bounds = array<i64: 128, 128>}]} {
    %c0 = arith.constant 0 : index
    %c0_0 = arith.constant 0 : index
    %0 = vector.load %arg1[%c0, %c0_0] : memref<128x16xf32, #tpu.memory_space<vmem>>, vector<128x16xf32>
    %1 = arith.truncf %0 : vector<128x16xf32> to vector<128x16xbf16>
    %c0_1 = arith.constant 0 : index
    %c0_2 = arith.constant 0 : index
    %2 = vector.load %arg2[%c0_1, %c0_2] : memref<16x32xbf16, #tpu.memory_space<vmem>>, vector<16x32xbf16>
    %cst = arith.constant dense<0.000000e+00> : vector<128x32xf32>
    %3 = tpu.matmul %1, %2, %cst {dimension_numbers = #tpu.dot_dimension_numbers<[1], [0], [0], [1], [0, 0, 1, 1], [], []>} : vector<128x16xbf16>, vector<16x32xbf16>, vector<128x32xf32> -> vector<128x32xf32>
    %c0_3 = arith.constant 0 : index
    %c0_4 = arith.constant 0 : index
    %4 = vector.load %arg3[%c0_3, %c0_4] : memref<1x32xf32, #tpu.memory_space<vmem>>, vector<1x32xf32>
    %5 = vector.broadcast %4 : vector<1x32xf32> to vector<128x32xf32>
    %6 = arith.addf %3, %5 : vector<128x32xf32>
    %cst_5 = arith.constant 0.000000e+00 : f32
    %7 = vector.broadcast %cst_5 : f32 to vector<128x32xf32>
    %8 = arith.maximumf %6, %7 : vector<128x32xf32>
    %9 = arith.truncf %8 : vector<128x32xf32> to vector<128x32xbf16>
    %c0_6 = arith.constant 0 : index
    %c0_7 = arith.constant 0 : index
    %c0_8 = arith.constant 0 : index
    %10 = vector.load %arg4[%c0_6, %c0_7, %c0_8] : memref<3x32x32xbf16, #tpu.memory_space<vmem>>, vector<1x32x32xbf16>
    %11 = vector.shape_cast %10 : vector<1x32x32xbf16> to vector<32x32xbf16>
    %cst_9 = arith.constant dense<0.000000e+00> : vector<128x32xf32>
    %12 = tpu.matmul %9, %11, %cst_9 {dimension_numbers = #tpu.dot_dimension_numbers<[1], [0], [0], [1], [0, 0, 1, 1], [], []>} : vector<128x32xbf16>, vector<32x32xbf16>, vector<128x32xf32> -> vector<128x32xf32>
    %c0_10 = arith.constant 0 : index
    %c0_11 = arith.constant 0 : index
    %13 = vector.load %arg5[%c0_10, %c0_11] : memref<3x32xf32, #tpu.memory_space<vmem>>, vector<1x32xf32>
    %14 = vector.broadcast %13 : vector<1x32xf32> to vector<128x32xf32>
    %15 = arith.addf %12, %14 : vector<128x32xf32>
    %cst_12 = arith.constant 0.000000e+00 : f32
    %16 = vector.broadcast %cst_12 : f32 to vector<128x32xf32>
    %17 = arith.maximumf %15, %16 : vector<128x32xf32>
    %18 = arith.truncf %17 : vector<128x32xf32> to vector<128x32xbf16>
    %c1 = arith.constant 1 : index
    %c0_13 = arith.constant 0 : index
    %c0_14 = arith.constant 0 : index
    %19 = vector.load %arg4[%c1, %c0_13, %c0_14] : memref<3x32x32xbf16, #tpu.memory_space<vmem>>, vector<1x32x32xbf16>
    %20 = vector.shape_cast %19 : vector<1x32x32xbf16> to vector<32x32xbf16>
    %cst_15 = arith.constant dense<0.000000e+00> : vector<128x32xf32>
    %21 = tpu.matmul %18, %20, %cst_15 {dimension_numbers = #tpu.dot_dimension_numbers<[1], [0], [0], [1], [0, 0, 1, 1], [], []>} : vector<128x32xbf16>, vector<32x32xbf16>, vector<128x32xf32> -> vector<128x32xf32>
    %c1_16 = arith.constant 1 : index
    %c0_17 = arith.constant 0 : index
    %22 = vector.load %arg5[%c1_16, %c0_17] : memref<3x32xf32, #tpu.memory_space<vmem>>, vector<1x32xf32>
    %23 = vector.broadcast %22 : vector<1x32xf32> to vector<128x32xf32>
    %24 = arith.addf %21, %23 : vector<128x32xf32>
    %cst_18 = arith.constant 0.000000e+00 : f32
    %25 = vector.broadcast %cst_18 : f32 to vector<128x32xf32>
    %26 = arith.maximumf %24, %25 : vector<128x32xf32>
    %27 = arith.truncf %26 : vector<128x32xf32> to vector<128x32xbf16>
    %c2 = arith.constant 2 : index
    %c0_19 = arith.constant 0 : index
    %c0_20 = arith.constant 0 : index
    %28 = vector.load %arg4[%c2, %c0_19, %c0_20] : memref<3x32x32xbf16, #tpu.memory_space<vmem>>, vector<1x32x32xbf16>
    %29 = vector.shape_cast %28 : vector<1x32x32xbf16> to vector<32x32xbf16>
    %cst_21 = arith.constant dense<0.000000e+00> : vector<128x32xf32>
    %30 = tpu.matmul %27, %29, %cst_21 {dimension_numbers = #tpu.dot_dimension_numbers<[1], [0], [0], [1], [0, 0, 1, 1], [], []>} : vector<128x32xbf16>, vector<32x32xbf16>, vector<128x32xf32> -> vector<128x32xf32>
    %c2_22 = arith.constant 2 : index
    %c0_23 = arith.constant 0 : index
    %31 = vector.load %arg5[%c2_22, %c0_23] : memref<3x32xf32, #tpu.memory_space<vmem>>, vector<1x32xf32>
    %32 = vector.broadcast %31 : vector<1x32xf32> to vector<128x32xf32>
    %33 = arith.addf %30, %32 : vector<128x32xf32>
    %34 = arith.truncf %33 : vector<128x32xf32> to vector<128x32xbf16>
    %c0_24 = arith.constant 0 : index
    %c0_25 = arith.constant 0 : index
    %35 = vector.load %arg6[%c0_24, %c0_25] : memref<32x512xbf16, #tpu.memory_space<vmem>>, vector<32x512xbf16>
    %cst_26 = arith.constant dense<0.000000e+00> : vector<128x512xf32>
    %36 = tpu.matmul %34, %35, %cst_26 {dimension_numbers = #tpu.dot_dimension_numbers<[1], [0], [0], [1], [0, 0, 1, 1], [], []>} : vector<128x32xbf16>, vector<32x512xbf16>, vector<128x512xf32> -> vector<128x512xf32>
    %c0_27 = arith.constant 0 : index
    %c0_28 = arith.constant 0 : index
    %37 = vector.load %arg7[%c0_27, %c0_28] : memref<1x512xf32, #tpu.memory_space<vmem>>, vector<1x512xf32>
    %38 = vector.broadcast %37 : vector<1x512xf32> to vector<128x512xf32>
    %39 = arith.addf %36, %38 : vector<128x512xf32>
    %40 = tpu.iota {dimensions = array<i32: 1>} : vector<128x128xi32>
    %c0_29 = arith.constant 0 : index
    %c0_30 = arith.constant 0 : index
    %41 = vector.load %arg14[%c0_29, %c0_30] : memref<128x4xf32, #tpu.memory_space<vmem>>, vector<128x4xf32>
    %42 = vector.extract_strided_slice %39 {offsets = [0, 0], sizes = [128, 128], strides = [1, 1]} : vector<128x512xf32> to vector<128x128xf32>
    %cst_31 = arith.constant 0.000000e+00 : f32
    %43 = vector.broadcast %cst_31 : f32 to vector<128x128xf32>
    %44 = arith.maximumf %42, %43 : vector<128x128xf32>
    %45 = arith.truncf %44 : vector<128x128xf32> to vector<128x128xbf16>
    %c0_32 = arith.constant 0 : index
    %c0_33 = arith.constant 0 : index
    %c0_34 = arith.constant 0 : index
    %46 = vector.load %arg9[%c0_32, %c0_33, %c0_34] : memref<4x128x128xbf16, #tpu.memory_space<vmem>>, vector<1x128x128xbf16>
    %47 = vector.shape_cast %46 : vector<1x128x128xbf16> to vector<128x128xbf16>
    %cst_35 = arith.constant dense<0.000000e+00> : vector<128x128xf32>
    %48 = tpu.matmul %45, %47, %cst_35 {dimension_numbers = #tpu.dot_dimension_numbers<[1], [0], [0], [1], [0, 0, 1, 1], [], []>} : vector<128x128xbf16>, vector<128x128xbf16>, vector<128x128xf32> -> vector<128x128xf32>
    %c0_36 = arith.constant 0 : index
    %c0_37 = arith.constant 0 : index
    %49 = vector.load %arg10[%c0_36, %c0_37] : memref<4x128xf32, #tpu.memory_space<vmem>>, vector<1x128xf32>
    %50 = vector.broadcast %49 : vector<1x128xf32> to vector<128x128xf32>
    %51 = arith.addf %48, %50 : vector<128x128xf32>
    %c0_38 = arith.constant 0 : index
    %c0_39 = arith.constant 0 : index
    %52 = vector.load %arg13[%c0_38, %c0_39] : memref<128x512xf32, #tpu.memory_space<vmem>>, vector<128x128xf32>
    %53 = arith.addf %51, %52 : vector<128x128xf32>
    %cst_40 = arith.constant dense<0xFF800000> : vector<128xf32>
    %54 = vector.multi_reduction <maximumf>, %53, %cst_40 [1] : vector<128x128xf32> to vector<128xf32>
    %55 = vector.shape_cast %54 : vector<128xf32> to vector<128x1xf32>
    %56 = vector.broadcast %55 : vector<128x1xf32> to vector<128x128xf32>
    %57 = arith.cmpf oge, %53, %56 : vector<128x128xf32>
    %c128_i32 = arith.constant 128 : i32
    %58 = vector.broadcast %c128_i32 : i32 to vector<128x128xi32>
    %59 = arith.select %57, %40, %58 : vector<128x128xi1>, vector<128x128xi32>
    %cst_41 = arith.constant dense<2147483647> : vector<128xi32>
    %60 = vector.multi_reduction <minsi>, %59, %cst_41 [1] : vector<128x128xi32> to vector<128xi32>
    %61 = vector.shape_cast %60 : vector<128xi32> to vector<128x1xi32>
    %62 = arith.sitofp %61 : vector<128x1xi32> to vector<128x1xf32>
    %63 = vector.extract_strided_slice %41 {offsets = [0, 0], sizes = [128, 1], strides = [1, 1]} : vector<128x4xf32> to vector<128x1xf32>
    %64 = arith.addf %62, %63 : vector<128x1xf32>
    %cst_42 = arith.constant 2.500000e-02 : f32
    %65 = vector.broadcast %cst_42 : f32 to vector<128x1xf32>
    %66 = arith.mulf %64, %65 : vector<128x1xf32>
    %cst_43 = arith.constant -1.000000e+00 : f32
    %67 = vector.broadcast %cst_43 : f32 to vector<128x1xf32>
    %68 = arith.addf %67, %66 : vector<128x1xf32>
    %69 = vector.extract_strided_slice %39 {offsets = [0, 128], sizes = [128, 128], strides = [1, 1]} : vector<128x512xf32> to vector<128x128xf32>
    %c0_44 = arith.constant 0 : index
    %c0_45 = arith.constant 0 : index
    %c0_46 = arith.constant 0 : index
    %70 = vector.load %arg11[%c0_44, %c0_45, %c0_46] : memref<3x3x128xf32, #tpu.memory_space<vmem>>, vector<1x3x128xf32>
    %71 = vector.shape_cast %70 : vector<1x3x128xf32> to vector<3x128xf32>
    %c0_47 = arith.constant 0 : index
    %c0_48 = arith.constant 0 : index
    %72 = vector.load %arg12[%c0_47, %c0_48] : memref<3x128xf32, #tpu.memory_space<vmem>>, vector<1x128xf32>
    %73 = vector.extract_strided_slice %71 {offsets = [0, 0], sizes = [1, 128], strides = [1, 1]} : vector<3x128xf32> to vector<1x128xf32>
    %74 = vector.broadcast %68 : vector<128x1xf32> to vector<128x128xf32>
    %75 = vector.broadcast %73 : vector<1x128xf32> to vector<128x128xf32>
    %76 = arith.mulf %74, %75 : vector<128x128xf32>
    %77 = vector.broadcast %72 : vector<1x128xf32> to vector<128x128xf32>
    %78 = arith.addf %77, %76 : vector<128x128xf32>
    %79 = arith.truncf %78 : vector<128x128xf32> to vector<128x128xbf16>
    %c1_49 = arith.constant 1 : index
    %c0_50 = arith.constant 0 : index
    %c0_51 = arith.constant 0 : index
    %80 = vector.load %arg8[%c1_49, %c0_50, %c0_51] : memref<4x128x128xbf16, #tpu.memory_space<vmem>>, vector<1x128x128xbf16>
    %81 = vector.shape_cast %80 : vector<1x128x128xbf16> to vector<128x128xbf16>
    %cst_52 = arith.constant dense<0.000000e+00> : vector<128x128xf32>
    %82 = tpu.matmul %79, %81, %cst_52 {dimension_numbers = #tpu.dot_dimension_numbers<[1], [0], [0], [1], [0, 0, 1, 1], [], []>} : vector<128x128xbf16>, vector<128x128xbf16>, vector<128x128xf32> -> vector<128x128xf32>
    %83 = arith.addf %69, %82 : vector<128x128xf32>
    %cst_53 = arith.constant 0.000000e+00 : f32
    %84 = vector.broadcast %cst_53 : f32 to vector<128x128xf32>
    %85 = arith.maximumf %83, %84 : vector<128x128xf32>
    %86 = arith.truncf %85 : vector<128x128xf32> to vector<128x128xbf16>
    %c1_54 = arith.constant 1 : index
    %c0_55 = arith.constant 0 : index
    %c0_56 = arith.constant 0 : index
    %87 = vector.load %arg9[%c1_54, %c0_55, %c0_56] : memref<4x128x128xbf16, #tpu.memory_space<vmem>>, vector<1x128x128xbf16>
    %88 = vector.shape_cast %87 : vector<1x128x128xbf16> to vector<128x128xbf16>
    %cst_57 = arith.constant dense<0.000000e+00> : vector<128x128xf32>
    %89 = tpu.matmul %86, %88, %cst_57 {dimension_numbers = #tpu.dot_dimension_numbers<[1], [0], [0], [1], [0, 0, 1, 1], [], []>} : vector<128x128xbf16>, vector<128x128xbf16>, vector<128x128xf32> -> vector<128x128xf32>
    %c1_58 = arith.constant 1 : index
    %c0_59 = arith.constant 0 : index
    %90 = vector.load %arg10[%c1_58, %c0_59] : memref<4x128xf32, #tpu.memory_space<vmem>>, vector<1x128xf32>
    %91 = vector.broadcast %90 : vector<1x128xf32> to vector<128x128xf32>
    %92 = arith.addf %89, %91 : vector<128x128xf32>
    %c0_60 = arith.constant 0 : index
    %c128 = arith.constant 128 : index
    %93 = vector.load %arg13[%c0_60, %c128] : memref<128x512xf32, #tpu.memory_space<vmem>>, vector<128x128xf32>
    %94 = arith.addf %92, %93 : vector<128x128xf32>
    %cst_61 = arith.constant dense<0xFF800000> : vector<128xf32>
    %95 = vector.multi_reduction <maximumf>, %94, %cst_61 [1] : vector<128x128xf32> to vector<128xf32>
    %96 = vector.shape_cast %95 : vector<128xf32> to vector<128x1xf32>
    %97 = vector.broadcast %96 : vector<128x1xf32> to vector<128x128xf32>
    %98 = arith.cmpf oge, %94, %97 : vector<128x128xf32>
    %c128_i32_62 = arith.constant 128 : i32
    %99 = vector.broadcast %c128_i32_62 : i32 to vector<128x128xi32>
    %100 = arith.select %98, %40, %99 : vector<128x128xi1>, vector<128x128xi32>
    %cst_63 = arith.constant dense<2147483647> : vector<128xi32>
    %101 = vector.multi_reduction <minsi>, %100, %cst_63 [1] : vector<128x128xi32> to vector<128xi32>
    %102 = vector.shape_cast %101 : vector<128xi32> to vector<128x1xi32>
    %103 = arith.sitofp %102 : vector<128x1xi32> to vector<128x1xf32>
    %104 = vector.extract_strided_slice %41 {offsets = [0, 1], sizes = [128, 1], strides = [1, 1]} : vector<128x4xf32> to vector<128x1xf32>
    %105 = arith.addf %103, %104 : vector<128x1xf32>
    %cst_64 = arith.constant 2.500000e-02 : f32
    %106 = vector.broadcast %cst_64 : f32 to vector<128x1xf32>
    %107 = arith.mulf %105, %106 : vector<128x1xf32>
    %cst_65 = arith.constant -1.000000e+00 : f32
    %108 = vector.broadcast %cst_65 : f32 to vector<128x1xf32>
    %109 = arith.addf %108, %107 : vector<128x1xf32>
    %110 = vector.extract_strided_slice %39 {offsets = [0, 256], sizes = [128, 128], strides = [1, 1]} : vector<128x512xf32> to vector<128x128xf32>
    %c1_66 = arith.constant 1 : index
    %c0_67 = arith.constant 0 : index
    %c0_68 = arith.constant 0 : index
    %111 = vector.load %arg11[%c1_66, %c0_67, %c0_68] : memref<3x3x128xf32, #tpu.memory_space<vmem>>, vector<1x3x128xf32>
    %112 = vector.shape_cast %111 : vector<1x3x128xf32> to vector<3x128xf32>
    %c1_69 = arith.constant 1 : index
    %c0_70 = arith.constant 0 : index
    %113 = vector.load %arg12[%c1_69, %c0_70] : memref<3x128xf32, #tpu.memory_space<vmem>>, vector<1x128xf32>
    %114 = vector.extract_strided_slice %112 {offsets = [0, 0], sizes = [1, 128], strides = [1, 1]} : vector<3x128xf32> to vector<1x128xf32>
    %115 = vector.broadcast %68 : vector<128x1xf32> to vector<128x128xf32>
    %116 = vector.broadcast %114 : vector<1x128xf32> to vector<128x128xf32>
    %117 = arith.mulf %115, %116 : vector<128x128xf32>
    %118 = vector.broadcast %113 : vector<1x128xf32> to vector<128x128xf32>
    %119 = arith.addf %118, %117 : vector<128x128xf32>
    %120 = vector.extract_strided_slice %112 {offsets = [1, 0], sizes = [1, 128], strides = [1, 1]} : vector<3x128xf32> to vector<1x128xf32>
    %121 = vector.broadcast %109 : vector<128x1xf32> to vector<128x128xf32>
    %122 = vector.broadcast %120 : vector<1x128xf32> to vector<128x128xf32>
    %123 = arith.mulf %121, %122 : vector<128x128xf32>
    %124 = arith.addf %119, %123 : vector<128x128xf32>
    %125 = arith.truncf %124 : vector<128x128xf32> to vector<128x128xbf16>
    %c2_71 = arith.constant 2 : index
    %c0_72 = arith.constant 0 : index
    %c0_73 = arith.constant 0 : index
    %126 = vector.load %arg8[%c2_71, %c0_72, %c0_73] : memref<4x128x128xbf16, #tpu.memory_space<vmem>>, vector<1x128x128xbf16>
    %127 = vector.shape_cast %126 : vector<1x128x128xbf16> to vector<128x128xbf16>
    %cst_74 = arith.constant dense<0.000000e+00> : vector<128x128xf32>
    %128 = tpu.matmul %125, %127, %cst_74 {dimension_numbers = #tpu.dot_dimension_numbers<[1], [0], [0], [1], [0, 0, 1, 1], [], []>} : vector<128x128xbf16>, vector<128x128xbf16>, vector<128x128xf32> -> vector<128x128xf32>
    %129 = arith.addf %110, %128 : vector<128x128xf32>
    %cst_75 = arith.constant 0.000000e+00 : f32
    %130 = vector.broadcast %cst_75 : f32 to vector<128x128xf32>
    %131 = arith.maximumf %129, %130 : vector<128x128xf32>
    %132 = arith.truncf %131 : vector<128x128xf32> to vector<128x128xbf16>
    %c2_76 = arith.constant 2 : index
    %c0_77 = arith.constant 0 : index
    %c0_78 = arith.constant 0 : index
    %133 = vector.load %arg9[%c2_76, %c0_77, %c0_78] : memref<4x128x128xbf16, #tpu.memory_space<vmem>>, vector<1x128x128xbf16>
    %134 = vector.shape_cast %133 : vector<1x128x128xbf16> to vector<128x128xbf16>
    %cst_79 = arith.constant dense<0.000000e+00> : vector<128x128xf32>
    %135 = tpu.matmul %132, %134, %cst_79 {dimension_numbers = #tpu.dot_dimension_numbers<[1], [0], [0], [1], [0, 0, 1, 1], [], []>} : vector<128x128xbf16>, vector<128x128xbf16>, vector<128x128xf32> -> vector<128x128xf32>
    %c2_80 = arith.constant 2 : index
    %c0_81 = arith.constant 0 : index
    %136 = vector.load %arg10[%c2_80, %c0_81] : memref<4x128xf32, #tpu.memory_space<vmem>>, vector<1x128xf32>
    %137 = vector.broadcast %136 : vector<1x128xf32> to vector<128x128xf32>
    %138 = arith.addf %135, %137 : vector<128x128xf32>
    %c0_82 = arith.constant 0 : index
    %c256 = arith.constant 256 : index
    %139 = vector.load %arg13[%c0_82, %c256] : memref<128x512xf32, #tpu.memory_space<vmem>>, vector<128x128xf32>
    %140 = arith.addf %138, %139 : vector<128x128xf32>
    %cst_83 = arith.constant dense<0xFF800000> : vector<128xf32>
    %141 = vector.multi_reduction <maximumf>, %140, %cst_83 [1] : vector<128x128xf32> to vector<128xf32>
    %142 = vector.shape_cast %141 : vector<128xf32> to vector<128x1xf32>
    %143 = vector.broadcast %142 : vector<128x1xf32> to vector<128x128xf32>
    %144 = arith.cmpf oge, %140, %143 : vector<128x128xf32>
    %c128_i32_84 = arith.constant 128 : i32
    %145 = vector.broadcast %c128_i32_84 : i32 to vector<128x128xi32>
    %146 = arith.select %144, %40, %145 : vector<128x128xi1>, vector<128x128xi32>
    %cst_85 = arith.constant dense<2147483647> : vector<128xi32>
    %147 = vector.multi_reduction <minsi>, %146, %cst_85 [1] : vector<128x128xi32> to vector<128xi32>
    %148 = vector.shape_cast %147 : vector<128xi32> to vector<128x1xi32>
    %149 = arith.sitofp %148 : vector<128x1xi32> to vector<128x1xf32>
    %150 = vector.extract_strided_slice %41 {offsets = [0, 2], sizes = [128, 1], strides = [1, 1]} : vector<128x4xf32> to vector<128x1xf32>
    %151 = arith.addf %149, %150 : vector<128x1xf32>
    %cst_86 = arith.constant 2.500000e-02 : f32
    %152 = vector.broadcast %cst_86 : f32 to vector<128x1xf32>
    %153 = arith.mulf %151, %152 : vector<128x1xf32>
    %cst_87 = arith.constant -1.000000e+00 : f32
    %154 = vector.broadcast %cst_87 : f32 to vector<128x1xf32>
    %155 = arith.addf %154, %153 : vector<128x1xf32>
    %156 = vector.extract_strided_slice %39 {offsets = [0, 384], sizes = [128, 128], strides = [1, 1]} : vector<128x512xf32> to vector<128x128xf32>
    %c2_88 = arith.constant 2 : index
    %c0_89 = arith.constant 0 : index
    %c0_90 = arith.constant 0 : index
    %157 = vector.load %arg11[%c2_88, %c0_89, %c0_90] : memref<3x3x128xf32, #tpu.memory_space<vmem>>, vector<1x3x128xf32>
    %158 = vector.shape_cast %157 : vector<1x3x128xf32> to vector<3x128xf32>
    %c2_91 = arith.constant 2 : index
    %c0_92 = arith.constant 0 : index
    %159 = vector.load %arg12[%c2_91, %c0_92] : memref<3x128xf32, #tpu.memory_space<vmem>>, vector<1x128xf32>
    %160 = vector.extract_strided_slice %158 {offsets = [0, 0], sizes = [1, 128], strides = [1, 1]} : vector<3x128xf32> to vector<1x128xf32>
    %161 = vector.broadcast %68 : vector<128x1xf32> to vector<128x128xf32>
    %162 = vector.broadcast %160 : vector<1x128xf32> to vector<128x128xf32>
    %163 = arith.mulf %161, %162 : vector<128x128xf32>
    %164 = vector.broadcast %159 : vector<1x128xf32> to vector<128x128xf32>
    %165 = arith.addf %164, %163 : vector<128x128xf32>
    %166 = vector.extract_strided_slice %158 {offsets = [1, 0], sizes = [1, 128], strides = [1, 1]} : vector<3x128xf32> to vector<1x128xf32>
    %167 = vector.broadcast %109 : vector<128x1xf32> to vector<128x128xf32>
    %168 = vector.broadcast %166 : vector<1x128xf32> to vector<128x128xf32>
    %169 = arith.mulf %167, %168 : vector<128x128xf32>
    %170 = arith.addf %165, %169 : vector<128x128xf32>
    %171 = vector.extract_strided_slice %158 {offsets = [2, 0], sizes = [1, 128], strides = [1, 1]} : vector<3x128xf32> to vector<1x128xf32>
    %172 = vector.broadcast %155 : vector<128x1xf32> to vector<128x128xf32>
    %173 = vector.broadcast %171 : vector<1x128xf32> to vector<128x128xf32>
    %174 = arith.mulf %172, %173 : vector<128x128xf32>
    %175 = arith.addf %170, %174 : vector<128x128xf32>
    %176 = arith.truncf %175 : vector<128x128xf32> to vector<128x128xbf16>
    %c3 = arith.constant 3 : index
    %c0_93 = arith.constant 0 : index
    %c0_94 = arith.constant 0 : index
    %177 = vector.load %arg8[%c3, %c0_93, %c0_94] : memref<4x128x128xbf16, #tpu.memory_space<vmem>>, vector<1x128x128xbf16>
    %178 = vector.shape_cast %177 : vector<1x128x128xbf16> to vector<128x128xbf16>
    %cst_95 = arith.constant dense<0.000000e+00> : vector<128x128xf32>
    %179 = tpu.matmul %176, %178, %cst_95 {dimension_numbers = #tpu.dot_dimension_numbers<[1], [0], [0], [1], [0, 0, 1, 1], [], []>} : vector<128x128xbf16>, vector<128x128xbf16>, vector<128x128xf32> -> vector<128x128xf32>
    %180 = arith.addf %156, %179 : vector<128x128xf32>
    %cst_96 = arith.constant 0.000000e+00 : f32
    %181 = vector.broadcast %cst_96 : f32 to vector<128x128xf32>
    %182 = arith.maximumf %180, %181 : vector<128x128xf32>
    %183 = arith.truncf %182 : vector<128x128xf32> to vector<128x128xbf16>
    %c3_97 = arith.constant 3 : index
    %c0_98 = arith.constant 0 : index
    %c0_99 = arith.constant 0 : index
    %184 = vector.load %arg9[%c3_97, %c0_98, %c0_99] : memref<4x128x128xbf16, #tpu.memory_space<vmem>>, vector<1x128x128xbf16>
    %185 = vector.shape_cast %184 : vector<1x128x128xbf16> to vector<128x128xbf16>
    %cst_100 = arith.constant dense<0.000000e+00> : vector<128x128xf32>
    %186 = tpu.matmul %183, %185, %cst_100 {dimension_numbers = #tpu.dot_dimension_numbers<[1], [0], [0], [1], [0, 0, 1, 1], [], []>} : vector<128x128xbf16>, vector<128x128xbf16>, vector<128x128xf32> -> vector<128x128xf32>
    %c3_101 = arith.constant 3 : index
    %c0_102 = arith.constant 0 : index
    %187 = vector.load %arg10[%c3_101, %c0_102] : memref<4x128xf32, #tpu.memory_space<vmem>>, vector<1x128xf32>
    %188 = vector.broadcast %187 : vector<1x128xf32> to vector<128x128xf32>
    %189 = arith.addf %186, %188 : vector<128x128xf32>
    %c0_103 = arith.constant 0 : index
    %c384 = arith.constant 384 : index
    %190 = vector.load %arg13[%c0_103, %c384] : memref<128x512xf32, #tpu.memory_space<vmem>>, vector<128x128xf32>
    %191 = arith.addf %189, %190 : vector<128x128xf32>
    %cst_104 = arith.constant dense<0xFF800000> : vector<128xf32>
    %192 = vector.multi_reduction <maximumf>, %191, %cst_104 [1] : vector<128x128xf32> to vector<128xf32>
    %193 = vector.shape_cast %192 : vector<128xf32> to vector<128x1xf32>
    %194 = vector.broadcast %193 : vector<128x1xf32> to vector<128x128xf32>
    %195 = arith.cmpf oge, %191, %194 : vector<128x128xf32>
    %c128_i32_105 = arith.constant 128 : i32
    %196 = vector.broadcast %c128_i32_105 : i32 to vector<128x128xi32>
    %197 = arith.select %195, %40, %196 : vector<128x128xi1>, vector<128x128xi32>
    %cst_106 = arith.constant dense<2147483647> : vector<128xi32>
    %198 = vector.multi_reduction <minsi>, %197, %cst_106 [1] : vector<128x128xi32> to vector<128xi32>
    %199 = vector.shape_cast %198 : vector<128xi32> to vector<128x1xi32>
    %200 = arith.sitofp %199 : vector<128x1xi32> to vector<128x1xf32>
    %201 = vector.extract_strided_slice %41 {offsets = [0, 3], sizes = [128, 1], strides = [1, 1]} : vector<128x4xf32> to vector<128x1xf32>
    %202 = arith.addf %200, %201 : vector<128x1xf32>
    %cst_107 = arith.constant 2.500000e-02 : f32
    %203 = vector.broadcast %cst_107 : f32 to vector<128x1xf32>
    %204 = arith.mulf %202, %203 : vector<128x1xf32>
    %cst_108 = arith.constant -1.000000e+00 : f32
    %205 = vector.broadcast %cst_108 : f32 to vector<128x1xf32>
    %206 = arith.addf %205, %204 : vector<128x1xf32>
    %cst_109 = arith.constant 0.000000e+00 : f32
    %207 = vector.broadcast %cst_109 : f32 to vector<128x124xf32>
    %208 = tpu.concatenate %68, %109, %155, %206, %207 in 1 : vector<128x1xf32>, vector<128x1xf32>, vector<128x1xf32>, vector<128x1xf32>, vector<128x124xf32> -> vector<128x128xf32>
    %c0_110 = arith.constant 0 : index
    %c0_111 = arith.constant 0 : index
    %209 = vector.load %arg15[%c0_110, %c0_111] : memref<128x128xf32, #tpu.memory_space<vmem>>, vector<128x128xf32>
    tpu.vector_store %arg15[%c0_110, %c0_111], %208 {strides = array<i32>} : memref<128x128xf32, #tpu.memory_space<vmem>>, vector<128x128xf32>,
    return
  }
  func.func @transform_0(%arg0: i32) -> (i32, i32) {
    %c0_i32 = arith.constant 0 : i32
    %c0_i32_0 = arith.constant 0 : i32
    return %arg0, %c0_i32 : i32, i32
  }
  func.func @transform_1(%arg0: i32) -> (i32, i32) {
    %c0_i32 = arith.constant 0 : i32
    %c0_i32_0 = arith.constant 0 : i32
    %c0_i32_1 = arith.constant 0 : i32
    return %c0_i32, %c0_i32_0 : i32, i32
  }
  func.func @transform_2(%arg0: i32) -> (i32, i32) {
    %c0_i32 = arith.constant 0 : i32
    %c0_i32_0 = arith.constant 0 : i32
    %c0_i32_1 = arith.constant 0 : i32
    return %c0_i32, %c0_i32_0 : i32, i32
  }
  func.func @transform_3(%arg0: i32) -> (i32, i32, i32) {
    %c0_i32 = arith.constant 0 : i32
    %c0_i32_0 = arith.constant 0 : i32
    %c0_i32_1 = arith.constant 0 : i32
    %c0_i32_2 = arith.constant 0 : i32
    return %c0_i32, %c0_i32_0, %c0_i32_1 : i32, i32, i32
  }
  func.func @transform_4(%arg0: i32) -> (i32, i32) {
    %c0_i32 = arith.constant 0 : i32
    %c0_i32_0 = arith.constant 0 : i32
    %c0_i32_1 = arith.constant 0 : i32
    return %c0_i32, %c0_i32_0 : i32, i32
  }
  func.func @transform_5(%arg0: i32) -> (i32, i32) {
    %c0_i32 = arith.constant 0 : i32
    %c0_i32_0 = arith.constant 0 : i32
    %c0_i32_1 = arith.constant 0 : i32
    return %c0_i32, %c0_i32_0 : i32, i32
  }
  func.func @transform_6(%arg0: i32) -> (i32, i32) {
    %c0_i32 = arith.constant 0 : i32
    %c0_i32_0 = arith.constant 0 : i32
    %c0_i32_1 = arith.constant 0 : i32
    return %c0_i32, %c0_i32_0 : i32, i32
  }
  func.func @transform_7(%arg0: i32) -> (i32, i32, i32) {
    %c0_i32 = arith.constant 0 : i32
    %c0_i32_0 = arith.constant 0 : i32
    %c0_i32_1 = arith.constant 0 : i32
    %c0_i32_2 = arith.constant 0 : i32
    return %c0_i32, %c0_i32_0, %c0_i32_1 : i32, i32, i32
  }
  func.func @transform_8(%arg0: i32) -> (i32, i32, i32) {
    %c0_i32 = arith.constant 0 : i32
    %c0_i32_0 = arith.constant 0 : i32
    %c0_i32_1 = arith.constant 0 : i32
    %c0_i32_2 = arith.constant 0 : i32
    return %c0_i32, %c0_i32_0, %c0_i32_1 : i32, i32, i32
  }
  func.func @transform_9(%arg0: i32) -> (i32, i32) {
    %c0_i32 = arith.constant 0 : i32
    %c0_i32_0 = arith.constant 0 : i32
    %c0_i32_1 = arith.constant 0 : i32
    return %c0_i32, %c0_i32_0 : i32, i32
  }
  func.func @transform_10(%arg0: i32) -> (i32, i32, i32) {
    %c0_i32 = arith.constant 0 : i32
    %c0_i32_0 = arith.constant 0 : i32
    %c0_i32_1 = arith.constant 0 : i32
    %c0_i32_2 = arith.constant 0 : i32
    return %c0_i32, %c0_i32_0, %c0_i32_1 : i32, i32, i32
  }
  func.func @transform_11(%arg0: i32) -> (i32, i32) {
    %c0_i32 = arith.constant 0 : i32
    %c0_i32_0 = arith.constant 0 : i32
    %c0_i32_1 = arith.constant 0 : i32
    return %c0_i32, %c0_i32_0 : i32, i32
  }
  func.func @transform_12(%arg0: i32) -> (i32, i32) {
    %c0_i32 = arith.constant 0 : i32
    %c0_i32_0 = arith.constant 0 : i32
    return %arg0, %c0_i32 : i32, i32
  }
  func.func @transform_13(%arg0: i32) -> (i32, i32) {
    %c0_i32 = arith.constant 0 : i32
    %c0_i32_0 = arith.constant 0 : i32
    return %arg0, %c0_i32 : i32, i32
  }
  func.func @transform_14(%arg0: i32) -> (i32, i32) {
    %c0_i32 = arith.constant 0 : i32
    %c0_i32_0 = arith.constant 0 : i32
    return %arg0, %c0_i32 : i32, i32
  }
}

</mosaic_0001>

<bundles_post_ra>
// kernel: tpu_custom_call.1
= control target key start
LH: loop header
LB: loop body
LE: loop exit
PB: predicated region body
PF: predicated region fallthrough
CT: control target
= control target key end

     0   :  { %s8932_s0 = inlined_call_operand.vmem [shape: f32[256,16], index: 0, kind: input, shape index: {}]   ;;  %s8933_s1 = inlined_call_operand.vmem [shape: bf16[16,32], index: 1, kind: input, shape index: {}]   ;;  %s8934_s2 = inlined_call_operand.vmem [shape: f32[1,32], index: 2, kind: input, shape index: {}]   ;;  %s8935_s3 = inlined_call_operand.hbm [shape: bf16[3,32,32], index: 3, kind: input, shape index: {}]   ;;  %s8936_s4 = inlined_call_operand.vmem [shape: f32[3,32], index: 4, kind: input, shape index: {}]   ;;  %s8937_s5 = inlined_call_operand.hbm [shape: bf16[32,512], index: 5, kind: input, shape index: {}]   ;;  %s8938_s6 = inlined_call_operand.vmem [shape: f32[1,512], index: 6, kind: input, shape index: {}]   ;;  %s8939_s7 = inlined_call_operand.vmem [shape: bf16[4,128,128], index: 7, kind: input, shape index: {}]   ;;  %s8940_s8 = inlined_call_operand.vmem [shape: bf16[4,128,128], index: 8, kind: input, shape index: {}]   ;;  %s8941_s9 = inlined_call_operand.vmem [shape: f32[4,128], index: 9, kind: input, shape index: {}]   ;;  %s8942_s10 = inlined_call_operand.vmem [shape: f32[3,3,128], index: 10, kind: input, shape index: {}]   ;;  %s8943_s11 = inlined_call_operand.vmem [shape: f32[3,128], index: 11, kind: input, shape index: {}]   ;;  %s8944_s12 = inlined_call_operand.hbm [shape: f32[256,512], index: 12, kind: input, shape index: {}]   ;;  %s8945_s13 = inlined_call_operand.vmem [shape: f32[256,4], index: 13, kind: input, shape index: {}]   ;;  %s8946_s14 = inlined_call_operand.hbm [shape: f32[256,128], index: 14, kind: output, shape index: {}]  }
   0x1   :  { %9011 = sst [smem:[#allocation92_spill]] %s8935_s3 }
   0x2   :  { %9012 = sst [smem:[#allocation93_spill]] %s8939_s7 }
   0x3   :  { %9013 = sst [smem:[#allocation94_spill]] %s8942_s10 }
   0x4   :  { %9014 = sst [smem:[#allocation95_spill]] %s8943_s11 }
   0x5   :  { %9015 = sst [smem:[#allocation96_spill]] %s8945_s13 }
   0x6   :  { %9016 = sst [smem:[#allocation97_spill]] %s8946_s14 }
   0x7   :  { %19 = vsyncpa [#allocation3], 0 }
   0x8   :  { %20 = vsyncpa [#allocation6], 0 }
   0x9   :  { %21 = vsyncpa [#allocation4], 0 }
   0xa   :  { %23 = vsyncpa [#allocation4 + $0x1], 0  ;;  %s6287_s29 = smov 0   ;;  %s6289_s30 = smov 0  }
   0xb   :  { %s6291_s15 = smov 0   ;;  %s6293_s16 = smov 0  }
   0xc LB: > { %9017 = sst [smem:[#allocation13_spill]] %s6183_s29  ;;  %s6308_s17 = sadd.s32 4294967295, %s6195_s16   ;;  %s6195_s16 = sphi %s6293_s16, %s9201_s16   ;;  %s6191_s15 = sphi %s6291_s15, %s9205_s15   ;;  %s6187_s30 = sphi %s6289_s30, %s9204_s30   ;;  %s6183_s29 = sphi %s6287_s29, %s9203_s29  }
   0xd   : > { %s5116_s18 = sadd.s32 4294967294, %s6195_s16   ;;  %s6312_s19 = sadd.s32 1, %s6195_s16  }
   0xe   : > { %9018 = sst [smem:[#allocation14_spill]] %s6312_s19  ;;  %s293_s20 = sadd.s32 1, %s6191_s15 }
   0xf   : > { %s290_s21 = ssub.s32 %s6195_s16, %s6312_s19  ;;  %p300_p0 = scmp.ne.s32.totalorder %s6191_s15, %s6187_s30 }
  0x10   : > { %p291_p1 = scmp.eq.s32.totalorder %s290_s21, 0  ;;  %p301_p2 = scmp.eq.s32.totalorder %s6195_s16, 0 }
  0x11   : > { %p306_p3 = scmp.ne.s32.totalorder %s6187_s30, %s6183_s29  ;;  %p8955_p4 = scmp.eq.s32.totalorder %s6308_s17, 0 }
  0x12   : > { %s6324_s22 = scalar_select %p291_p1, %s6191_s15, %s293_s20  }
  0x13   : > { %p6326_p5 = por %p301_p2, %p300_p0  ;;  %p6332_p6 = por %p8955_p4, %p306_p3 }
  0x14   : > { %9019 = sst [smem:[#allocation15_spill]] %s6324_s22  ;;  %p356_p7 = scmp.eq.s32.totalorder %s6308_s17, 1 }
  0x15   : > { %s9020_s23 = scalar_select %p6326_p5, 1, 0 }
  0x16   : > { %s9021_s24 = scalar_select %p6332_p6, 1, 0 }
  0x17   : > { %p362_p8 = scmp.eq.s32.totalorder %s5116_s18, 1  ;;  %p5117_p9 = scmp.ge.s32.totalorder %s6195_s16, 1 }
  0x18   : > { %p369_p10 = scmp.lt.s32.totalorder %s6195_s16, 3  ;;  %p6339_p11 = por %p356_p7, %p300_p0 }
  0x19   : > { %p6343_p12 = por %p362_p8, %p306_p3  ;;  %s6197_s28 = smov [#allocation2]  }
  0x1a   : > { %s9022_s25 = scalar_select %p6339_p11, 1, 0 }
  0x1b   : > { %s9024_s26 = scalar_select %p6343_p12, 1, 0 }
  0x1c   : > { %9023 = sst [smem:[#allocation16_spill]] %s9022_s25  ;;  %p6347_p13 = pnand %p5117_p9, %p369_p10 }
  0x1d   : > { %9025 = sst [smem:[#allocation17_spill]] %s9024_s26  ;;  %s387_s20 = sshll.u32 %s6197_s28, 4  ;;  %s388_s20 = int_to_ptr.vmem [resolvable:$true] %s387_s20 }
  0x1e   : > { %s9026_s27 = scalar_select %p6347_p13, 1, 0 }
  0x1f   : > { %p5837_p1 = pneg %p6347_p13  ;;  %s6198_s21 = smov [#allocation5]  }
  0x20   : > { %s403_s22 = sshll.u32 %s6198_s21, 4  ;;  %s9028_s3 = sld [smem:[#allocation92_spill]]  ;;  %s404_s22 = int_to_ptr.vmem [resolvable:$true] %s403_s22 }
  0x21   : > { %p6355_p2 = pnand %p5837_p1, %p8955_p4 }
  0x23   : > { %p6037_p8 = pneg %p6355_p2 }
  0x26   : > { %s6035_s29 = scalar_lea.hbm %s9028_s3, 768 }
  0x27   : > { %p6036_p7 = scmp.ne.s32.totalorder %s9028_s3, %s6035_s29  ;;  %p6042_p1 = scmp.lt.u32.totalorder %s6035_s29, %s9028_s3 }
  0x29   : > { %p6038_p9 = pnand %p6037_p8, %p6036_p7 }
  0x2b   : > { %p6039_p10 = pneg %p6038_p9 }
  0x2d   : > { %p6044_p0 = pnand %p6042_p1, %p6039_p10 }
  0x2f   : > { %6047 = shalt.err (!%p6044_p0)
}
  0x30   : > { %s6048_s21 = scalar_lea.vmem %s388_s20, 768  ;;  %p6056_p11 = scmp.lt.s32.totalorder %s388_s20, %s388_s20 }
  0x31   : > { %p6049_p4 = scmp.ne.s32.totalorder %s388_s20, %s6048_s21  ;;  %p6057_p6 = scmp.lt.s32.totalorder %s6048_s21, %s6048_s21 }
  0x33   : > { %p6051_p3 = pnand %p6049_p4, %p6037_p8  ;;  %p6058_p13 = por %p6057_p6, %p6056_p11 }
  0x35   : > { %p6052_p12 = pneg %p6051_p3 }
  0x37   : > { %p6059_p5 = pnand %p6058_p13, %p6052_p12 }
  0x39   : > { %6062 = shalt.err (!%p6059_p5)
}
  0x3a   : > { %s6199_s14 = smov 64   ;;  %s6200_s11 = smov 4  }
  0x3b   : > { %5840 = dma.hbm_to_vmem [thread:$0]  (!%p6355_p2), %s9028_s3, 768, %s388_s20, [#allocation3], %s6199_s14, %s6199_s14, %s6200_s11  }
  0x3c   : > { %p9029_p0 = scmp.ne.s32.totalorder %s9020_s23, 0  ;;  %p9030_p4 = scmp.lt.s32.totalorder %s6195_s16, 2 }
  0x3d   : > { %s444_s26 = sand.u32 1, %s6195_s16   ;;  %s6063_s10 = scalar_lea.hbm %s8937_s5, 1024 }
  0x3e   : > { %p6387_p3 = pnand %p9030_p4, %p9029_p0  ;;  %p6064_p5 = scmp.ne.s32.totalorder %s8937_s5, %s6063_s10 }
  0x3f   : > { %p6070_p12 = scmp.lt.u32.totalorder %s6063_s10, %s8937_s5 }
  0x40   : > { %s9031_s25 = scalar_select %p6387_p3, 1, 0 }
  0x41   : > { %p6066_p6 = pnand %p6064_p5, %p6037_p8 }
  0x43   : > { %p6067_p11 = pneg %p6066_p6 }
  0x45   : > { %p6072_p13 = pnand %p6070_p12, %p6067_p11 }
  0x47   : > { %6075 = shalt.err (!%p6072_p13)
}
  0x48   : > { %s6076_s14 = scalar_lea.vmem %s404_s22, 1024  ;;  %p6084_p1 = scmp.lt.s32.totalorder %s404_s22, %s404_s22 }
  0x49   : > { %p6077_p7 = scmp.ne.s32.totalorder %s404_s22, %s6076_s14  ;;  %p6085_p0 = scmp.lt.s32.totalorder %s6076_s14, %s6076_s14 }
  0x4b   : > { %p6079_p9 = pnand %p6077_p7, %p6037_p8  ;;  %p6086_p4 = por %p6085_p0, %p6084_p1 }
  0x4d   : > { %p6080_p10 = pneg %p6079_p9 }
  0x4f   : > { %p6087_p3 = pnand %p6086_p4, %p6080_p10 }
  0x51   : > { %6090 = shalt.err (!%p6087_p3)
}
  0x52   : > { %s6201_s7 = smov 256   ;;  %s6202_s10 = smov 16  }
  0x53   : > { %5843 = dma.hbm_to_vmem [thread:$0]  (!%p6355_p2), %s8937_s5, 1024, %s404_s22, [#allocation6], %s6201_s7, %s6201_s7, %s6202_s10  }
  0x54   : > { %s446_s29 = sand.u32 1, %s6191_s15   ;;  %s5368_s28 = sshll.u32 %s6195_s16, 13 }
  0x55   : > { %s5121_s19 = sshll.u32 %s446_s29, 9  ;;  %s6417_s20 = scalar_lea.hbm %s8944_s12, %s5368_s28 }
  0x56   : > { %s448_s14 = scalar_lea.vmem [#allocation7], %s5121_s19  ;;  %s6421_s18 = scalar_lea.sflag [#allocation3], %s444_s26 }
  0x57   : > { %s456_s3 = sshll.u32 %s448_s14, 4  ;;  %s6091_s13 = scalar_lea.hbm %s6417_s20, 8192  ;;  %s6419_s3 = int_to_ptr.vmem [resolvable:$true] %s456_s3 }
  0x58   : > { %p6092_p2 = scmp.ne.s32.totalorder %s6417_s20, %s6091_s13  ;;  %p9032_p8 = scmp.ne.s32.totalorder %s9031_s25, 0 }
  0x59   : > { %s6096_s10 = scalar_lea.hbm %s8944_s12, 16384  ;;  %p6097_p11 = scmp.lt.u32.totalorder %s6417_s20, %s8944_s12 }
  0x5a   : > { %p6093_p3 = pneg %p9032_p8  ;;  %p6098_p12 = scmp.lt.u32.totalorder %s6096_s10, %s6091_s13 }
  0x5b   : > { %p6100_p7 = scmp.lt.u32.totalorder %s6091_s13, %s6417_s20 }
  0x5c   : > { %p6094_p5 = pnand %p6093_p3, %p6092_p2  ;;  %p6099_p13 = por %p6098_p12, %p6097_p11 }
  0x5e   : > { %p6095_p6 = pneg %p6094_p5  ;;  %p6101_p9 = por %p6100_p7, %p6099_p13 }
  0x60   : > { %p6102_p10 = pnand %p6101_p9, %p6095_p6 }
  0x62   : > { %6105 = shalt.err (!%p6102_p10)
}
  0x63   : > { %s6106_s26 = scalar_lea.vmem %s6419_s3, 8192  ;;  %s6203_s19 = smov [#allocation7]  }
  0x64   : > { %p6107_p1 = scmp.ne.s32.totalorder %s6419_s3, %s6106_s26  ;;  %s6111_s28 = sshll.u32 %s6203_s19, 4  ;;  %s6112_s28 = int_to_ptr.vmem [resolvable:$false] %s6111_s28 }
  0x65   : > { %s6113_s21 = scalar_lea.vmem %s6112_s28, 16384  ;;  %p6114_p2 = scmp.lt.s32.totalorder %s6419_s3, %s6112_s28 }
  0x66   : > { %p6109_p0 = pnand %p6107_p1, %p6093_p3  ;;  %p6115_p5 = scmp.lt.s32.totalorder %s6113_s21, %s6106_s26 }
  0x68   : > { %p6110_p4 = pneg %p6109_p0  ;;  %p6116_p11 = por %p6115_p5, %p6114_p2 }
  0x6a   : > { %p6117_p12 = pnand %p6116_p11, %p6110_p4 }
  0x6c   : > { %6120 = shalt.err (!%p6117_p12)
}
  0x6d   : > { %s6204_s23 = smov 512   ;;  %s6205_s14 = smov 32  }
  0x6e   : > { %5847 = dma.hbm_to_vmem [thread:$0]  (!%p9032_p8), %s6417_s20, 8192, %s6419_s3, %s6421_s18, %s6204_s23, %s6204_s23, %s6205_s14  }
  0x6f   : > { %p9033_p3 = scmp.ne.s32.totalorder %s9026_s27, 0 }
  0x71   : > { %477 = sbr.rel (%p9033_p3) target bundleno = 5082 (0x13da), region = 76 }
  0x78   : > { %p9034_p6 = scmp.eq.s32.totalorder %s6308_s17, 0 }
  0x7a   : > { %6166 = dma.done.wait (%p9034_p6), [#allocation3], 768   ;;  %p9035_p13 = pmov %p9034_p6 }
  0x7b   : > { %p9036_p7 = pmov %p9034_p6 }
  0x7c   : > { %6168 = vsyncadd (%p9035_p13), [#allocation3], 4294966528 }
  0x7d   : > { %6170 = dma.done.wait (%p9036_p7), [#allocation6], 1024   ;;  %p9037_p9 = pmov %p9034_p6 }
  0x7e   : > { %s487_s25 = sand.u32 1, %s6308_s17   ;;  %s6461_s3 = sand.u32 1, %s6187_s30  }
  0x7f   : > { %6172 = vsyncadd (%p9037_p9), [#allocation6], 4294966272  ;;  %s5128_s27 = sshll.u32 %s6461_s3, 9  ;;  %s488_s20 = scalar_lea.sflag [#allocation3], %s487_s25 }
  0x80   : > { %s6464_s18 = scalar_lea.vmem [#allocation7], %s5128_s27  ;;  %p9038_p8 = scmp.ne.s32.totalorder %s9021_s24, 0 }
  0x82   : > { %6174 = dma.done.wait (%p9038_p8), %s488_s20, 8192  }
  0x83   : > { %6176 = vsyncadd (%p9038_p8), %s488_s20, 4294959104  ;;  %s5130_s13 = sshll.u32 %s6308_s17, 4  ;;  %v5909_v0 = vld [vmem:[%s8933_s1] sm:$0xff]   ;;  %vm600_vm0 = vcmask 130048   ;;  %v5911_v26 = vld [vmem:[#allocation2 + $0x8] sm:$0xff]   ;;  %vm767_vm1 = vcmask 261120  }
  0x84   : > { %p547_p10 = scmp.lt.s32.totalorder %s5130_s13, 31  ;;  %5521 = vmatprep.subr.bf16.mxu0 %v5909_v0  ;;  %5823 = vmatprep.subr.bf16.mxu1 %v5909_v0  ;;  %v5910_v23 = vld [vmem:[#allocation2] sm:$0xff]   ;;  %v5912_v27 = vld [vmem:[#allocation2 + $0x10] sm:$0xff]   ;;  %s9070_s28 = sld [smem:[#allocation93_spill]] }
  0x85   : > { %5522 = vmatpush3.bf16.msra.mxu0 %v5909_v0  ;;  %5824 = vmatpush3.bf16.msra.mxu1 %v5909_v0  ;;  %v5134_v28 = vld [vmem:[%s8934_s2] ss:$0 sm:$0xff]  ;;  %s9071_s19 = sld [smem:[#allocation96_spill]]  ;;  %s9088_s25 = sld [smem:[#allocation94_spill]] }
  0x86   : > { %s9207_s13 = smov (!%p547_p10, %s5130_s13), 31  ;;  %5539 = vmatprep.subr.bf16.mxu1 %v5910_v23  ;;  %5559 = vmatprep.subr.bf16.mxu0 %v5912_v27  ;;  %s9091_s7 = sld [smem:[#allocation95_spill]] }
  0x87   : > { %s5131_s22 = sshll.u32 %s9207_s13, 3  ;;  %s5369_s13 = sshll.u32 %s6308_s17, 11 }
  0x88   : > { %s6479_s11 = scalar_lea.vmem %s8932_s0, %s5131_s22  ;;  %s9195_s14 = sld [smem:[#allocation97_spill]] }
  0x89   : > { %v561_v1 = vld [vmem:[%s6479_s11] sm:$0xff]  ;;  %v562_v2 = vld [vmem:[%s6479_s11 + $0x8] sm:$0xff]  ;;  %v563_v3 = vld [vmem:[%s6479_s11 + $0x10] sm:$0xff]  ;;  %s4987_s17 = scalar_lea.sflag [#allocation4], %s6461_s3  ;;  %s6209_s10 = smov [#allocation8]  }
  0x8a   : > { %v577_v4 = vpack.c.bf16 %v562_v2, %v561_v1  ;;  %v564_v5 = vld [vmem:[%s6479_s11 + $0x18] sm:$0xff]  ;;  %v565_v6 = vld [vmem:[%s6479_s11 + $0x20] sm:$0xff]  ;;  %v566_v7 = vld [vmem:[%s6479_s11 + $0x28] sm:$0xff] }
  0x8b   : > { %v578_v8 = vpack.c.bf16 %v564_v5, %v563_v3  ;;  %v579_v9 = vpack.c.bf16 %v566_v7, %v565_v6  ;;  %v569_v10 = vld [vmem:[%s6479_s11 + $0x40] sm:$0xff]  ;;  %v570_v11 = vld [vmem:[%s6479_s11 + $0x48] sm:$0xff]  ;;  %v571_v12 = vld [vmem:[%s6479_s11 + $0x50] sm:$0xff]  ;;  %s7066_s21 = scalar_lea.vmem %s9071_s19, %s5131_s22  ;;  %s9194_s19 = sld [smem:[#allocation16_spill]] }
  0x8c   : > { %5523 = vmatprep.mubr.msk.bf16.mxu0 %vm600_vm0, %v577_v4  ;;  %v572_v13 = vld [vmem:[%s6479_s11 + $0x58] sm:$0xff]  ;;  %v567_v14 = vld [vmem:[%s6479_s11 + $0x30] sm:$0xff]  ;;  %v581_v15 = vpack.c.bf16 %v570_v11, %v569_v10  ;;  %v573_v17 = vld [vmem:[%s6479_s11 + $0x60] sm:$0xff] }
  0x8d   : > { %v582_v16 = vpack.c.bf16 %v572_v13, %v571_v12  ;;  %v574_v18 = vld [vmem:[%s6479_s11 + $0x68] sm:$0xff]  ;;  %5524 = vmatmul.mubr.msk.bf16.vlgmr.msra.gmra.mrb[0].mxu0 %vm600_vm0, %v578_v8  ;;  %v568_v19 = vld [vmem:[%s6479_s11 + $0x38] sm:$0xff]  ;;  %v575_v21 = vld [vmem:[%s6479_s11 + $0x70] sm:$0xff] }
  0x8e   : > { %v583_v20 = vpack.c.bf16 %v574_v18, %v573_v17  ;;  %5527 = vmatprep.mubr.msk.bf16.mxu0 %vm600_vm0, %v579_v9  ;;  %5531 = vmatprep.mubr.msk.bf16.mxu1 %vm600_vm0, %v581_v15  ;;  %v576_v22 = vld [vmem:[%s6479_s11 + $0x78] sm:$0xff]  ;;  %v580_v24 = vpack.c.bf16 %v568_v19, %v567_v14  ;;  %s8881_s27 = scalar_lea.hbm %s9195_s14, %s5369_s13  ;;  %s6125_s11 = sshll.u32 %s6209_s10, 4  ;;  %s6126_s11 = int_to_ptr.vmem [resolvable:$false] %s6125_s11 }
  0x8f   : > { %5532 = vmatmul.mubr.msk.bf16.vlgmr.msra.gmra.mrb[0].mxu1 %vm600_vm0, %v582_v16  ;;  %v584_v25 = vpack.c.bf16 %v576_v22, %v575_v21  ;;  %5560 = vmatpush3.bf16.msra.mxu0 %v5912_v27  ;;  %v5913_v21 = vld [vmem:[#allocation2 + $0x18] sm:$0xff]   ;;  %v5914_v22 = vld [vmem:[#allocation2 + $0x20] sm:$0xff]   ;;  %s6127_s29 = scalar_lea.vmem %s6126_s11, 4096 }
  0x90   : > { %5535 = vmatprep.mubr.msk.bf16.mxu1 %vm600_vm0, %v583_v20  ;;  %5540 = vmatpush3.bf16.msra.mxu1 %v5910_v23  ;;  %v5915_v23 = vld [vmem:[#allocation2 + $0x28] sm:$0xff]  }
  0x91   : > { %5541 = vmatprep.subr.bf16.mxu1 %v5911_v26  ;;  %5561 = vmatprep.subr.bf16.mxu0 %v5913_v21  ;;  %p9196_p0 = scmp.ne.s32.totalorder %s9194_s19, 0 }
  0x93   : > { %5562 = vmatpush3.bf16.msra.mxu0 %v5913_v21  ;;  %v5155_v21 = vld [vmem:[%s8936_s4 + $0x1] ss:$0 sm:$0xff] }
  0x94   : > { %5542 = vmatpush3.bf16.msra.mxu1 %v5911_v26 }
  0x95   : > { %5528 = vmatmul.mubr.msk.bf16.gmra.mrb[4].mxu0 %vm600_vm0, %v580_v24  ;;  %5579 = vmatprep.subr.bf16.mxu1 %v5914_v22  ;;  %v5144_v24 = vld [vmem:[%s8936_s4] ss:$0 sm:$0xff] }
  0x97   : > { %5536 = vmatmul.mubr.msk.bf16.gmra.mrb[4].mxu1 %vm600_vm0, %v584_v25 }
 0x160   : > { %v5525_v29 = vpop.f32.mrb[0].mxu0 }
 0x161   : > { %v668_v30 = vadd.f32 %v5525_v29, %v5134_v28  ;;  %v659_v31 = vpop.f32.mrb[1].mxu0 }
 0x162   : > { %v660_v32 = vadd.f32 %v5134_v28, %v659_v31  ;;  %v5526_v33 = vpop.f32.mrb[2].mxu0  ;;  %v5533_v34 = vpop.f32.mrb[0].mxu1 }
 0x163   : > { %v671_v35 = vadd.f32 %v5526_v33, %v5134_v28  ;;  %v662_v36 = vpop.f32.mrb[3].mxu0  ;;  %v700_v37 = vadd.f32 %v5533_v34, %v5134_v28  ;;  %v691_v38 = vpop.f32.mrb[1].mxu1  ;;  %v724_v42 = vmax.f32 %v668_v30, 0.0 }
 0x164   : > { %v663_v39 = vadd.f32 %v5134_v28, %v662_v36  ;;  %v692_v40 = vadd.f32 %v5134_v28, %v691_v38  ;;  %v5534_v41 = vpop.f32.mrb[2].mxu1  ;;  %v722_v47 = vmax.f32 %v660_v32, 0.0 }
 0x165   : > { %v725_v43 = vmax.f32 %v671_v35, 0.0  ;;  %v732_v44 = vmax.f32 %v700_v37, 0.0  ;;  %v703_v45 = vadd.f32 %v5534_v41, %v5134_v28  ;;  %v694_v46 = vpop.f32.mrb[3].mxu1 }
 0x166   : > { %v723_v48 = vmax.f32 %v663_v39, 0.0  ;;  %v730_v49 = vmax.f32 %v692_v40, 0.0  ;;  %v695_v50 = vadd.f32 %v5134_v28, %v694_v46 }
 0x167   : > { %v739_v51 = vpack.c.bf16 %v725_v43, %v724_v42  ;;  %v733_v52 = vmax.f32 %v703_v45, 0.0 }
 0x168   : > { %v738_v53 = vpack.c.bf16 %v723_v48, %v722_v47  ;;  %v5529_v54 = vpop.f32.mrb[4].mxu0  ;;  %v731_v55 = vmax.f32 %v695_v50, 0.0 }
 0x169   : > { %v684_v56 = vadd.f32 %v5529_v54, %v5134_v28  ;;  %v675_v57 = vpop.f32.mrb[5].mxu0  ;;  %v743_v58 = vpack.c.bf16 %v733_v52, %v732_v44 }
 0x16a   : > { %v676_v59 = vadd.f32 %v5134_v28, %v675_v57  ;;  %v5530_v60 = vpop.f32.mrb[6].mxu0  ;;  %5543 = vmatprep.mubr.msk.bf16.mxu1 %vm767_vm1, %v738_v53  ;;  %v742_v61 = vpack.c.bf16 %v731_v55, %v730_v49  ;;  %v5537_v62 = vpop.f32.mrb[4].mxu1 }
 0x16b   : > { %v728_v63 = vmax.f32 %v684_v56, 0.0  ;;  %v687_v0 = vadd.f32 %v5530_v60, %v5134_v28  ;;  %v678_v1 = vpop.f32.mrb[7].mxu0  ;;  %5544 = vmatmul.mubr.msk.bf16.vlgmr.msra.gmra.mrb[8].mxu1 %vm767_vm1, %v739_v51  ;;  %v716_v2 = vadd.f32 %v5537_v62, %v5134_v28  ;;  %v707_v3 = vpop.f32.mrb[5].mxu1 }
 0x16c   : > { %v726_v4 = vmax.f32 %v676_v59, 0.0  ;;  %v679_v5 = vadd.f32 %v5134_v28, %v678_v1  ;;  %v708_v6 = vadd.f32 %v5134_v28, %v707_v3  ;;  %v5538_v7 = vpop.f32.mrb[6].mxu1  ;;  %5580 = vmatpush3.bf16.msra.mxu1 %v5914_v22 }
 0x16d   : > { %v729_v8 = vmax.f32 %v687_v0, 0.0  ;;  %v736_v9 = vmax.f32 %v716_v2, 0.0  ;;  %v719_v10 = vadd.f32 %v5538_v7, %v5134_v28  ;;  %v710_v11 = vpop.f32.mrb[7].mxu1  ;;  %5581 = vmatprep.subr.bf16.mxu1 %v5915_v23 }
 0x16e   : > { %v727_v12 = vmax.f32 %v679_v5, 0.0  ;;  %v734_v13 = vmax.f32 %v708_v6, 0.0  ;;  %v711_v14 = vadd.f32 %v5134_v28, %v710_v11 }
 0x16f   : > { %v741_v15 = vpack.c.bf16 %v729_v8, %v728_v63  ;;  %v737_v16 = vmax.f32 %v719_v10, 0.0 }
 0x170   : > { %v740_v17 = vpack.c.bf16 %v727_v12, %v726_v4  ;;  %v735_v18 = vmax.f32 %v711_v14, 0.0  ;;  %5582 = vmatpush3.bf16.msra.mxu1 %v5915_v23 }
 0x171   : > { %v745_v19 = vpack.c.bf16 %v737_v16, %v736_v9 }
 0x172   : > { %5547 = vmatprep.mubr.msk.bf16.mxu1 %vm767_vm1, %v740_v17  ;;  %v744_v20 = vpack.c.bf16 %v735_v18, %v734_v13  ;;  %v5916_v17 = vld [vmem:[#allocation5] ss:$16 sps:$4 sm:$0xff]   ;;  %v5918_v18 = vld [vmem:[#allocation5 + $0x4] ss:$16 sps:$4 sm:$0xff]  }
 0x173   : > { %5548 = vmatmul.mubr.msk.bf16.gmra.mrb[12].mxu1 %vm767_vm1, %v741_v15  ;;  %1325 = vmatprep.subr.bf16.mxu0 %v5918_v18  ;;  %v6206_v18 = vmov 0  }
 0x174   : > { %5551 = vmatprep.mubr.msk.bf16.mxu1 %vm767_vm1, %v742_v61  ;;  %5903 = vset.pattern.permute.xlu0 %v6206_v18 }
 0x175   : > { %5904 = vset.pattern.permute.xlu1 %v6206_v18 }
 0x17b   : > { %5552 = vmatmul.mubr.msk.bf16.gmra.mrb[16].mxu1 %vm767_vm1, %v743_v58 }
 0x17c   : > { %5555 = vmatprep.mubr.msk.bf16.mxu1 %vm767_vm1, %v744_v20  ;;  %v5919_v20 = vld [vmem:[#allocation5 + $0x20] ss:$16 sps:$4 sm:$0xff]  }
 0x183   : > { %5556 = vmatmul.mubr.msk.bf16.gmra.mrb[20].mxu1 %vm767_vm1, %v745_v19  ;;  %v5921_v19 = vld [vmem:[#allocation5 + $0x24] ss:$16 sps:$4 sm:$0xff]  }
 0x23e   : > { %v5545_v25 = vpop.f32.mrb[8].mxu1 }
 0x23f   : > { %v835_v26 = vadd.f32 %v5545_v25, %v5144_v24  ;;  %v826_v27 = vpop.f32.mrb[9].mxu1 }
 0x240   : > { %v827_v28 = vadd.f32 %v5144_v24, %v826_v27  ;;  %v5546_v29 = vpop.f32.mrb[10].mxu1 }
 0x241   : > { %v838_v30 = vadd.f32 %v5546_v29, %v5144_v24  ;;  %v829_v31 = vpop.f32.mrb[11].mxu1  ;;  %v891_v33 = vmax.f32 %v835_v26, 0.0 }
 0x242   : > { %v830_v32 = vadd.f32 %v5144_v24, %v829_v31  ;;  %v889_v35 = vmax.f32 %v827_v28, 0.0 }
 0x243   : > { %v892_v34 = vmax.f32 %v838_v30, 0.0 }
 0x244   : > { %v890_v36 = vmax.f32 %v830_v32, 0.0 }
 0x245   : > { %v906_v37 = vpack.c.bf16 %v892_v34, %v891_v33 }
 0x246   : > { %v905_v38 = vpack.c.bf16 %v890_v36, %v889_v35  ;;  %v5549_v39 = vpop.f32.mrb[12].mxu1 }
 0x247   : > { %v851_v40 = vadd.f32 %v5549_v39, %v5144_v24  ;;  %v842_v41 = vpop.f32.mrb[13].mxu1 }
 0x248   : > { %v843_v42 = vadd.f32 %v5144_v24, %v842_v41  ;;  %v5550_v43 = vpop.f32.mrb[14].mxu1  ;;  %5563 = vmatprep.mubr.msk.bf16.mxu0 %vm767_vm1, %v905_v38 }
 0x249   : > { %v895_v44 = vmax.f32 %v851_v40, 0.0  ;;  %v854_v45 = vadd.f32 %v5550_v43, %v5144_v24  ;;  %v845_v46 = vpop.f32.mrb[15].mxu1  ;;  %5564 = vmatmul.mubr.msk.bf16.vlgmr.msra.gmra.mrb[8].mxu0 %vm767_vm1, %v906_v37 }
 0x24a   : > { %v893_v47 = vmax.f32 %v843_v42, 0.0  ;;  %v846_v48 = vadd.f32 %v5144_v24, %v845_v46  ;;  %1326 = vmatpush1.bf16.msra.mxu0 %v5916_v17  ;;  %v5925_v17 = vld [vmem:[#allocation5 + $0x28] ss:$16 sps:$4 sm:$0xff]  }
 0x24b   : > { %v896_v49 = vmax.f32 %v854_v45, 0.0  ;;  %1327 = vmatprep.subr.bf16.mxu0 %v5921_v19  ;;  %v5928_v19 = vld [vmem:[%s8940_s8] sm:$0xff]  }
 0x24c   : > { %v894_v50 = vmax.f32 %v846_v48, 0.0 }
 0x24d   : > { %v908_v51 = vpack.c.bf16 %v896_v49, %v895_v44 }
 0x24e   : > { %v907_v52 = vpack.c.bf16 %v894_v50, %v893_v47  ;;  %v5553_v53 = vpop.f32.mrb[16].mxu1  ;;  %1328 = vmatpush1.bf16.msra.mxu0 %v5919_v20 }
 0x24f   : > { %v867_v54 = vadd.f32 %v5553_v53, %v5144_v24  ;;  %v858_v55 = vpop.f32.mrb[17].mxu1  ;;  %5599 = vmatprep.subr.bf16.mxu0 %v5928_v19 }
 0x250   : > { %5567 = vmatprep.mubr.msk.bf16.mxu0 %vm767_vm1, %v907_v52  ;;  %v859_v56 = vadd.f32 %v5144_v24, %v858_v55  ;;  %v5554_v57 = vpop.f32.mrb[18].mxu1 }
 0x251   : > { %5568 = vmatmul.mubr.msk.bf16.gmra.mrb[12].mxu0 %vm767_vm1, %v908_v51  ;;  %v899_v58 = vmax.f32 %v867_v54, 0.0  ;;  %v870_v59 = vadd.f32 %v5554_v57, %v5144_v24  ;;  %v861_v60 = vpop.f32.mrb[19].mxu1 }
 0x252   : > { %v897_v61 = vmax.f32 %v859_v56, 0.0  ;;  %v862_v62 = vadd.f32 %v5144_v24, %v861_v60 }
 0x253   : > { %v900_v63 = vmax.f32 %v870_v59, 0.0 }
 0x254   : > { %v898_v0 = vmax.f32 %v862_v62, 0.0 }
 0x255   : > { %v910_v1 = vpack.c.bf16 %v900_v63, %v899_v58 }
 0x256   : > { %v909_v2 = vpack.c.bf16 %v898_v0, %v897_v61  ;;  %v5557_v3 = vpop.f32.mrb[20].mxu1 }
 0x257   : > { %v883_v4 = vadd.f32 %v5557_v3, %v5144_v24  ;;  %v874_v5 = vpop.f32.mrb[21].mxu1 }
 0x258   : > { %5571 = vmatprep.mubr.msk.bf16.mxu0 %vm767_vm1, %v909_v2  ;;  %v875_v6 = vadd.f32 %v5144_v24, %v874_v5  ;;  %v5558_v7 = vpop.f32.mrb[22].mxu1 }
 0x259   : > { %5572 = vmatmul.mubr.msk.bf16.gmra.mrb[16].mxu0 %vm767_vm1, %v910_v1  ;;  %v903_v8 = vmax.f32 %v883_v4, 0.0  ;;  %v886_v9 = vadd.f32 %v5558_v7, %v5144_v24  ;;  %v877_v10 = vpop.f32.mrb[23].mxu1 }
 0x25a   : > { %v901_v11 = vmax.f32 %v875_v6, 0.0  ;;  %v878_v12 = vadd.f32 %v5144_v24, %v877_v10 }
 0x25b   : > { %v904_v13 = vmax.f32 %v886_v9, 0.0 }
 0x25c   : > { %v902_v14 = vmax.f32 %v878_v12, 0.0 }
 0x25d   : > { %v912_v15 = vpack.c.bf16 %v904_v13, %v903_v8 }
 0x25e   : > { %v911_v16 = vpack.c.bf16 %v902_v14, %v901_v11  ;;  %v5924_v14 = vld [vmem:[#allocation5 + $0xc] ss:$16 sps:$4 sm:$0xff]  }
 0x25f   : > { %1438 = vmatprep.subr.bf16.mxu1 %v5924_v14 }
 0x260   : > { %5575 = vmatprep.mubr.msk.bf16.mxu0 %vm767_vm1, %v911_v16  ;;  %v5927_v16 = vld [vmem:[#allocation5 + $0x2c] ss:$16 sps:$4 sm:$0xff]  }
 0x261   : > { %5576 = vmatmul.mubr.msk.bf16.gmra.mrb[20].mxu0 %vm767_vm1, %v912_v15  ;;  %v5922_v15 = vld [vmem:[#allocation5 + $0x8] ss:$16 sps:$4 sm:$0xff]  }
 0x262   : > { %1357 = vmatprep.mubr.bf16.mxu0 %v6206_v18 }
 0x31c   : > { %v5565_v22 = vpop.f32.mrb[8].mxu0 }
 0x31d   : > { %v1002_v23 = vadd.f32 %v5565_v22, %v5155_v21  ;;  %v993_v24 = vpop.f32.mrb[9].mxu0 }
 0x31e   : > { %v994_v25 = vadd.f32 %v5155_v21, %v993_v24  ;;  %v5566_v26 = vpop.f32.mrb[10].mxu0 }
 0x31f   : > { %v1005_v27 = vadd.f32 %v5566_v26, %v5155_v21  ;;  %v996_v28 = vpop.f32.mrb[11].mxu0  ;;  %v1058_v30 = vmax.f32 %v1002_v23, 0.0 }
 0x320   : > { %v997_v29 = vadd.f32 %v5155_v21, %v996_v28  ;;  %v1056_v32 = vmax.f32 %v994_v25, 0.0 }
 0x321   : > { %v1059_v31 = vmax.f32 %v1005_v27, 0.0 }
 0x322   : > { %v1057_v33 = vmax.f32 %v997_v29, 0.0 }
 0x323   : > { %v1073_v34 = vpack.c.bf16 %v1059_v31, %v1058_v30  ;;  %v5929_v31 = vld [vmem:[%s8940_s8 + $0x8] sm:$0xff]  }
 0x324   : > { %v1072_v35 = vpack.c.bf16 %v1057_v33, %v1056_v32  ;;  %v5569_v36 = vpop.f32.mrb[12].mxu0 }
 0x325   : > { %v1018_v37 = vadd.f32 %v5569_v36, %v5155_v21  ;;  %v1009_v38 = vpop.f32.mrb[13].mxu0 }
 0x326   : > { %v1010_v39 = vadd.f32 %v5155_v21, %v1009_v38  ;;  %v5570_v40 = vpop.f32.mrb[14].mxu0  ;;  %5583 = vmatprep.mubr.msk.bf16.mxu1 %vm767_vm1, %v1072_v35  ;;  %v5930_v38 = vld [vmem:[%s8940_s8 + $0x10] sm:$0xff]  }
 0x327   : > { %v1021_v41 = vadd.f32 %v5570_v40, %v5155_v21  ;;  %v1012_v42 = vpop.f32.mrb[15].mxu0  ;;  %5584 = vmatmul.mubr.msk.bf16.vlgmr.msra.gmra.mrb[24].mxu1 %vm767_vm1, %v1073_v34  ;;  %v1062_v44 = vmax.f32 %v1018_v37, 0.0 }
 0x328   : > { %v1013_v43 = vadd.f32 %v5155_v21, %v1012_v42  ;;  %v1060_v46 = vmax.f32 %v1010_v39, 0.0  ;;  %1439 = vmatpush1.bf16.msra.mxu1 %v5922_v15 }
 0x329   : > { %v1063_v45 = vmax.f32 %v1021_v41, 0.0  ;;  %1440 = vmatprep.subr.bf16.mxu1 %v5927_v16 }
 0x32a   : > { %v1061_v47 = vmax.f32 %v1013_v43, 0.0  ;;  %v5931_v43 = vld [vmem:[%s8940_s8 + $0x18] sm:$0xff]  }
 0x32b   : > { %v1075_v48 = vpack.c.bf16 %v1063_v45, %v1062_v44 }
 0x32c   : > { %v1074_v49 = vpack.c.bf16 %v1061_v47, %v1060_v46  ;;  %v5573_v50 = vpop.f32.mrb[16].mxu0  ;;  %1441 = vmatpush1.bf16.msra.mxu1 %v5925_v17 }
 0x32d   : > { %v1034_v51 = vadd.f32 %v5573_v50, %v5155_v21  ;;  %v1025_v52 = vpop.f32.mrb[17].mxu0 }
 0x32e   : > { %5587 = vmatprep.mubr.msk.bf16.mxu1 %vm767_vm1, %v1074_v49  ;;  %v1026_v53 = vadd.f32 %v5155_v21, %v1025_v52  ;;  %v5574_v54 = vpop.f32.mrb[18].mxu0 }
 0x32f   : > { %5588 = vmatmul.mubr.msk.bf16.gmra.mrb[28].mxu1 %vm767_vm1, %v1075_v48  ;;  %v1066_v55 = vmax.f32 %v1034_v51, 0.0  ;;  %v1037_v56 = vadd.f32 %v5574_v54, %v5155_v21  ;;  %v1028_v57 = vpop.f32.mrb[19].mxu0  ;;  %v5932_v51 = vld [vmem:[%s8940_s8 + $0x20] sm:$0xff]  }
 0x330   : > { %v1064_v58 = vmax.f32 %v1026_v53, 0.0  ;;  %v1029_v59 = vadd.f32 %v5155_v21, %v1028_v57 }
 0x331   : > { %v1067_v60 = vmax.f32 %v1037_v56, 0.0 }
 0x332   : > { %v1065_v61 = vmax.f32 %v1029_v59, 0.0 }
 0x333   : > { %v1077_v62 = vpack.c.bf16 %v1067_v60, %v1066_v55  ;;  %v5933_v55 = vld [vmem:[%s8940_s8 + $0x28] sm:$0xff]  }
 0x334   : > { %v1076_v63 = vpack.c.bf16 %v1065_v61, %v1064_v58  ;;  %v5577_v0 = vpop.f32.mrb[20].mxu0 }
 0x335   : > { %v1050_v1 = vadd.f32 %v5577_v0, %v5155_v21  ;;  %v1041_v2 = vpop.f32.mrb[21].mxu0 }
 0x336   : > { %5591 = vmatprep.mubr.msk.bf16.mxu1 %vm767_vm1, %v1076_v63  ;;  %v1042_v3 = vadd.f32 %v5155_v21, %v1041_v2  ;;  %v5578_v4 = vpop.f32.mrb[22].mxu0  ;;  %v5934_v2 = vld [vmem:[%s8940_s8 + $0x30] sm:$0xff]  }
 0x337   : > { %5592 = vmatmul.mubr.msk.bf16.gmra.mrb[32].mxu1 %vm767_vm1, %v1077_v62  ;;  %v1070_v5 = vmax.f32 %v1050_v1, 0.0  ;;  %v1053_v6 = vadd.f32 %v5578_v4, %v5155_v21  ;;  %v1044_v7 = vpop.f32.mrb[23].mxu0  ;;  %v8962_v4 = vlaneseq }
 0x338   : > { %v1068_v8 = vmax.f32 %v1042_v3, 0.0  ;;  %v1045_v9 = vadd.f32 %v5155_v21, %v1044_v7  ;;  %v6551_v21 = vld [vmem:[%s8936_s4 + $0x2] ss:$0 sm:$0xff]  ;;  %v5935_v3 = vld [vmem:[%s8940_s8 + $0x38] sm:$0xff]  }
 0x339   : > { %v1071_v10 = vmax.f32 %v1053_v6, 0.0  ;;  %v1239_v7 = vld [vmem:[%s8938_s6] sm:$0xf] }
 0x33a   : > { %v1069_v11 = vmax.f32 %v1045_v9, 0.0 }
 0x33b   : > { %v1079_v12 = vpack.c.bf16 %v1071_v10, %v1070_v5  ;;  %v6621_v5 = vshrl.u32 %v8962_v4, 7  ;;  %v1762_v4 = vld [vmem:[%s6464_s18 + $0x60] sm:$0xff] }
 0x33c   : > { %v1078_v13 = vpack.c.bf16 %v1069_v11, %v1068_v8 }
 0x33d   : > { %v6624_v6 = vsub.s32 0, %v6621_v5 }
 0x33e   : > { %5595 = vmatprep.mubr.msk.bf16.mxu1 %vm767_vm1, %v1078_v13 }
 0x33f   : > { %5596 = vmatmul.mubr.msk.bf16.gmra.mrb[36].mxu1 %vm767_vm1, %v1079_v12  ;;  %v6630_v8 = vrot.slane %v1239_v7, %v6624_v6 }
 0x340   : > { %1470 = vmatprep.mubr.bf16.mxu1 %v6206_v18 }
 0x3fa   : > { %v5585_v20 = vpop.f32.mrb[24].mxu1 }
 0x3fb   : > { %v1160_v22 = vpop.f32.mrb[25].mxu1  ;;  %v1169_v24 = vadd.f32 %v5585_v20, %v6551_v21 }
 0x3fc   : > { %v5586_v23 = vpop.f32.mrb[26].mxu1  ;;  %v1161_v27 = vadd.f32 %v6551_v21, %v1160_v22 }
 0x3fd   : > { %v1172_v25 = vadd.f32 %v5586_v23, %v6551_v21  ;;  %v1163_v26 = vpop.f32.mrb[27].mxu1 }
 0x3fe   : > { %v1164_v28 = vadd.f32 %v6551_v21, %v1163_v26 }
 0x3ff   : > { %v1224_v29 = vpack.c.bf16 %v1172_v25, %v1169_v24 }
 0x400   : > { %v1223_v30 = vpack.c.bf16 %v1164_v28, %v1161_v27 }
 0x402   : > { %v5589_v32 = vpop.f32.mrb[28].mxu1  ;;  %5185 = vmatmul.mubr.msk.bf16.vlgmr.msra.gmra.mrb[24].mxu0 %vm767_vm1, %v1223_v30  ;;  %5193 = vmatmul.mubr.msk.bf16.vlgmr.msra.gmra.mrb[40].mxu1 %vm767_vm1, %v1223_v30 }
 0x403   : > { %v1176_v33 = vpop.f32.mrb[29].mxu1  ;;  %1367 = vmatprep.mubr.bf16.mxu0 %v6206_v18  ;;  %1480 = vmatprep.mubr.bf16.mxu1 %v6206_v18  ;;  %v1185_v35 = vadd.f32 %v5589_v32, %v6551_v21 }
 0x404   : > { %v5590_v34 = vpop.f32.mrb[30].mxu1  ;;  %5600 = vmatpush3.bf16.msra.mxu0 %v5928_v19  ;;  %v1177_v39 = vadd.f32 %v6551_v21, %v1176_v33 }
 0x405   : > { %v1188_v36 = vadd.f32 %v5590_v34, %v6551_v21  ;;  %v1179_v37 = vpop.f32.mrb[31].mxu1  ;;  %5601 = vmatprep.subr.bf16.mxu0 %v5929_v31 }
 0x406   : > { %v1180_v40 = vadd.f32 %v6551_v21, %v1179_v37 }
 0x407   : > { %v1226_v41 = vpack.c.bf16 %v1188_v36, %v1185_v35 }
 0x408   : > { %v1225_v42 = vpack.c.bf16 %v1180_v40, %v1177_v39  ;;  %5602 = vmatpush3.bf16.msra.mxu0 %v5929_v31 }
 0x409   : > { %5603 = vmatprep.subr.bf16.mxu0 %v5930_v38 }
 0x40a   : > { %5186 = vmatmul.mubr.msk.bf16.gmra.mrb[28].mxu0 %vm767_vm1, %v1224_v29  ;;  %5194 = vmatmul.mubr.msk.bf16.gmra.mrb[44].mxu1 %vm767_vm1, %v1224_v29  ;;  %v5593_v44 = vpop.f32.mrb[32].mxu1 }
 0x40b   : > { %1377 = vmatprep.mubr.bf16.mxu0 %v6206_v18  ;;  %1490 = vmatprep.mubr.bf16.mxu1 %v6206_v18  ;;  %v1201_v45 = vadd.f32 %v5593_v44, %v6551_v21  ;;  %v1192_v46 = vpop.f32.mrb[33].mxu1 }
 0x40c   : > { %v1193_v47 = vadd.f32 %v6551_v21, %v1192_v46  ;;  %v5594_v48 = vpop.f32.mrb[34].mxu1  ;;  %5604 = vmatpush3.bf16.msra.mxu0 %v5930_v38 }
 0x40d   : > { %v1204_v49 = vadd.f32 %v5594_v48, %v6551_v21  ;;  %v1195_v50 = vpop.f32.mrb[35].mxu1  ;;  %5605 = vmatprep.subr.bf16.mxu0 %v5931_v43 }
 0x40e   : > { %v1196_v52 = vadd.f32 %v6551_v21, %v1195_v50 }
 0x40f   : > { %v1228_v53 = vpack.c.bf16 %v1204_v49, %v1201_v45 }
 0x410   : > { %v1227_v54 = vpack.c.bf16 %v1196_v52, %v1193_v47  ;;  %5606 = vmatpush3.bf16.msra.mxu0 %v5931_v43 }
 0x411   : > { %5607 = vmatprep.subr.bf16.mxu0 %v5932_v51 }
 0x412   : > { %5187 = vmatmul.mubr.msk.bf16.gmra.mrb[32].mxu0 %vm767_vm1, %v1225_v42  ;;  %5195 = vmatmul.mubr.msk.bf16.gmra.mrb[48].mxu1 %vm767_vm1, %v1225_v42  ;;  %v5597_v56 = vpop.f32.mrb[36].mxu1 }
 0x413   : > { %1387 = vmatprep.mubr.bf16.mxu0 %v6206_v18  ;;  %1500 = vmatprep.mubr.bf16.mxu1 %v6206_v18  ;;  %v1217_v57 = vadd.f32 %v5597_v56, %v6551_v21  ;;  %v1208_v58 = vpop.f32.mrb[37].mxu1 }
 0x414   : > { %v1209_v59 = vadd.f32 %v6551_v21, %v1208_v58  ;;  %v5598_v60 = vpop.f32.mrb[38].mxu1  ;;  %5608 = vmatpush3.bf16.msra.mxu0 %v5932_v51 }
 0x415   : > { %v1220_v61 = vadd.f32 %v5598_v60, %v6551_v21  ;;  %v1211_v62 = vpop.f32.mrb[39].mxu1  ;;  %5609 = vmatprep.subr.bf16.mxu0 %v5933_v55 }
 0x416   : > { %v1212_v63 = vadd.f32 %v6551_v21, %v1211_v62 }
 0x417   : > { %v1230_v0 = vpack.c.bf16 %v1220_v61, %v1217_v57 }
 0x418   : > { %v1229_v1 = vpack.c.bf16 %v1212_v63, %v1209_v59  ;;  %5610 = vmatpush3.bf16.msra.mxu0 %v5933_v55 }
 0x419   : > { %5611 = vmatprep.subr.bf16.mxu0 %v5934_v2 }
 0x41a   : > { %5188 = vmatmul.mubr.msk.bf16.gmra.mrb[36].mxu0 %vm767_vm1, %v1226_v41  ;;  %5196 = vmatmul.mubr.msk.bf16.gmra.mrb[52].mxu1 %vm767_vm1, %v1226_v41 }
 0x41b   : > { %1397 = vmatprep.mubr.bf16.mxu0 %v6206_v18  ;;  %1510 = vmatprep.mubr.bf16.mxu1 %v6206_v18 }
 0x41c   : > { %5612 = vmatpush3.bf16.msra.mxu0 %v5934_v2 }
 0x41d   : > { %5613 = vmatprep.subr.bf16.mxu0 %v5935_v3 }
 0x420   : > { %5614 = vmatpush3.bf16.msra.mxu0 %v5935_v3 }
 0x422   : > { %5189 = vmatmul.mubr.msk.bf16.gmra.mrb[40].mxu0 %vm767_vm1, %v1227_v54  ;;  %5197 = vmatmul.mubr.msk.bf16.gmra.mrb[56].mxu1 %vm767_vm1, %v1227_v54 }
 0x423   : > { %1407 = vmatprep.mubr.bf16.mxu0 %v6206_v18  ;;  %1520 = vmatprep.mubr.bf16.mxu1 %v6206_v18 }
 0x42a   : > { %5190 = vmatmul.mubr.msk.bf16.gmra.mrb[44].mxu0 %vm767_vm1, %v1228_v53  ;;  %5198 = vmatmul.mubr.msk.bf16.gmra.mrb[60].mxu1 %vm767_vm1, %v1228_v53 }
 0x42b   : > { %1417 = vmatprep.mubr.bf16.mxu0 %v6206_v18  ;;  %1530 = vmatprep.mubr.bf16.mxu1 %v6206_v18 }
 0x432   : > { %5191 = vmatmul.mubr.msk.bf16.gmra.mrb[48].mxu0 %vm767_vm1, %v1229_v1  ;;  %5199 = vmatmul.mubr.msk.bf16.gmra.mrb[64].mxu1 %vm767_vm1, %v1229_v1 }
 0x433   : > { %1427 = vmatprep.mubr.bf16.mxu0 %v6206_v18  ;;  %1540 = vmatprep.mubr.bf16.mxu1 %v6206_v18 }
 0x43a   : > { %5192 = vmatmul.mubr.msk.bf16.gmra.mrb[52].mxu0 %vm767_vm1, %v1230_v0  ;;  %5200 = vmatmul.mubr.msk.bf16.gmra.mrb[68].mxu1 %vm767_vm1, %v1230_v0 }
 0x4d5   : > { %v1359_v9 = vpop.f32.mrb[24].mxu0  ;;  %v6632_v10 = vpop.f32.mrb[40].mxu1 }
 0x4d6   : > { %v1360_v11 = vadd.f32 %v1359_v9, %v6630_v8  ;;  %v6635_v12 = vpop.f32.mrb[25].mxu0  ;;  %v6637_v13 = vpop.f32.mrb[41].mxu1 }
 0x4d7   : > { %9039 = vst [vmem:[#allocation18_spill] sm:$0xff] %v6637_v13  ;;  %v1363_v14 = vpop.f32.mrb[26].mxu0  ;;  %v6639_v15 = vpop.f32.mrb[42].mxu1 }
 0x4d8   : > { %9040 = vst [vmem:[#allocation19_spill] sm:$0xff] %v6639_v15  ;;  %v1364_v16 = vadd.f32 %v1363_v14, %v6630_v8  ;;  %v6642_v17 = vpop.f32.mrb[27].mxu0  ;;  %v6644_v18 = vpop.f32.mrb[43].mxu1  ;;  %v1569_v19 = vmax.f32 %v1360_v11, 0.0 }
 0x4d9   : > { %9041 = vst [vmem:[#allocation20_spill] sm:$0xff] %v6644_v18  ;;  %v1774_v18 = vld [vmem:[%s6464_s18 + $0x1e0] sm:$0xff] }
 0x4da   : > { %v1570_v20 = vmax.f32 %v1364_v16, 0.0 }
 0x4dc   : > { %v1585_v21 = vpack.c.bf16 %v1570_v20, %v1569_v19 }
 0x4dd   : > { %v1369_v22 = vpop.f32.mrb[28].mxu0  ;;  %v6646_v23 = vpop.f32.mrb[44].mxu1 }
 0x4de   : > { %v1370_v24 = vadd.f32 %v1369_v22, %v6630_v8  ;;  %v6649_v25 = vpop.f32.mrb[29].mxu0  ;;  %v6651_v26 = vpop.f32.mrb[45].mxu1  ;;  %5615 = vmatprep.mubr.bf16.mxu0 %v1585_v21 }
 0x4df   : > { %9042 = vst [vmem:[#allocation21_spill] sm:$0xff] %v6651_v26  ;;  %v1373_v27 = vpop.f32.mrb[30].mxu0  ;;  %v6653_v28 = vpop.f32.mrb[46].mxu1 }
 0x4e0   : > { %v1374_v29 = vadd.f32 %v1373_v27, %v6630_v8  ;;  %v6656_v30 = vpop.f32.mrb[31].mxu0  ;;  %v6658_v31 = vpop.f32.mrb[47].mxu1  ;;  %v1571_v32 = vmax.f32 %v1370_v24, 0.0 }
 0x4e1   : > { %9043 = vst [vmem:[#allocation22_spill] sm:$0xff] %v6658_v31 }
 0x4e2   : > { %v1572_v33 = vmax.f32 %v1374_v29, 0.0 }
 0x4e4   : > { %v1586_v34 = vpack.c.bf16 %v1572_v33, %v1571_v32 }
 0x4e5   : > { %v1379_v35 = vpop.f32.mrb[32].mxu0  ;;  %v6660_v36 = vpop.f32.mrb[48].mxu1 }
 0x4e6   : > { %9044 = vst [vmem:[#allocation23_spill] sm:$0xff] %v6660_v36  ;;  %v1380_v37 = vadd.f32 %v1379_v35, %v6630_v8  ;;  %v6663_v38 = vpop.f32.mrb[33].mxu0  ;;  %v6665_v39 = vpop.f32.mrb[49].mxu1  ;;  %5616 = vmatmul.mubr.bf16.vlgmr.msra.gmra.mrb[56].mxu0 %v1586_v34 }
 0x4e7   : > { %9045 = vst [vmem:[#allocation24_spill] sm:$0xff] %v6665_v39  ;;  %v1383_v40 = vpop.f32.mrb[34].mxu0  ;;  %v6667_v41 = vpop.f32.mrb[50].mxu1 }
 0x4e8   : > { %9046 = vst [vmem:[#allocation25_spill] sm:$0xff] %v6667_v41  ;;  %v1384_v42 = vadd.f32 %v1383_v40, %v6630_v8  ;;  %v6670_v43 = vpop.f32.mrb[35].mxu0  ;;  %v6672_v44 = vpop.f32.mrb[51].mxu1  ;;  %v1573_v45 = vmax.f32 %v1380_v37, 0.0 }
 0x4e9   : > { %9047 = vst [vmem:[#allocation26_spill] sm:$0xff] %v6672_v44  ;;  %v1770_v44 = vld [vmem:[%s6464_s18 + $0x160] sm:$0xff] }
 0x4ea   : > { %v1574_v46 = vmax.f32 %v1384_v42, 0.0 }
 0x4ec   : > { %v1587_v47 = vpack.c.bf16 %v1574_v46, %v1573_v45 }
 0x4ed   : > { %v1389_v48 = vpop.f32.mrb[36].mxu0  ;;  %v6674_v49 = vpop.f32.mrb[52].mxu1 }
 0x4ee   : > { %9048 = vst [vmem:[#allocation27_spill] sm:$0xff] %v6674_v49  ;;  %v1390_v50 = vadd.f32 %v1389_v48, %v6630_v8  ;;  %v6677_v51 = vpop.f32.mrb[37].mxu0  ;;  %v6679_v52 = vpop.f32.mrb[53].mxu1  ;;  %5619 = vmatprep.mubr.bf16.mxu0 %v1587_v47 }
 0x4ef   : > { %9049 = vst [vmem:[#allocation28_spill] sm:$0xff] %v6679_v52  ;;  %v1393_v53 = vpop.f32.mrb[38].mxu0  ;;  %v6681_v54 = vpop.f32.mrb[54].mxu1  ;;  %v1773_v52 = vld [vmem:[%s6464_s18 + $0x1c0] sm:$0xff] }
 0x4f0   : > { %9050 = vst [vmem:[#allocation29_spill] sm:$0xff] %v6681_v54  ;;  %v1394_v55 = vadd.f32 %v1393_v53, %v6630_v8  ;;  %v6684_v56 = vpop.f32.mrb[39].mxu0  ;;  %v6686_v57 = vpop.f32.mrb[55].mxu1  ;;  %v1575_v58 = vmax.f32 %v1390_v50, 0.0 }
 0x4f1   : > { %9051 = vst [vmem:[#allocation30_spill] sm:$0xff] %v6686_v57  ;;  %v1772_v57 = vld [vmem:[%s6464_s18 + $0x1a0] sm:$0xff] }
 0x4f2   : > { %v1576_v59 = vmax.f32 %v1394_v55, 0.0 }
 0x4f4   : > { %v1588_v60 = vpack.c.bf16 %v1576_v59, %v1575_v58 }
 0x4f5   : > { %v1399_v61 = vpop.f32.mrb[40].mxu0  ;;  %v6688_v62 = vpop.f32.mrb[56].mxu1 }
 0x4f6   : > { %9052 = vst [vmem:[#allocation31_spill] sm:$0xff] %v6688_v62  ;;  %v1400_v63 = vadd.f32 %v1399_v61, %v6630_v8  ;;  %v6691_v0 = vpop.f32.mrb[41].mxu0  ;;  %v6693_v1 = vpop.f32.mrb[57].mxu1  ;;  %5620 = vmatmul.mubr.bf16.gmra.mrb[60].mxu0 %v1588_v60 }
 0x4f7   : > { %9053 = vst [vmem:[#allocation32_spill] sm:$0xff] %v6693_v1  ;;  %v1403_v2 = vpop.f32.mrb[42].mxu0  ;;  %v6695_v3 = vpop.f32.mrb[58].mxu1 }
 0x4f8   : > { %9054 = vst [vmem:[#allocation33_spill] sm:$0xff] %v6695_v3  ;;  %v1577_v7 = vmax.f32 %v1400_v63, 0.0  ;;  %v1404_v9 = vadd.f32 %v1403_v2, %v6630_v8  ;;  %v6698_v11 = vpop.f32.mrb[43].mxu0  ;;  %v6700_v14 = vpop.f32.mrb[59].mxu1 }
 0x4f9   : > { %9055 = vst [vmem:[#allocation34_spill] sm:$0xff] %v6700_v14  ;;  %v1766_v14 = vld [vmem:[%s6464_s18 + $0xe0] sm:$0xff] }
 0x4fa   : > { %v1578_v16 = vmax.f32 %v1404_v9, 0.0 }
 0x4fc   : > { %v1589_v19 = vpack.c.bf16 %v1578_v16, %v1577_v7 }
 0x4fd   : > { %v1409_v20 = vpop.f32.mrb[44].mxu0  ;;  %v6702_v21 = vpop.f32.mrb[60].mxu1 }
 0x4fe   : > { %9056 = vst [vmem:[#allocation35_spill] sm:$0xff] %v6702_v21  ;;  %v1410_v22 = vadd.f32 %v1409_v20, %v6630_v8  ;;  %v6705_v24 = vpop.f32.mrb[45].mxu0  ;;  %v6707_v27 = vpop.f32.mrb[61].mxu1  ;;  %5623 = vmatprep.mubr.bf16.mxu0 %v1589_v19 }
 0x4ff   : > { %9057 = vst [vmem:[#allocation36_spill] sm:$0xff] %v6707_v27  ;;  %v1413_v29 = vpop.f32.mrb[46].mxu0  ;;  %v6709_v32 = vpop.f32.mrb[62].mxu1 }
 0x500   : > { %9058 = vst [vmem:[#allocation37_spill] sm:$0xff] %v6709_v32  ;;  %v1414_v33 = vadd.f32 %v1413_v29, %v6630_v8  ;;  %v6712_v34 = vpop.f32.mrb[47].mxu0  ;;  %v6714_v35 = vpop.f32.mrb[63].mxu1  ;;  %v1579_v37 = vmax.f32 %v1410_v22, 0.0 }
 0x501   : > { %9059 = vst [vmem:[#allocation38_spill] sm:$0xff] %v6714_v35  ;;  %v1768_v35 = vld [vmem:[%s6464_s18 + $0x120] sm:$0xff] }
 0x502   : > { %v1580_v40 = vmax.f32 %v1414_v33, 0.0 }
 0x504   : > { %v1590_v42 = vpack.c.bf16 %v1580_v40, %v1579_v37 }
 0x505   : > { %v1419_v45 = vpop.f32.mrb[48].mxu0  ;;  %v6716_v46 = vpop.f32.mrb[64].mxu1 }
 0x506   : > { %9060 = vst [vmem:[#allocation39_spill] sm:$0xff] %v6716_v46  ;;  %v1420_v47 = vadd.f32 %v1419_v45, %v6630_v8  ;;  %v6719_v48 = vpop.f32.mrb[49].mxu0  ;;  %v6721_v50 = vpop.f32.mrb[65].mxu1  ;;  %5624 = vmatmul.mubr.bf16.gmra.mrb[64].mxu0 %v1590_v42 }
 0x507   : > { %9061 = vst [vmem:[#allocation40_spill] sm:$0xff] %v6721_v50  ;;  %v1423_v53 = vpop.f32.mrb[50].mxu0  ;;  %v6723_v55 = vpop.f32.mrb[66].mxu1 }
 0x508   : > { %9062 = vst [vmem:[#allocation41_spill] sm:$0xff] %v6723_v55  ;;  %v1581_v58 = vmax.f32 %v1420_v47, 0.0  ;;  %v1424_v59 = vadd.f32 %v1423_v53, %v6630_v8  ;;  %v6726_v60 = vpop.f32.mrb[51].mxu0  ;;  %v6728_v61 = vpop.f32.mrb[67].mxu1  ;;  %v6747_v53 = vld [vmem:[%s8941_s9] ss:$0 sm:$0xff] }
 0x509   : > { %9063 = vst [vmem:[#allocation42_spill] sm:$0xff] %v6728_v61 }
 0x50a   : > { %v1582_v63 = vmax.f32 %v1424_v59, 0.0  ;;  %v1761_v59 = vld [vmem:[%s6464_s18 + $0x40] sm:$0xff] }
 0x50c   : > { %v1591_v2 = vpack.c.bf16 %v1582_v63, %v1581_v58 }
 0x50d   : > { %v1429_v7 = vpop.f32.mrb[52].mxu0  ;;  %v6730_v9 = vpop.f32.mrb[68].mxu1 }
 0x50e   : > { %9064 = vst [vmem:[#allocation43_spill] sm:$0xff] %v6730_v9  ;;  %v1430_v16 = vadd.f32 %v1429_v7, %v6630_v8  ;;  %v6733_v19 = vpop.f32.mrb[53].mxu0  ;;  %v6735_v20 = vpop.f32.mrb[69].mxu1  ;;  %5627 = vmatprep.mubr.bf16.mxu0 %v1591_v2  ;;  %v1759_v2 = vld [vmem:[%s6464_s18] sm:$0xff] }
 0x50f   : > { %9065 = vst [vmem:[#allocation44_spill] sm:$0xff] %v6735_v20  ;;  %v1433_v22 = vpop.f32.mrb[54].mxu0  ;;  %v6737_v29 = vpop.f32.mrb[70].mxu1 }
 0x510   : > { %9066 = vst [vmem:[#allocation45_spill] sm:$0xff] %v6737_v29  ;;  %v1434_v33 = vadd.f32 %v1433_v22, %v6630_v8  ;;  %v6740_v37 = vpop.f32.mrb[55].mxu0  ;;  %v6742_v40 = vpop.f32.mrb[71].mxu1  ;;  %v1583_v42 = vmax.f32 %v1430_v16, 0.0 }
 0x511   : > { %9067 = vst [vmem:[#allocation46_spill] sm:$0xff] %v6742_v40  ;;  %v1764_v40 = vld [vmem:[%s6464_s18 + $0xa0] sm:$0xff] }
 0x512   : > { %v1584_v45 = vmax.f32 %v1434_v33, 0.0 }
 0x514   : > { %v1592_v47 = vpack.c.bf16 %v1584_v45, %v1583_v42 }
 0x516   : > { %5628 = vmatmul.mubr.bf16.gmra.mrb[68].mxu0 %v1592_v47 }
 0x5b9   : > { %v5617_v58 = vpop.f32.mrb[56].mxu0 }
 0x5ba   : > { %v1705_v63 = vadd.f32 %v5617_v58, %v6747_v53  ;;  %v1696_v8 = vpop.f32.mrb[57].mxu0  ;;  %v1760_v58 = vld [vmem:[%s6464_s18 + $0x20] sm:$0xff] }
 0x5bb   : > { %v1697_v7 = vadd.f32 %v6747_v53, %v1696_v8  ;;  %v5618_v22 = vpop.f32.mrb[58].mxu0 }
 0x5bc   : > { %v1708_v16 = vadd.f32 %v5618_v22, %v6747_v53  ;;  %v1699_v33 = vpop.f32.mrb[59].mxu0  ;;  %v6754_v42 = vadd.f32 %v1761_v59, %v1705_v63 }
 0x5bd   : > { %v1700_v45 = vadd.f32 %v6747_v53, %v1699_v33  ;;  %v6757_v47 = vadd.f32 %v1759_v2, %v1697_v7  ;;  %v1763_v2 = vld [vmem:[%s6464_s18 + $0x80] sm:$0xff] }
 0x5be   : > { %1795 = vmax.xlane.f32.xlu1 %v6754_v42  ;;  %v6763_v8 = vadd.f32 %v1762_v4, %v1708_v16 }
 0x5bf   : > { %1791 = vmax.xlane.f32.xlu0 %v6757_v47  ;;  %v6765_v61 = vadd.f32 %v1760_v58, %v1700_v45  ;;  %v1765_v45 = vld [vmem:[%s6464_s18 + $0xc0] sm:$0xff] }
 0x5c2   : > { %1797 = vmax.xlane.f32.xlu1 %v6763_v8 }
 0x5c3   : > { %1793 = vmax.xlane.f32.xlu0 %v6765_v61 }
 0x5c9   : > { %v5621_v59 = vpop.f32.mrb[60].mxu0 }
 0x5ca   : > { %v1712_v63 = vpop.f32.mrb[61].mxu0  ;;  %v1721_v50 = vadd.f32 %v5621_v59, %v6747_v53 }
 0x5cb   : > { %v1713_v7 = vadd.f32 %v6747_v53, %v1712_v63  ;;  %v5622_v22 = vpop.f32.mrb[62].mxu0 }
 0x5cc   : > { %v1715_v33 = vpop.f32.mrb[63].mxu0  ;;  %v1724_v58 = vadd.f32 %v5622_v22, %v6747_v53  ;;  %v6783_v63 = vadd.f32 %v1765_v45, %v1721_v50  ;;  %v1767_v22 = vld [vmem:[%s6464_s18 + $0x100] sm:$0xff] }
 0x5cd   : > { %v1716_v4 = vadd.f32 %v6747_v53, %v1715_v33  ;;  %v6774_v16 = vadd.f32 %v1763_v2, %v1713_v7 }
 0x5ce   : > { %v6786_v59 = vadd.f32 %v1766_v14, %v1724_v58  ;;  %v1769_v14 = vld [vmem:[%s6464_s18 + $0x140] sm:$0xff] }
 0x5cf   : > { %1799 = vmax.xlane.f32.xlu0 %v6774_v16  ;;  %v6779_v20 = vadd.f32 %v1764_v40, %v1716_v4 }
 0x5d1   : > { %1801 = vmax.xlane.f32.xlu1 %v6779_v20 }
 0x5d3   : > { %1803 = vmax.xlane.f32.xlu0 %v6783_v63 }
 0x5d5   : > { %1805 = vmax.xlane.f32.xlu1 %v6786_v59 }
 0x5d9   : > { %v5625_v2 = vpop.f32.mrb[64].mxu0 }
 0x5da   : > { %v1728_v7 = vpop.f32.mrb[65].mxu0  ;;  %v1737_v1 = vadd.f32 %v5625_v2, %v6747_v53 }
 0x5db   : > { %v1729_v33 = vadd.f32 %v6747_v53, %v1728_v7  ;;  %v5626_v40 = vpop.f32.mrb[66].mxu0 }
 0x5dc   : > { %v1731_v4 = vpop.f32.mrb[67].mxu0  ;;  %v1740_v58 = vadd.f32 %v5626_v40, %v6747_v53  ;;  %v6803_v7 = vadd.f32 %v1769_v14, %v1737_v1  ;;  %v1771_v40 = vld [vmem:[%s6464_s18 + $0x180] sm:$0xff] }
 0x5dd   : > { %v1732_v50 = vadd.f32 %v6747_v53, %v1731_v4  ;;  %v6794_v45 = vadd.f32 %v1767_v22, %v1729_v33 }
 0x5de   : > { %v6806_v2 = vadd.f32 %v1770_v44, %v1740_v58 }
 0x5df   : > { %1807 = vmax.xlane.f32.xlu0 %v6794_v45  ;;  %v6799_v27 = vadd.f32 %v1768_v35, %v1732_v50 }
 0x5e1   : > { %1809 = vmax.xlane.f32.xlu1 %v6799_v27 }
 0x5e3   : > { %1811 = vmax.xlane.f32.xlu0 %v6803_v7 }
 0x5e5   : > { %1813 = vmax.xlane.f32.xlu1 %v6806_v2 }
 0x5e9   : > { %v5629_v22 = vpop.f32.mrb[68].mxu0 }
 0x5ea   : > { %v1744_v33 = vpop.f32.mrb[69].mxu0  ;;  %v1753_v39 = vadd.f32 %v5629_v22, %v6747_v53  ;;  %v9068_v22 = vlaneseq }
 0x5eb   : > { %v1745_v4 = vadd.f32 %v6747_v53, %v1744_v33  ;;  %v5630_v35 = vpop.f32.mrb[70].mxu0 }
 0x5ec   : > { %v1747_v50 = vpop.f32.mrb[71].mxu0  ;;  %v1756_v44 = vadd.f32 %v5630_v35, %v6747_v53  ;;  %v6823_v33 = vadd.f32 %v1773_v52, %v1753_v39 }
 0x5ed   : > { %v1748_v1 = vadd.f32 %v6747_v53, %v1747_v50  ;;  %v6814_v14 = vadd.f32 %v1771_v40, %v1745_v4  ;;  %v6830_v40 = vand.u32 127, %v9068_v22 }
 0x5ee   : > { %v6826_v31 = vadd.f32 %v1774_v18, %v1756_v44 }
 0x5ef   : > { %1815 = vmax.xlane.f32.xlu0 %v6814_v14  ;;  %v6819_v58 = vadd.f32 %v1772_v57, %v1748_v1  ;;  %9069 = vst [vmem:[#allocation47_spill] sm:$0xff] %v6830_v40 }
 0x5f1   : > { %1817 = vmax.xlane.f32.xlu1 %v6819_v58 }
 0x5f3   : > { %1819 = vmax.xlane.f32.xlu0 %v6823_v33 }
 0x5f5   : > { %1821 = vmax.xlane.f32.xlu1 %v6826_v31 }
 0x64b   : > { %v1796_v4 = vpop.xlane.xlu1 %1795 }
 0x64c   : > { %vm1825_vm2 = vcmp.ge.f32.partialorder %v6754_v42, %v1796_v4  ;;  %v1792_v53 = vpop.xlane.xlu0 %1791 }
 0x64d   : > { %vm1823_vm3 = vcmp.ge.f32.partialorder %v6757_v47, %v1792_v53  ;;  %v6835_v57 = vsel %vm1825_vm2, %v6830_v40, 128 }
 0x64e   : > { %v6838_v39 = vsel %vm1823_vm3, %v6830_v40, 128  ;;  %v1884_v42 = vshra.s32 %v6835_v57, 16  ;;  %v1883_v54 = vand.u32 65535, %v6835_v57 }
 0x64f   : > { %v1798_v52 = vpop.xlane.xlu1 %1797  ;;  %v1856_v18 = vshra.s32 %v6838_v39, 16 }
 0x650   : > { %vm1826_vm4 = vcmp.ge.f32.partialorder %v6763_v8, %v1798_v52  ;;  %v1794_v35 = vpop.xlane.xlu0 %1793  ;;  %v6854_v22 = vcvt.s32.f32 %v1884_v42  ;;  %v1885_v15 = vcvt.s32.f32 %v1883_v54 }
 0x651   : > { %vm1824_vm5 = vcmp.ge.f32.partialorder %v6765_v61, %v1794_v35  ;;  %v6843_v50 = vcvt.s32.f32 %v1856_v18  ;;  %v6847_v47 = vsel %vm1826_vm4, %v6830_v40, 128 }
 0x652   : > { %v6850_v1 = vsel %vm1824_vm5, %v6830_v40, 128  ;;  %v1898_v61 = vshra.s32 %v6847_v47, 16 }
 0x653   : > { %1859 = vmin.xlane.f32.xlu0 %v6843_v50  ;;  %v1870_v44 = vshra.s32 %v6850_v1, 16  ;;  %v1869_v41 = vand.u32 65535, %v6850_v1 }
 0x654   : > { %v6861_v4 = vcvt.s32.f32 %v1898_v61 }
 0x655   : > { %v6856_v8 = vcvt.s32.f32 %v1870_v44  ;;  %v1871_v49 = vcvt.s32.f32 %v1869_v41 }
 0x657   : > { %1887 = vmin.xlane.f32.xlu0 %v6854_v22  ;;  %1873 = vmin.xlane.f32.xlu1 %v6856_v8 }
 0x65b   : > { %1901 = vmin.xlane.f32.xlu1 %v6861_v4 }
 0x65c   : > { %v1800_v53 = vpop.xlane.xlu0 %1799 }
 0x65d   : > { %vm1827_vm6 = vcmp.ge.f32.partialorder %v6774_v16, %v1800_v53 }
 0x65e   : > { %v6866_v52 = vsel %vm1827_vm6, %v6830_v40, 128  ;;  %v1802_v18 = vpop.xlane.xlu1 %1801 }
 0x65f   : > { %vm1828_vm7 = vcmp.ge.f32.partialorder %v6779_v20, %v1802_v18  ;;  %v1912_v35 = vshra.s32 %v6866_v52, 16  ;;  %v1911_v54 = vand.u32 65535, %v6866_v52 }
 0x660   : > { %v6871_v42 = vsel %vm1828_vm7, %v6830_v40, 128  ;;  %v1804_v44 = vpop.xlane.xlu0 %1803 }
 0x661   : > { %vm1829_vm8 = vcmp.ge.f32.partialorder %v6783_v63, %v1804_v44  ;;  %v6874_v61 = vcvt.s32.f32 %v1912_v35  ;;  %v1926_v13 = vshra.s32 %v6871_v42, 16 }
 0x662   : > { %v6878_v16 = vsel %vm1829_vm8, %v6830_v40, 128  ;;  %v1806_v53 = vpop.xlane.xlu1 %1805 }
 0x663   : > { %vm1830_vm9 = vcmp.ge.f32.partialorder %v6786_v59, %v1806_v53  ;;  %1915 = vmin.xlane.f32.xlu0 %v6874_v61  ;;  %v6882_v20 = vcvt.s32.f32 %v1926_v13  ;;  %v1940_v18 = vshra.s32 %v6878_v16, 16 }
 0x664   : > { %v6886_v26 = vsel %vm1830_vm9, %v6830_v40, 128 }
 0x665   : > { %1929 = vmin.xlane.f32.xlu1 %v6882_v20  ;;  %v6889_v63 = vcvt.s32.f32 %v1940_v18  ;;  %v1954_v35 = vshra.s32 %v6886_v26, 16 }
 0x667   : > { %1943 = vmin.xlane.f32.xlu0 %v6889_v63  ;;  %v6893_v44 = vcvt.s32.f32 %v1954_v35 }
 0x669   : > { %1957 = vmin.xlane.f32.xlu1 %v6893_v44 }
 0x66c   : > { %v1808_v59 = vpop.xlane.xlu0 %1807 }
 0x66d   : > { %vm1831_vm10 = vcmp.ge.f32.partialorder %v6794_v45, %v1808_v59 }
 0x66e   : > { %v6898_v13 = vsel %vm1831_vm10, %v6830_v40, 128  ;;  %v1810_v53 = vpop.xlane.xlu1 %1809 }
 0x66f   : > { %vm1832_vm11 = vcmp.ge.f32.partialorder %v6799_v27, %v1810_v53  ;;  %v1968_v18 = vshra.s32 %v6898_v13, 16 }
 0x670   : > { %v6903_v55 = vsel %vm1832_vm11, %v6830_v40, 128  ;;  %v1812_v29 = vpop.xlane.xlu0 %1811 }
 0x671   : > { %vm1833_vm12 = vcmp.ge.f32.partialorder %v6803_v7, %v1812_v29  ;;  %v6906_v35 = vcvt.s32.f32 %v1968_v18  ;;  %v1982_v46 = vshra.s32 %v6903_v55, 16 }
 0x672   : > { %v6910_v45 = vsel %vm1833_vm12, %v6830_v40, 128  ;;  %v1814_v59 = vpop.xlane.xlu1 %1813 }
 0x673   : > { %vm1834_vm13 = vcmp.ge.f32.partialorder %v6806_v2, %v1814_v59  ;;  %1971 = vmin.xlane.f32.xlu0 %v6906_v35  ;;  %v6914_v27 = vcvt.s32.f32 %v1982_v46  ;;  %v1996_v53 = vshra.s32 %v6910_v45, 16 }
 0x674   : > { %v6918_v9 = vsel %vm1834_vm13, %v6830_v40, 128 }
 0x675   : > { %1985 = vmin.xlane.f32.xlu1 %v6914_v27  ;;  %v6921_v29 = vcvt.s32.f32 %v1996_v53  ;;  %v2010_v7 = vshra.s32 %v6918_v9, 16 }
 0x677   : > { %1999 = vmin.xlane.f32.xlu0 %v6921_v29  ;;  %v6925_v18 = vcvt.s32.f32 %v2010_v7 }
 0x679   : > { %2013 = vmin.xlane.f32.xlu1 %v6925_v18 }
 0x67c   : > { %v1816_v2 = vpop.xlane.xlu0 %1815 }
 0x67d   : > { %vm1835_vm14 = vcmp.ge.f32.partialorder %v6814_v14, %v1816_v2 }
 0x67e   : > { %v6930_v46 = vsel %vm1835_vm14, %v6830_v40, 128  ;;  %v1818_v59 = vpop.xlane.xlu1 %1817 }
 0x67f   : > { %vm1836_vm15 = vcmp.ge.f32.partialorder %v6819_v58, %v1818_v59  ;;  %v2024_v53 = vshra.s32 %v6930_v46, 16 }
 0x680   : > { %v6935_v3 = vsel %vm1836_vm15, %v6830_v40, 128  ;;  %v1820_v32 = vpop.xlane.xlu0 %1819 }
 0x681   : > { %vm1837_vm0 = vcmp.ge.f32.partialorder %v6823_v33, %v1820_v32  ;;  %v6938_v7 = vcvt.s32.f32 %v2024_v53  ;;  %v2038_v62 = vshra.s32 %v6935_v3, 16 }
 0x682   : > { %v6942_v14 = vsel %vm1837_vm0, %v6830_v40, 128  ;;  %v1822_v2 = vpop.xlane.xlu1 %1821 }
 0x683   : > { %vm1838_vm1 = vcmp.ge.f32.partialorder %v6826_v31, %v1822_v2  ;;  %2027 = vmin.xlane.f32.xlu0 %v6938_v7  ;;  %v6946_v58 = vcvt.s32.f32 %v2038_v62  ;;  %v2052_v59 = vshra.s32 %v6942_v14, 16  ;;  %v1855_v31 = vand.u32 65535, %v6838_v39 }
 0x684   : > { %v6950_v21 = vsel %vm1838_vm1, %v6830_v40, 128  ;;  %v1897_v39 = vand.u32 65535, %v6847_v47  ;;  %v1925_v47 = vand.u32 65535, %v6871_v42 }
 0x685   : > { %2041 = vmin.xlane.f32.xlu1 %v6946_v58  ;;  %v6953_v32 = vcvt.s32.f32 %v2052_v59  ;;  %v2066_v33 = vshra.s32 %v6950_v21, 16  ;;  %v1857_v2 = vcvt.s32.f32 %v1855_v31 }
 0x686   : > { %v1899_v31 = vcvt.s32.f32 %v1897_v39 }
 0x687   : > { %2055 = vmin.xlane.f32.xlu0 %v6953_v32  ;;  %v6957_v53 = vcvt.s32.f32 %v2066_v33 }
 0x689   : > { %2069 = vmin.xlane.f32.xlu1 %v6957_v53 }
 0x6e0   : > { %v6961_v62 = vpop.xlane.xlu0 %1859 }
 0x6e1   : > { %vm1861_vm2 = vcmp.eq.f32.partialorder %v6843_v50, %v6961_v62 }
 0x6e2   : > { %v1862_v59 = vsel %vm1861_vm2, %v1857_v2, inf  ;;  %v1913_v2 = vcvt.s32.f32 %v1911_v54  ;;  %v1995_v54 = vand.u32 65535, %v6910_v45 }
 0x6e3   : > { %1863 = vmin.xlane.f32.xlu0 %v1862_v59  ;;  %v1927_v59 = vcvt.s32.f32 %v1925_v47 }
 0x6e4   : > { %v6967_v36 = vpop.xlane.xlu1 %1873  ;;  %v6969_v33 = vpop.xlane.xlu0 %1887 }
 0x6e5   : > { %vm1875_vm3 = vcmp.eq.f32.partialorder %v6856_v8, %v6967_v36  ;;  %vm1889_vm4 = vcmp.eq.f32.partialorder %v6854_v22, %v6969_v33 }
 0x6e6   : > { %v1876_v57 = vsel %vm1875_vm3, %v1871_v49, inf  ;;  %v1890_v1 = vsel %vm1889_vm4, %v1885_v15, inf  ;;  %v1939_v49 = vand.u32 65535, %v6878_v16 }
 0x6e7   : > { %1877 = vmin.xlane.f32.xlu1 %v1876_v57  ;;  %1891 = vmin.xlane.f32.xlu0 %v1890_v1  ;;  %v1981_v1 = vand.u32 65535, %v6903_v55 }
 0x6e8   : > { %v6976_v50 = vpop.xlane.xlu1 %1901  ;;  %v1941_v39 = vcvt.s32.f32 %v1939_v49  ;;  %v1997_v49 = vcvt.s32.f32 %v1995_v54  ;;  %v5941_v54 = vld [vmem:[%s9070_s28 + $0x68] sm:$0xff]  }
 0x6e9   : > { %vm1903_vm5 = vcmp.eq.f32.partialorder %v6861_v4, %v6976_v50  ;;  %v1953_v4 = vand.u32 65535, %v6886_v26 }
 0x6ea   : > { %v1904_v41 = vsel %vm1903_vm5, %v1899_v31, inf }
 0x6eb   : > { %1905 = vmin.xlane.f32.xlu1 %v1904_v41  ;;  %v1955_v57 = vcvt.s32.f32 %v1953_v4 }
 0x6f0   : > { %v6982_v8 = vpop.xlane.xlu0 %1915 }
 0x6f1   : > { %vm1917_vm6 = vcmp.eq.f32.partialorder %v6874_v61, %v6982_v8 }
 0x6f2   : > { %v6987_v15 = vpop.xlane.xlu1 %1929  ;;  %v1918_v22 = vsel %vm1917_vm6, %v1913_v2, inf  ;;  %v1983_v2 = vcvt.s32.f32 %v1981_v1  ;;  %v5937_v1 = vld [vmem:[%s9070_s28 + $0x48] sm:$0xff]  }
 0x6f3   : > { %1919 = vmin.xlane.f32.xlu0 %v1918_v22  ;;  %vm1931_vm7 = vcmp.eq.f32.partialorder %v6882_v20, %v6987_v15  ;;  %v1967_v20 = vand.u32 65535, %v6898_v13 }
 0x6f4   : > { %v6992_v52 = vpop.xlane.xlu0 %1943  ;;  %v1932_v42 = vsel %vm1931_vm7, %v1927_v59, inf  ;;  %v2037_v59 = vand.u32 65535, %v6935_v3 }
 0x6f5   : > { %1933 = vmin.xlane.f32.xlu1 %v1932_v42  ;;  %vm1945_vm8 = vcmp.eq.f32.partialorder %v6889_v63, %v6992_v52  ;;  %v1969_v41 = vcvt.s32.f32 %v1967_v20 }
 0x6f6   : > { %v6996_v16 = vpop.xlane.xlu1 %1957  ;;  %v1946_v61 = vsel %vm1945_vm8, %v1941_v39, inf  ;;  %v2051_v39 = vand.u32 65535, %v6942_v14 }
 0x6f7   : > { %1947 = vmin.xlane.f32.xlu0 %v1946_v61  ;;  %vm1959_vm9 = vcmp.eq.f32.partialorder %v6893_v44, %v6996_v16  ;;  %v2009_v44 = vand.u32 65535, %v6918_v9 }
 0x6f8   : > { %v1960_v26 = vsel %vm1959_vm9, %v1955_v57, inf  ;;  %v2039_v57 = vcvt.s32.f32 %v2037_v59 }
 0x6f9   : > { %1961 = vmin.xlane.f32.xlu1 %v1960_v26  ;;  %v2011_v22 = vcvt.s32.f32 %v2009_v44  ;;  %v2053_v26 = vcvt.s32.f32 %v2051_v39  ;;  %v1894_v44 = vcvt.f32.s32 %v6969_v33 }
 0x700   : > { %v7002_v31 = vpop.xlane.xlu0 %1971 }
 0x701   : > { %vm1973_vm10 = vcmp.eq.f32.partialorder %v6906_v35, %v7002_v31 }
 0x702   : > { %v7007_v63 = vpop.xlane.xlu1 %1985  ;;  %v1974_v47 = vsel %vm1973_vm10, %v1969_v41, inf  ;;  %v5940_v41 = vld [vmem:[%s9070_s28 + $0x60] sm:$0xff]  }
 0x703   : > { %1975 = vmin.xlane.f32.xlu0 %v1974_v47  ;;  %vm1987_vm11 = vcmp.eq.f32.partialorder %v6914_v27, %v7007_v63  ;;  %v2023_v27 = vand.u32 65535, %v6930_v46  ;;  %v1866_v47 = vcvt.f32.s32 %v6961_v62 }
 0x704   : > { %v7012_v13 = vpop.xlane.xlu0 %1999  ;;  %v1988_v55 = vsel %vm1987_vm11, %v1983_v2, inf  ;;  %v1880_v2 = vcvt.f32.s32 %v6967_v36  ;;  %v1908_v36 = vcvt.f32.s32 %v6976_v50  ;;  %v1556_v50 = vld [vmem:[%s7066_s21 + $0x18] sm:$0xff] }
 0x705   : > { %1989 = vmin.xlane.f32.xlu1 %v1988_v55  ;;  %vm2001_vm12 = vcmp.eq.f32.partialorder %v6921_v29, %v7012_v13  ;;  %v2025_v42 = vcvt.s32.f32 %v2023_v27  ;;  %v1895_v27 = vshll.u32 %v1894_v44, 16 }
 0x706   : > { %v7016_v45 = vpop.xlane.xlu1 %2013  ;;  %v2002_v35 = vsel %vm2001_vm12, %v1997_v49, inf  ;;  %v1867_v49 = vshll.u32 %v1866_v47, 16  ;;  %v1554_v47 = vld [vmem:[%s7066_s21 + $0x8] sm:$0xff] }
 0x707   : > { %2003 = vmin.xlane.f32.xlu0 %v2002_v35  ;;  %vm2015_vm13 = vcmp.eq.f32.partialorder %v6925_v18, %v7016_v45  ;;  %v2065_v18 = vand.u32 65535, %v6950_v21 }
 0x708   : > { %v2016_v9 = vsel %vm2015_vm13, %v2011_v22, inf }
 0x709   : > { %2017 = vmin.xlane.f32.xlu1 %v2016_v9  ;;  %v2067_v20 = vcvt.s32.f32 %v2065_v18  ;;  %v1881_v9 = vshll.u32 %v1880_v2, 16  ;;  %v1922_v2 = vcvt.f32.s32 %v6982_v8 }
 0x710   : > { %v7022_v4 = vpop.xlane.xlu0 %2027 }
 0x711   : > { %vm2029_vm14 = vcmp.eq.f32.partialorder %v6938_v7, %v7022_v4 }
 0x712   : > { %v7027_v29 = vpop.xlane.xlu1 %2041  ;;  %v2030_v61 = vsel %vm2029_vm14, %v2025_v42, inf  ;;  %v1553_v42 = vld [vmem:[%s7066_s21] sm:$0xff] }
 0x713   : > { %2031 = vmin.xlane.f32.xlu0 %v2030_v61  ;;  %vm2043_vm15 = vcmp.eq.f32.partialorder %v6946_v58, %v7027_v29  ;;  %v5936_v58 = vld [vmem:[%s9070_s28 + $0x40] sm:$0xff]  }
 0x714   : > { %v7032_v46 = vpop.xlane.xlu0 %2055  ;;  %v2044_v3 = vsel %vm2043_vm15, %v2039_v57, inf  ;;  %5631 = vmatprep.subr.bf16.mxu1 %v5936_v58 }
 0x715   : > { %2045 = vmin.xlane.f32.xlu1 %v2044_v3  ;;  %vm2057_vm0 = vcmp.eq.f32.partialorder %v6953_v32, %v7032_v46  ;;  %5632 = vmatpush3.bf16.msra.mxu1 %v5936_v58  ;;  %v5938_v32 = vld [vmem:[%s9070_s28 + $0x50] sm:$0xff]  }
 0x716   : > { %v7036_v14 = vpop.xlane.xlu1 %2069  ;;  %v2058_v7 = vsel %vm2057_vm0, %v2053_v26, inf  ;;  %5633 = vmatprep.subr.bf16.mxu1 %v5937_v1 }
 0x717   : > { %2059 = vmin.xlane.f32.xlu0 %v2058_v7  ;;  %vm2071_vm1 = vcmp.eq.f32.partialorder %v6957_v53, %v7036_v14  ;;  %v5939_v53 = vld [vmem:[%s9070_s28 + $0x58] sm:$0xff]   ;;  %v1555_v7 = vld [vmem:[%s7066_s21 + $0x10] sm:$0xff] }
 0x718   : > { %v2072_v21 = vsel %vm2071_vm1, %v2067_v20, inf  ;;  %v1909_v20 = vshll.u32 %v1908_v36, 16 }
 0x719   : > { %2073 = vmin.xlane.f32.xlu1 %v2072_v21  ;;  %5634 = vmatpush3.bf16.msra.mxu1 %v5937_v1 }
 0x71a   : > { %5635 = vmatprep.subr.bf16.mxu1 %v5938_v32 }
 0x71d   : > { %5636 = vmatpush3.bf16.msra.mxu1 %v5938_v32 }
 0x71e   : > { %5637 = vmatprep.subr.bf16.mxu1 %v5939_v53 }
 0x721   : > { %5638 = vmatpush3.bf16.msra.mxu1 %v5939_v53 }
 0x722   : > { %5639 = vmatprep.subr.bf16.mxu1 %v5940_v41 }
 0x725   : > { %5640 = vmatpush3.bf16.msra.mxu1 %v5940_v41 }
 0x726   : > { %5641 = vmatprep.subr.bf16.mxu1 %v5941_v54 }
 0x729   : > { %5642 = vmatpush3.bf16.msra.mxu1 %v5941_v54 }
 0x770   : > { %v1864_v55 = vpop.xlane.xlu0 %1863 }
 0x771   : > { %v1865_v35 = vcvt.f32.s32 %v1864_v55 }
 0x773   : > { %v1868_v22 = vadd.s32 %v1867_v49, %v1865_v35 }
 0x774   : > { %v1878_v59 = vpop.xlane.xlu1 %1877  ;;  %v1892_v62 = vpop.xlane.xlu0 %1891 }
 0x775   : > { %v2079_v33 = vcvt.s32.f32 %v1868_v22  ;;  %v1879_v39 = vcvt.f32.s32 %v1878_v59  ;;  %v1893_v61 = vcvt.f32.s32 %v1892_v62  ;;  %v1923_v59 = vshll.u32 %v1922_v2, 16 }
 0x776   : > { %v1950_v62 = vcvt.f32.s32 %v6992_v52 }
 0x777   : > { %v1882_v57 = vadd.s32 %v1881_v9, %v1879_v39  ;;  %v1896_v18 = vadd.s32 %v1895_v27, %v1893_v61  ;;  %v2095_v3 = vadd.f32 %v2079_v33, %v1553_v42  ;;  %v1936_v9 = vcvt.f32.s32 %v6987_v15 }
 0x778   : > { %v1906_v26 = vpop.xlane.xlu1 %1905 }
 0x779   : > { %v2081_v21 = vcvt.s32.f32 %v1896_v18  ;;  %v1907_v58 = vcvt.f32.s32 %v1906_v26  ;;  %v2111_v1 = vmul.f32 0.025, %v2095_v3  ;;  %v2080_v32 = vcvt.s32.f32 %v1882_v57  ;;  %v5942_v18 = vld [vmem:[%s9070_s28 + $0x70] sm:$0xff]  }
 0x77a   : > { %v1937_v15 = vshll.u32 %v1936_v9, 16  ;;  %v1964_v3 = vcvt.f32.s32 %v6996_v16  ;;  %v1951_v26 = vshll.u32 %v1950_v62, 16  ;;  %5643 = vmatprep.subr.bf16.mxu1 %v5942_v18  ;;  %v5943_v16 = vld [vmem:[%s9070_s28 + $0x78] sm:$0xff]   ;;  %v1558_v9 = vld [vmem:[%s7066_s21 + $0x28] sm:$0xff] }
 0x77b   : > { %v1910_v53 = vadd.s32 %v1909_v20, %v1907_v58  ;;  %v7071_v41 = vadd.f32 -1.0, %v2111_v1  ;;  %v2097_v54 = vadd.f32 %v2081_v21, %v1555_v7  ;;  %v2096_v22 = vadd.f32 %v2080_v32, %v1554_v47  ;;  %5644 = vmatpush3.bf16.msra.mxu1 %v5942_v18  ;;  %v1557_v47 = vld [vmem:[%s7066_s21 + $0x20] sm:$0xff] }
 0x77c   : > { %5645 = vmatprep.subr.bf16.mxu1 %v5943_v16 }
 0x77d   : > { %9072 = vst [vmem:[#allocation48_spill] sm:$0xff] %v7071_v41  ;;  %v2082_v44 = vcvt.s32.f32 %v1910_v53  ;;  %2147 = vperm.xlu0 %5903, %v7071_v41   ;;  %v2113_v55 = vmul.f32 0.025, %v2097_v54  ;;  %v2112_v57 = vmul.f32 0.025, %v2096_v22  ;;  %v1965_v54 = vshll.u32 %v1964_v3, 16 }
 0x77f   : > { %v7077_v49 = vadd.f32 -1.0, %v2113_v55  ;;  %v2098_v35 = vadd.f32 %v2082_v44, %v1556_v50  ;;  %v7089_v53 = vadd.f32 -1.0, %v2112_v57  ;;  %v1559_v50 = vld [vmem:[%s7066_s21 + $0x30] sm:$0xff]  ;;  %5646 = vmatpush3.bf16.msra.mxu1 %v5943_v16 }
 0x780   : > { %v1920_v27 = vpop.xlane.xlu0 %1919 }
 0x781   : > { %9073 = vst [vmem:[#allocation49_spill] sm:$0xff] %v7077_v49  ;;  %v1921_v42 = vcvt.f32.s32 %v1920_v27  ;;  %2157 = vperm.xlu1 %5904, %v7077_v49   ;;  %v2114_v36 = vmul.f32 0.025, %v2098_v35  ;;  %9075 = vst [vmem:[#allocation51_spill] sm:$0xff] %v7089_v53  ;;  %v1978_v27 = vcvt.f32.s32 %v7002_v31 }
 0x782   : > { %v1934_v33 = vpop.xlane.xlu1 %1933 }
 0x783   : > { %v1924_v8 = vadd.s32 %v1923_v59, %v1921_v42  ;;  %v1935_v39 = vcvt.f32.s32 %v1934_v33  ;;  %v7082_v61 = vadd.f32 -1.0, %v2114_v36  ;;  %v1992_v36 = vcvt.f32.s32 %v7007_v63 }
 0x784   : > { %v1948_v52 = vpop.xlane.xlu0 %1947  ;;  %v1979_v18 = vshll.u32 %v1978_v27, 16 }
 0x785   : > { %9074 = vst [vmem:[#allocation50_spill] sm:$0xff] %v7082_v61  ;;  %v1949_v7 = vcvt.f32.s32 %v1948_v52  ;;  %2162 = vperm.xlu1 %5904, %v7082_v61   ;;  %v1938_v20 = vadd.s32 %v1937_v15, %v1935_v39  ;;  %v2083_v58 = vcvt.s32.f32 %v1924_v8  ;;  %v1560_v39 = vld [vmem:[%s7066_s21 + $0x38] sm:$0xff]  ;;  %v2006_v15 = vcvt.f32.s32 %v7012_v13 }
 0x786   : > { %v1962_v21 = vpop.xlane.xlu1 %1961  ;;  %v2020_v52 = vcvt.f32.s32 %v7016_v45 }
 0x787   : > { %v1952_v1 = vadd.s32 %v1951_v26, %v1949_v7  ;;  %v1963_v32 = vcvt.f32.s32 %v1962_v21  ;;  %v2084_v44 = vcvt.s32.f32 %v1938_v20  ;;  %v2099_v22 = vadd.f32 %v2083_v58, %v1557_v47 }
 0x788   : > { %v1993_v20 = vshll.u32 %v1992_v36, 16  ;;  %v2021_v45 = vshll.u32 %v2020_v52, 16  ;;  %v2034_v52 = vcvt.f32.s32 %v7022_v4 }
 0x789   : > { %v2085_v2 = vcvt.s32.f32 %v1952_v1  ;;  %2152 = vperm.xlu1 %5904, %v7089_v53   ;;  %v1966_v55 = vadd.s32 %v1965_v54, %v1963_v32  ;;  %v2100_v42 = vadd.f32 %v2084_v44, %v1558_v9  ;;  %v2115_v8 = vmul.f32 0.025, %v2099_v22  ;;  %v1561_v32 = vld [vmem:[%s7066_s21 + $0x40] sm:$0xff] }
 0x78a   : > { %v2007_v54 = vshll.u32 %v2006_v15, 16 }
 0x78b   : > { %v2101_v35 = vadd.f32 %v2085_v2, %v1559_v50  ;;  %v2086_v62 = vcvt.s32.f32 %v1966_v55  ;;  %v2116_v26 = vmul.f32 0.025, %v2100_v42  ;;  %v7106_v58 = vadd.f32 -1.0, %v2115_v8  ;;  %v1562_v55 = vld [vmem:[%s7066_s21 + $0x48] sm:$0xff] }
 0x78d   : > { %v2117_v59 = vmul.f32 0.025, %v2101_v35  ;;  %v2102_v7 = vadd.f32 %v2086_v62, %v1560_v39  ;;  %9077 = vst [vmem:[#allocation53_spill] sm:$0xff] %v7106_v58  ;;  %v7110_v16 = vadd.f32 -1.0, %v2116_v26  ;;  %v1564_v39 = vld [vmem:[%s7066_s21 + $0x58] sm:$0xff] }
 0x78f   : > { %v7100_v33 = vadd.f32 -1.0, %v2117_v59  ;;  %9078 = vst [vmem:[#allocation54_spill] sm:$0xff] %v7110_v16  ;;  %v2118_v44 = vmul.f32 0.025, %v2102_v7  ;;  %v1563_v59 = vld [vmem:[%s7066_s21 + $0x50] sm:$0xff]  ;;  %v2048_v7 = vcvt.f32.s32 %v7027_v29 }
 0x790   : > { %v1976_v57 = vpop.xlane.xlu0 %1975 }
 0x791   : > { %9076 = vst [vmem:[#allocation52_spill] sm:$0xff] %v7100_v33  ;;  %v1977_v3 = vcvt.f32.s32 %v1976_v57  ;;  %2177 = vperm.xlu1 %5904, %v7100_v33   ;;  %v7115_v8 = vadd.f32 -1.0, %v2118_v44 }
 0x792   : > { %v1990_v31 = vpop.xlane.xlu1 %1989 }
 0x793   : > { %v1980_v63 = vadd.s32 %v1979_v18, %v1977_v3  ;;  %v1991_v21 = vcvt.f32.s32 %v1990_v31  ;;  %9079 = vst [vmem:[#allocation55_spill] sm:$0xff] %v7115_v8 }
 0x794   : > { %v2004_v1 = vpop.xlane.xlu0 %2003 }
 0x795   : > { %v2087_v50 = vcvt.s32.f32 %v1980_v63  ;;  %v1994_v13 = vadd.s32 %v1993_v20, %v1991_v21  ;;  %v2005_v47 = vcvt.f32.s32 %v2004_v1  ;;  %2167 = vperm.xlu1 %5904, %v7106_v58  }
 0x796   : > { %v2018_v2 = vpop.xlane.xlu1 %2017 }
 0x797   : > { %v2088_v35 = vcvt.s32.f32 %v1994_v13  ;;  %v2008_v22 = vadd.s32 %v2007_v54, %v2005_v47  ;;  %v2019_v9 = vcvt.f32.s32 %v2018_v2  ;;  %v2103_v27 = vadd.f32 %v2087_v50, %v1561_v32 }
 0x798   : > { %v2035_v32 = vshll.u32 %v2034_v52, 16  ;;  %v2062_v54 = vcvt.f32.s32 %v7032_v46  ;;  %v2076_v13 = vcvt.f32.s32 %v7036_v14  ;;  %v2049_v47 = vshll.u32 %v2048_v7, 16  ;;  %v1568_v7 = vld [vmem:[%s7066_s21 + $0x78] sm:$0xff] }
 0x799   : > { %v2089_v62 = vcvt.s32.f32 %v2008_v22  ;;  %v2022_v42 = vadd.s32 %v2021_v45, %v2019_v9  ;;  %2172 = vperm.xlu1 %5904, %v7110_v16   ;;  %v2104_v36 = vadd.f32 %v2088_v35, %v1562_v55  ;;  %v2119_v15 = vmul.f32 0.025, %v2103_v27  ;;  %v1565_v35 = vld [vmem:[%s7066_s21 + $0x60] sm:$0xff] }
 0x79a   : > { %v2063_v46 = vshll.u32 %v2062_v54, 16  ;;  %v2077_v14 = vshll.u32 %v2076_v13, 16 }
 0x79b   : > { %v2090_v57 = vcvt.s32.f32 %v2022_v42  ;;  %v2120_v18 = vmul.f32 0.025, %v2104_v36  ;;  %v2105_v3 = vadd.f32 %v2089_v62, %v1563_v59  ;;  %v7124_v20 = vadd.f32 -1.0, %v2119_v15  ;;  %v1566_v62 = vld [vmem:[%s7066_s21 + $0x68] sm:$0xff] }
 0x79d   : > { %2182 = vperm.xlu1 %5904, %v7115_v8   ;;  %v7120_v31 = vadd.f32 -1.0, %v2120_v18  ;;  %v2106_v26 = vadd.f32 %v2090_v57, %v1564_v39  ;;  %9081 = vst [vmem:[#allocation57_spill] sm:$0xff] %v7124_v20  ;;  %v2121_v21 = vmul.f32 0.025, %v2105_v3  ;;  %v1567_v18 = vld [vmem:[%s7066_s21 + $0x70] sm:$0xff] }
 0x79f   : > { %9080 = vst [vmem:[#allocation56_spill] sm:$0xff] %v7120_v31  ;;  %2192 = vperm.xlu0 %5903, %v7120_v31   ;;  %v2122_v63 = vmul.f32 0.025, %v2106_v26  ;;  %v7132_v44 = vadd.f32 -1.0, %v2121_v21 }
 0x7a0   : > { %v2032_v1 = vpop.xlane.xlu0 %2031 }
 0x7a1   : > { %v2033_v50 = vcvt.f32.s32 %v2032_v1  ;;  %2187 = vperm.xlu1 %5904, %v7124_v20   ;;  %v7128_v4 = vadd.f32 -1.0, %v2122_v63  ;;  %9083 = vst [vmem:[#allocation59_spill] sm:$0xff] %v7132_v44 }
 0x7a2   : > { %v2046_v29 = vpop.xlane.xlu1 %2045 }
 0x7a3   : > { %9082 = vst [vmem:[#allocation58_spill] sm:$0xff] %v7128_v4  ;;  %v2036_v45 = vadd.s32 %v2035_v32, %v2033_v50  ;;  %v2047_v2 = vcvt.f32.s32 %v2046_v29  ;;  %2202 = vperm.xlu0 %5903, %v7128_v4  }
 0x7a4   : > { %v2060_v55 = vpop.xlane.xlu0 %2059 }
 0x7a5   : > { %v2091_v22 = vcvt.s32.f32 %v2036_v45  ;;  %v2050_v9 = vadd.s32 %v2049_v47, %v2047_v2  ;;  %v2061_v27 = vcvt.f32.s32 %v2060_v55  ;;  %2197 = vperm.xlu1 %5904, %v7132_v44   ;;  %v5944_v2 = vld [vmem:[%s8940_s8 + $0x40] sm:$0xff]   ;;  %v5945_v55 = vld [vmem:[%s8940_s8 + $0x48] sm:$0xff]  }
 0x7a6   : > { %v2074_v59 = vpop.xlane.xlu1 %2073  ;;  %5663 = vmatprep.subr.bf16.mxu0 %v5944_v2 }
 0x7a7   : > { %v2092_v42 = vcvt.s32.f32 %v2050_v9  ;;  %v2064_v36 = vadd.s32 %v2063_v46, %v2061_v27  ;;  %v2075_v39 = vcvt.f32.s32 %v2074_v59  ;;  %v2107_v57 = vadd.f32 %v2091_v22, %v1565_v35  ;;  %5664 = vmatpush3.bf16.msra.mxu0 %v5944_v2  ;;  %v5946_v35 = vld [vmem:[%s8940_s8 + $0x50] sm:$0xff]   ;;  %v5947_v46 = vld [vmem:[%s8940_s8 + $0x58] sm:$0xff]   ;;  %v5948_v22 = vld [vmem:[%s8940_s8 + $0x60] sm:$0xff]  }
 0x7a8   : > { %5665 = vmatprep.subr.bf16.mxu0 %v5945_v55  ;;  %v5949_v9 = vld [vmem:[%s8940_s8 + $0x68] sm:$0xff]   ;;  %v2143_v27 = vld [vmem:[%s9088_s25] sm:$0x7] }
 0x7a9   : > { %v2093_v15 = vcvt.s32.f32 %v2064_v36  ;;  %v2078_v3 = vadd.s32 %v2077_v14, %v2075_v39  ;;  %v2123_v52 = vmul.f32 0.025, %v2107_v57  ;;  %v2108_v26 = vadd.f32 %v2092_v42, %v1566_v62  ;;  %v5210_v57 = vld [vmem:[%s9091_s7] ss:$0 sm:$0xff] }
 0x7aa   : > { %v2228_v59 = vrot.slane %v2143_v27, %v6624_v6 }
 0x7ab   : > { %v2094_v63 = vcvt.s32.f32 %v2078_v3  ;;  %v7139_v21 = vadd.f32 -1.0, %v2123_v52  ;;  %v2124_v1 = vmul.f32 0.025, %v2108_v26  ;;  %v2109_v32 = vadd.f32 %v2093_v15, %v1567_v18  ;;  %5666 = vmatpush3.bf16.msra.mxu0 %v5945_v55 }
 0x7ac   : > { %5667 = vmatprep.subr.bf16.mxu0 %v5946_v35 }
 0x7ad   : > { %9084 = vst [vmem:[#allocation60_spill] sm:$0xff] %v7139_v21  ;;  %2207 = vperm.xlu1 %5904, %v7139_v21   ;;  %v7142_v54 = vadd.f32 -1.0, %v2124_v1  ;;  %v2125_v50 = vmul.f32 0.025, %v2109_v32  ;;  %v2110_v13 = vadd.f32 %v2094_v63, %v1568_v7 }
 0x7af   : > { %9085 = vst [vmem:[#allocation61_spill] sm:$0xff] %v7142_v54  ;;  %2212 = vperm.xlu0 %5903, %v7142_v54   ;;  %v7145_v29 = vadd.f32 -1.0, %v2125_v50  ;;  %v2126_v47 = vmul.f32 0.025, %v2110_v13  ;;  %5668 = vmatpush3.bf16.msra.mxu0 %v5946_v35 }
 0x7b0   : > { %5669 = vmatprep.subr.bf16.mxu0 %v5947_v46 }
 0x7b1   : > { %9086 = vst [vmem:[#allocation62_spill] sm:$0xff] %v7145_v29  ;;  %2217 = vperm.xlu1 %5904, %v7145_v29   ;;  %v7148_v45 = vadd.f32 -1.0, %v2126_v47 }
 0x7b3   : > { %9087 = vst [vmem:[#allocation63_spill] sm:$0xff] %v7148_v45  ;;  %2222 = vperm.xlu0 %5903, %v7148_v45   ;;  %5670 = vmatpush3.bf16.msra.mxu0 %v5947_v46 }
 0x7b4   : > { %5671 = vmatprep.subr.bf16.mxu0 %v5948_v22 }
 0x7b7   : > { %5672 = vmatpush3.bf16.msra.mxu0 %v5948_v22 }
 0x7b8   : > { %5673 = vmatprep.subr.bf16.mxu0 %v5949_v9 }
 0x7bb   : > { %5674 = vmatpush3.bf16.msra.mxu0 %v5949_v9 }
 0x7fc   : > { %v7175_v62 = vpop.permute.xlu0 %2147 }
 0x7fd   : > { %v2229_v39 = vmul.f32 %v2228_v59, %v7175_v62 }
 0x7ff   : > { %v2249_v26 = vadd.f32 %v5210_v57, %v2229_v39 }
 0x800   : > { %v7172_v14 = vpop.permute.xlu1 %2157 }
 0x801   : > { %9089 = vst [vmem:[#allocation64_spill] sm:$0xff] %v7172_v14  ;;  %v2231_v18 = vmul.f32 %v2228_v59, %v7172_v14 }
 0x803   : > { %v2251_v63 = vadd.f32 %v5210_v57, %v2231_v18 }
 0x804   : > { %v7177_v42 = vpop.permute.xlu1 %2162 }
 0x805   : > { %9090 = vst [vmem:[#allocation65_spill] sm:$0xff] %v7177_v42  ;;  %v2232_v36 = vmul.f32 %v2228_v59, %v7177_v42 }
 0x807   : > { %v2252_v52 = vadd.f32 %v5210_v57, %v2232_v36 }
 0x808   : > { %v7185_v15 = vpop.permute.xlu1 %2152 }
 0x809   : > { %v2230_v3 = vmul.f32 %v2228_v59, %v7185_v15  ;;  %v2266_v32 = vpack.c.bf16 %v2252_v52, %v2251_v63 }
 0x80b   : > { %v2250_v7 = vadd.f32 %v5210_v57, %v2230_v3 }
 0x80d   : > { %v2265_v1 = vpack.c.bf16 %v2250_v7, %v2249_v26 }
 0x80f   : > { %5647 = vmatprep.mubr.bf16.mxu1 %v2265_v1 }
 0x810   : > { %v7188_v50 = vpop.permute.xlu1 %2177  ;;  %5648 = vmatmul.mubr.bf16.vlgmr.msra.gmra.mrb[72].mxu1 %v2266_v32 }
 0x811   : > { %9092 = vst [vmem:[#allocation66_spill] sm:$0xff] %v7188_v50  ;;  %v2235_v35 = vmul.f32 %v2228_v59, %v7188_v50 }
 0x813   : > { %v2255_v3 = vadd.f32 %v5210_v57, %v2235_v35 }
 0x814   : > { %v7190_v13 = vpop.permute.xlu1 %2167 }
 0x815   : > { %9093 = vst [vmem:[#allocation67_spill] sm:$0xff] %v7190_v13  ;;  %v2233_v47 = vmul.f32 %v2228_v59, %v7190_v13 }
 0x817   : > { %v2253_v46 = vadd.f32 %v5210_v57, %v2233_v47 }
 0x818   : > { %v7193_v2 = vpop.permute.xlu1 %2172 }
 0x819   : > { %9094 = vst [vmem:[#allocation68_spill] sm:$0xff] %v7193_v2  ;;  %v2234_v55 = vmul.f32 %v2228_v59, %v7193_v2 }
 0x81b   : > { %v2254_v22 = vadd.f32 %v5210_v57, %v2234_v55 }
 0x81c   : > { %v7197_v9 = vpop.permute.xlu1 %2182 }
 0x81d   : > { %9095 = vst [vmem:[#allocation69_spill] sm:$0xff] %v7197_v9  ;;  %v2236_v27 = vmul.f32 %v2228_v59, %v7197_v9  ;;  %v2267_v36 = vpack.c.bf16 %v2254_v22, %v2253_v46 }
 0x81e   : > { %v7200_v39 = vpop.permute.xlu0 %2192 }
 0x81f   : > { %9096 = vst [vmem:[#allocation70_spill] sm:$0xff] %v7200_v39  ;;  %v2238_v18 = vmul.f32 %v2228_v59, %v7200_v39  ;;  %5651 = vmatprep.mubr.bf16.mxu1 %v2267_v36  ;;  %v2256_v52 = vadd.f32 %v5210_v57, %v2236_v27 }
 0x820   : > { %v7203_v26 = vpop.permute.xlu1 %2187 }
 0x821   : > { %9097 = vst [vmem:[#allocation71_spill] sm:$0xff] %v7203_v26  ;;  %v2237_v7 = vmul.f32 %v2228_v59, %v7203_v26  ;;  %v2268_v63 = vpack.c.bf16 %v2256_v52, %v2255_v3  ;;  %v2258_v55 = vadd.f32 %v5210_v57, %v2238_v18 }
 0x822   : > { %v7206_v1 = vpop.permute.xlu0 %2202 }
 0x823   : > { %9098 = vst [vmem:[#allocation72_spill] sm:$0xff] %v7206_v1  ;;  %v2240_v32 = vmul.f32 %v2228_v59, %v7206_v1  ;;  %5652 = vmatmul.mubr.bf16.gmra.mrb[76].mxu1 %v2268_v63  ;;  %v2257_v47 = vadd.f32 %v5210_v57, %v2237_v7 }
 0x824   : > { %v7209_v46 = vpop.permute.xlu1 %2197 }
 0x825   : > { %9099 = vst [vmem:[#allocation73_spill] sm:$0xff] %v7209_v46  ;;  %v2239_v22 = vmul.f32 %v2228_v59, %v7209_v46  ;;  %v2269_v45 = vpack.c.bf16 %v2258_v55, %v2257_v47  ;;  %v2260_v27 = vadd.f32 %v5210_v57, %v2240_v32 }
 0x827   : > { %5655 = vmatprep.mubr.bf16.mxu1 %v2269_v45  ;;  %v2259_v35 = vadd.f32 %v5210_v57, %v2239_v22 }
 0x829   : > { %v2270_v36 = vpack.c.bf16 %v2260_v27, %v2259_v35  ;;  %v5950_v27 = vld [vmem:[%s8940_s8 + $0x70] sm:$0xff]  }
 0x82a   : > { %5675 = vmatprep.subr.bf16.mxu0 %v5950_v27 }
 0x82b   : > { %5656 = vmatmul.mubr.bf16.gmra.mrb[80].mxu1 %v2270_v36  ;;  %5676 = vmatpush3.bf16.msra.mxu0 %v5950_v27  ;;  %v5951_v36 = vld [vmem:[%s8940_s8 + $0x78] sm:$0xff]  }
 0x82c   : > { %v7212_v29 = vpop.permute.xlu1 %2207  ;;  %5677 = vmatprep.subr.bf16.mxu0 %v5951_v36 }
 0x82d   : > { %9100 = vst [vmem:[#allocation74_spill] sm:$0xff] %v7212_v29  ;;  %v2241_v3 = vmul.f32 %v2228_v59, %v7212_v29 }
 0x82e   : > { %v7215_v52 = vpop.permute.xlu0 %2212 }
 0x82f   : > { %9101 = vst [vmem:[#allocation75_spill] sm:$0xff] %v7215_v52  ;;  %v2242_v63 = vmul.f32 %v2228_v59, %v7215_v52  ;;  %v2261_v54 = vadd.f32 %v5210_v57, %v2241_v3  ;;  %5678 = vmatpush3.bf16.msra.mxu0 %v5951_v36 }
 0x830   : > { %v7218_v7 = vpop.permute.xlu1 %2217 }
 0x831   : > { %9102 = vst [vmem:[#allocation76_spill] sm:$0xff] %v7218_v7  ;;  %v2243_v18 = vmul.f32 %v2228_v59, %v7218_v7  ;;  %v2262_v21 = vadd.f32 %v5210_v57, %v2242_v63 }
 0x832   : > { %v7221_v47 = vpop.permute.xlu0 %2222 }
 0x833   : > { %9103 = vst [vmem:[#allocation77_spill] sm:$0xff] %v7221_v47  ;;  %v2244_v45 = vmul.f32 %v2228_v59, %v7221_v47  ;;  %v2271_v32 = vpack.c.bf16 %v2262_v21, %v2261_v54  ;;  %v2263_v55 = vadd.f32 %v5210_v57, %v2243_v18  ;;  %v7231_v59 = vsub.s32 1, %v6621_v5  ;;  %v5984_v21 = vld [vmem:[%s8938_s6] sm:$0xf] }
 0x835   : > { %5659 = vmatprep.mubr.bf16.mxu1 %v2271_v32  ;;  %v2264_v22 = vadd.f32 %v5210_v57, %v2244_v45  ;;  %v7237_v54 = vrot.slane %v5984_v21, %v7231_v59 }
 0x837   : > { %v2272_v35 = vpack.c.bf16 %v2264_v22, %v2263_v55  ;;  %v1372_v57 = vadd.f32 %v6649_v25, %v7237_v54  ;;  %v1362_v3 = vadd.f32 %v6635_v12, %v7237_v54  ;;  %v1376_v18 = vadd.f32 %v6656_v30, %v7237_v54 }
 0x838   : > { %v1366_v55 = vadd.f32 %v6642_v17, %v7237_v54  ;;  %v1392_v30 = vadd.f32 %v6677_v51, %v7237_v54 }
 0x839   : > { %5660 = vmatmul.mubr.bf16.gmra.mrb[84].mxu1 %v2272_v35 }
 0x8e3   : > { %v5649_v63 = vpop.f32.mrb[72].mxu1 }
 0x8e4   : > { %v2437_v45 = vadd.f32 %v5649_v63, %v1372_v57  ;;  %v2372_v32 = vpop.f32.mrb[73].mxu1  ;;  %v1382_v57 = vadd.f32 %v6663_v38, %v7237_v54  ;;  %v1412_v38 = vadd.f32 %v6705_v24, %v7237_v54 }
 0x8e5   : > { %v2435_v22 = vadd.f32 %v2372_v32, %v1362_v3  ;;  %v5650_v35 = vpop.f32.mrb[74].mxu1  ;;  %v1396_v3 = vadd.f32 %v6684_v56, %v7237_v54  ;;  %v1402_v56 = vadd.f32 %v6691_v0, %v7237_v54 }
 0x8e6   : > { %v2438_v27 = vadd.f32 %v5650_v35, %v1376_v18  ;;  %v2375_v36 = vpop.f32.mrb[75].mxu1  ;;  %v2453_v4 = vmax.f32 %v2437_v45, 0.0  ;;  %v1386_v45 = vadd.f32 %v6670_v43, %v7237_v54  ;;  %v1416_v43 = vadd.f32 %v6712_v34, %v7237_v54 }
 0x8e7   : > { %v2436_v21 = vadd.f32 %v2375_v36, %v1366_v55  ;;  %v2451_v25 = vmax.f32 %v2435_v22, 0.0  ;;  %v1432_v34 = vadd.f32 %v6733_v19, %v7237_v54 }
 0x8e8   : > { %v2454_v44 = vmax.f32 %v2438_v27, 0.0 }
 0x8e9   : > { %v2452_v31 = vmax.f32 %v2436_v21, 0.0 }
 0x8ea   : > { %v2468_v20 = vpack.c.bf16 %v2454_v44, %v2453_v4 }
 0x8eb   : > { %v2467_v12 = vpack.c.bf16 %v2452_v31, %v2451_v25 }
 0x8ed   : > { %5679 = vmatprep.mubr.bf16.mxu0 %v2467_v12 }
 0x8ee   : > { %5680 = vmatmul.mubr.bf16.vlgmr.msra.gmra.mrb[72].mxu0 %v2468_v20 }
 0x8f6   : > { %v5653_v17 = vpop.f32.mrb[76].mxu1 }
 0x8f7   : > { %v2441_v63 = vadd.f32 %v5653_v17, %v1392_v30  ;;  %v2388_v18 = vpop.f32.mrb[77].mxu1  ;;  %v1406_v30 = vadd.f32 %v6698_v11, %v7237_v54  ;;  %v1422_v11 = vadd.f32 %v6719_v48, %v7237_v54 }
 0x8f8   : > { %v2439_v32 = vadd.f32 %v2388_v18, %v1382_v57  ;;  %v5654_v4 = vpop.f32.mrb[78].mxu1 }
 0x8f9   : > { %v2442_v31 = vadd.f32 %v5654_v4, %v1396_v3  ;;  %v2391_v44 = vpop.f32.mrb[79].mxu1  ;;  %v2457_v55 = vmax.f32 %v2441_v63, 0.0 }
 0x8fa   : > { %v2440_v20 = vadd.f32 %v2391_v44, %v1386_v45  ;;  %v2455_v51 = vmax.f32 %v2439_v32, 0.0 }
 0x8fb   : > { %v2458_v22 = vmax.f32 %v2442_v31, 0.0 }
 0x8fc   : > { %v2456_v35 = vmax.f32 %v2440_v20, 0.0  ;;  %v1436_v20 = vadd.f32 %v6740_v37, %v7237_v54 }
 0x8fd   : > { %v2470_v27 = vpack.c.bf16 %v2458_v22, %v2457_v55 }
 0x8fe   : > { %v2469_v36 = vpack.c.bf16 %v2456_v35, %v2455_v51  ;;  %v5657_v21 = vpop.f32.mrb[80].mxu1  ;;  %v1426_v51 = vadd.f32 %v6726_v60, %v7237_v54  ;;  %v7274_v60 = vld [vmem:[%s8941_s9 + $0x1] ss:$0 sm:$0xff] }
 0x8ff   : > { %v2445_v25 = vadd.f32 %v5657_v21, %v1412_v38  ;;  %v2404_v12 = vpop.f32.mrb[81].mxu1 }
 0x900   : > { %v2443_v57 = vadd.f32 %v2404_v12, %v1402_v56  ;;  %v5658_v17 = vpop.f32.mrb[82].mxu1  ;;  %5683 = vmatprep.mubr.bf16.mxu0 %v2469_v36 }
 0x901   : > { %v2446_v3 = vadd.f32 %v5658_v17, %v1416_v43  ;;  %v2407_v63 = vpop.f32.mrb[83].mxu1  ;;  %5684 = vmatmul.mubr.bf16.gmra.mrb[76].mxu0 %v2470_v27  ;;  %v2461_v18 = vmax.f32 %v2445_v25, 0.0 }
 0x902   : > { %v2444_v24 = vadd.f32 %v2407_v63, %v1406_v30  ;;  %v2459_v0 = vmax.f32 %v2443_v57, 0.0  ;;  %v2642_v30 = vld [vmem:[%s6464_s18 + $0x8] sm:$0xff] }
 0x903   : > { %v2462_v45 = vmax.f32 %v2446_v3, 0.0  ;;  %v2643_v63 = vld [vmem:[%s6464_s18 + $0x28] sm:$0xff] }
 0x904   : > { %v2460_v32 = vmax.f32 %v2444_v24, 0.0 }
 0x905   : > { %v2472_v4 = vpack.c.bf16 %v2462_v45, %v2461_v18 }
 0x906   : > { %v2471_v31 = vpack.c.bf16 %v2460_v32, %v2459_v0  ;;  %v2645_v0 = vld [vmem:[%s6464_s18 + $0x68] sm:$0xff] }
 0x908   : > { %5687 = vmatprep.mubr.bf16.mxu0 %v2471_v31  ;;  %v2644_v31 = vld [vmem:[%s6464_s18 + $0x48] sm:$0xff] }
 0x909   : > { %5688 = vmatmul.mubr.bf16.gmra.mrb[80].mxu0 %v2472_v4 }
 0x90c   : > { %v5661_v44 = vpop.f32.mrb[84].mxu1 }
 0x90d   : > { %v2449_v55 = vadd.f32 %v5661_v44, %v1432_v34  ;;  %v2420_v22 = vpop.f32.mrb[85].mxu1 }
 0x90e   : > { %v2447_v35 = vadd.f32 %v2420_v22, %v1422_v11  ;;  %v5662_v38 = vpop.f32.mrb[86].mxu1 }
 0x90f   : > { %v2450_v27 = vadd.f32 %v5662_v38, %v1436_v20  ;;  %v2423_v56 = vpop.f32.mrb[87].mxu1  ;;  %v2465_v19 = vmax.f32 %v2449_v55, 0.0  ;;  %v2646_v55 = vld [vmem:[%s6464_s18 + $0x88] sm:$0xff] }
 0x910   : > { %v2448_v36 = vadd.f32 %v2423_v56, %v1426_v51  ;;  %v2463_v43 = vmax.f32 %v2447_v35, 0.0  ;;  %v2647_v38 = vld [vmem:[%s6464_s18 + $0xa8] sm:$0xff] }
 0x911   : > { %v2466_v21 = vmax.f32 %v2450_v27, 0.0 }
 0x912   : > { %v2464_v48 = vmax.f32 %v2448_v36, 0.0 }
 0x913   : > { %v2474_v25 = vpack.c.bf16 %v2466_v21, %v2465_v19  ;;  %v2648_v19 = vld [vmem:[%s6464_s18 + $0xc8] sm:$0xff] }
 0x914   : > { %v2473_v12 = vpack.c.bf16 %v2464_v48, %v2463_v43  ;;  %v2649_v48 = vld [vmem:[%s6464_s18 + $0xe8] sm:$0xff] }
 0x916   : > { %5691 = vmatprep.mubr.bf16.mxu0 %v2473_v12 }
 0x917   : > { %5692 = vmatmul.mubr.bf16.gmra.mrb[84].mxu0 %v2474_v25 }
 0x9c1   : > { %v5681_v37 = vpop.f32.mrb[72].mxu0 }
 0x9c2   : > { %v2579_v54 = vpop.f32.mrb[73].mxu0  ;;  %v2588_v32 = vadd.f32 %v5681_v37, %v7274_v60 }
 0x9c3   : > { %v2580_v57 = vadd.f32 %v7274_v60, %v2579_v54  ;;  %v5682_v17 = vpop.f32.mrb[74].mxu0  ;;  %v2650_v54 = vld [vmem:[%s6464_s18 + $0x108] sm:$0xff] }
 0x9c4   : > { %v2582_v3 = vpop.f32.mrb[75].mxu0  ;;  %v2591_v24 = vadd.f32 %v5682_v17, %v7274_v60  ;;  %v7293_v11 = vadd.f32 %v2644_v31, %v2588_v32  ;;  %v2652_v32 = vld [vmem:[%s6464_s18 + $0x148] sm:$0xff] }
 0x9c5   : > { %v2583_v18 = vadd.f32 %v7274_v60, %v2582_v3  ;;  %v7281_v45 = vadd.f32 %v2642_v30, %v2580_v57 }
 0x9c6   : > { %v7290_v34 = vadd.f32 %v2645_v0, %v2591_v24 }
 0x9c7   : > { %2674 = vmax.xlane.f32.xlu1 %v7281_v45  ;;  %v7286_v4 = vadd.f32 %v2643_v63, %v2583_v18  ;;  %v2651_v63 = vld [vmem:[%s6464_s18 + $0x128] sm:$0xff] }
 0x9c9   : > { %2676 = vmax.xlane.f32.xlu0 %v7286_v4 }
 0x9cb   : > { %2680 = vmax.xlane.f32.xlu1 %v7290_v34 }
 0x9cd   : > { %2678 = vmax.xlane.f32.xlu0 %v7293_v11 }
 0x9d4   : > { %v5685_v44 = vpop.f32.mrb[76].mxu0 }
 0x9d5   : > { %v2595_v20 = vpop.f32.mrb[77].mxu0  ;;  %v2604_v27 = vadd.f32 %v5685_v44, %v7274_v60 }
 0x9d6   : > { %v2596_v22 = vadd.f32 %v7274_v60, %v2595_v20  ;;  %v5686_v51 = vpop.f32.mrb[78].mxu0  ;;  %v2653_v20 = vld [vmem:[%s6464_s18 + $0x168] sm:$0xff] }
 0x9d7   : > { %v2598_v35 = vpop.f32.mrb[79].mxu0  ;;  %v2607_v21 = vadd.f32 %v5686_v51, %v7274_v60  ;;  %v7310_v12 = vadd.f32 %v2648_v19, %v2604_v27 }
 0x9d8   : > { %v2599_v56 = vadd.f32 %v7274_v60, %v2598_v35  ;;  %v7301_v36 = vadd.f32 %v2646_v55, %v2596_v22 }
 0x9d9   : > { %v7315_v17 = vadd.f32 %v2649_v48, %v2607_v21  ;;  %v2655_v21 = vld [vmem:[%s6464_s18 + $0x1a8] sm:$0xff] }
 0x9da   : > { %2682 = vmax.xlane.f32.xlu0 %v7301_v36  ;;  %v7306_v43 = vadd.f32 %v2647_v38, %v2599_v56  ;;  %v2654_v38 = vld [vmem:[%s6464_s18 + $0x188] sm:$0xff] }
 0x9dc   : > { %2684 = vmax.xlane.f32.xlu1 %v7306_v43  ;;  %v5689_v25 = vpop.f32.mrb[80].mxu0 }
 0x9dd   : > { %v2611_v37 = vpop.f32.mrb[81].mxu0  ;;  %v2620_v24 = vadd.f32 %v5689_v25, %v7274_v60 }
 0x9de   : > { %v2612_v30 = vadd.f32 %v7274_v60, %v2611_v37  ;;  %2686 = vmax.xlane.f32.xlu0 %v7310_v12  ;;  %v5690_v57 = vpop.f32.mrb[82].mxu0 }
 0x9df   : > { %v2614_v3 = vpop.f32.mrb[83].mxu0  ;;  %v2623_v31 = vadd.f32 %v5690_v57, %v7274_v60  ;;  %v7330_v55 = vadd.f32 %v2652_v32, %v2620_v24 }
 0x9e0   : > { %v2615_v18 = vadd.f32 %v7274_v60, %v2614_v3  ;;  %2688 = vmax.xlane.f32.xlu1 %v7315_v17  ;;  %v7321_v0 = vadd.f32 %v2650_v54, %v2612_v30  ;;  %v2656_v54 = vld [vmem:[%s6464_s18 + $0x1c8] sm:$0xff] }
 0x9e1   : > { %v7333_v22 = vadd.f32 %v2653_v20, %v2623_v31  ;;  %v2657_v3 = vld [vmem:[%s6464_s18 + $0x1e8] sm:$0xff] }
 0x9e2   : > { %2690 = vmax.xlane.f32.xlu0 %v7321_v0  ;;  %v7326_v44 = vadd.f32 %v2651_v63, %v2615_v18 }
 0x9e4   : > { %2692 = vmax.xlane.f32.xlu1 %v7326_v44 }
 0x9e6   : > { %2694 = vmax.xlane.f32.xlu0 %v7330_v55 }
 0x9e8   : > { %2696 = vmax.xlane.f32.xlu1 %v7333_v22 }
 0x9ea   : > { %v5693_v51 = vpop.f32.mrb[84].mxu0 }
 0x9eb   : > { %v2627_v35 = vpop.f32.mrb[85].mxu0  ;;  %v2636_v48 = vadd.f32 %v5693_v51, %v7274_v60 }
 0x9ec   : > { %v2628_v27 = vadd.f32 %v7274_v60, %v2627_v35  ;;  %v5694_v56 = vpop.f32.mrb[86].mxu0 }
 0x9ed   : > { %v2630_v19 = vpop.f32.mrb[87].mxu0  ;;  %v2639_v30 = vadd.f32 %v5694_v56, %v7274_v60  ;;  %v7350_v63 = vadd.f32 %v2656_v54, %v2636_v48 }
 0x9ee   : > { %v2631_v25 = vadd.f32 %v7274_v60, %v2630_v19  ;;  %v7341_v37 = vadd.f32 %v2654_v38, %v2628_v27 }
 0x9ef   : > { %v7353_v24 = vadd.f32 %v2657_v3, %v2639_v30 }
 0x9f0   : > { %2698 = vmax.xlane.f32.xlu0 %v7341_v37  ;;  %v7346_v57 = vadd.f32 %v2655_v21, %v2631_v25 }
 0x9f2   : > { %2700 = vmax.xlane.f32.xlu1 %v7346_v57 }
 0x9f4   : > { %2702 = vmax.xlane.f32.xlu0 %v7350_v63 }
 0x9f6   : > { %2704 = vmax.xlane.f32.xlu1 %v7353_v24 }
 0xa54   : > { %v2675_v18 = vpop.xlane.xlu1 %2674 }
 0xa55   : > { %vm2706_vm2 = vcmp.ge.f32.partialorder %v7281_v45, %v2675_v18 }
 0xa56   : > { %v7358_v60 = vsel %vm2706_vm2, %v6830_v40, 128  ;;  %v2677_v32 = vpop.xlane.xlu0 %2676 }
 0xa57   : > { %vm2707_vm3 = vcmp.ge.f32.partialorder %v7286_v4, %v2677_v32  ;;  %v2739_v31 = vshra.s32 %v7358_v60, 16 }
 0xa58   : > { %v7363_v20 = vsel %vm2707_vm3, %v6830_v40, 128  ;;  %v2681_v51 = vpop.xlane.xlu1 %2680 }
 0xa59   : > { %vm2709_vm4 = vcmp.ge.f32.partialorder %v7290_v34, %v2681_v51  ;;  %v7366_v35 = vcvt.s32.f32 %v2739_v31  ;;  %v2753_v38 = vshra.s32 %v7363_v20, 16 }
 0xa5a   : > { %v7370_v45 = vsel %vm2709_vm4, %v6830_v40, 128  ;;  %v2679_v27 = vpop.xlane.xlu0 %2678 }
 0xa5b   : > { %vm2708_vm5 = vcmp.ge.f32.partialorder %v7293_v11, %v2679_v27  ;;  %2742 = vmin.xlane.f32.xlu0 %v7366_v35  ;;  %v7374_v4 = vcvt.s32.f32 %v2753_v38  ;;  %v2781_v56 = vshra.s32 %v7370_v45, 16  ;;  %v2780_v49 = vand.u32 65535, %v7370_v45 }
 0xa5c   : > { %v7378_v19 = vsel %vm2708_vm5, %v6830_v40, 128 }
 0xa5d   : > { %2756 = vmin.xlane.f32.xlu1 %v7374_v4  ;;  %v2767_v34 = vshra.s32 %v7378_v19, 16  ;;  %v7382_v21 = vcvt.s32.f32 %v2781_v56 }
 0xa5f   : > { %v7384_v48 = vcvt.s32.f32 %v2767_v34 }
 0xa61   : > { %2784 = vmin.xlane.f32.xlu1 %v7382_v21  ;;  %2770 = vmin.xlane.f32.xlu0 %v7384_v48 }
 0xa67   : > { %v2683_v11 = vpop.xlane.xlu0 %2682 }
 0xa68   : > { %vm2710_vm6 = vcmp.ge.f32.partialorder %v7301_v36, %v2683_v11 }
 0xa69   : > { %v7390_v25 = vsel %vm2710_vm6, %v6830_v40, 128  ;;  %v2685_v54 = vpop.xlane.xlu1 %2684 }
 0xa6a   : > { %vm2711_vm7 = vcmp.ge.f32.partialorder %v7306_v43, %v2685_v54  ;;  %v2795_v30 = vshra.s32 %v7390_v25, 16 }
 0xa6b   : > { %v7395_v3 = vsel %vm2711_vm7, %v6830_v40, 128  ;;  %v2687_v18 = vpop.xlane.xlu0 %2686 }
 0xa6c   : > { %vm2712_vm8 = vcmp.ge.f32.partialorder %v7310_v12, %v2687_v18  ;;  %v7398_v32 = vcvt.s32.f32 %v2795_v30  ;;  %v2809_v31 = vshra.s32 %v7395_v3, 16 }
 0xa6d   : > { %v7402_v36 = vsel %vm2712_vm8, %v6830_v40, 128  ;;  %v2689_v51 = vpop.xlane.xlu1 %2688 }
 0xa6e   : > { %vm2713_vm9 = vcmp.ge.f32.partialorder %v7315_v17, %v2689_v51  ;;  %2798 = vmin.xlane.f32.xlu0 %v7398_v32  ;;  %v7406_v43 = vcvt.s32.f32 %v2809_v31  ;;  %v2823_v38 = vshra.s32 %v7402_v36, 16 }
 0xa6f   : > { %v7410_v27 = vsel %vm2713_vm9, %v6830_v40, 128  ;;  %v2691_v12 = vpop.xlane.xlu0 %2690 }
 0xa70   : > { %vm2714_vm10 = vcmp.ge.f32.partialorder %v7321_v0, %v2691_v12  ;;  %2812 = vmin.xlane.f32.xlu1 %v7406_v43  ;;  %v7414_v56 = vcvt.s32.f32 %v2823_v38  ;;  %v2837_v34 = vshra.s32 %v7410_v27, 16 }
 0xa71   : > { %v7418_v17 = vsel %vm2714_vm10, %v6830_v40, 128  ;;  %v2693_v11 = vpop.xlane.xlu1 %2692 }
 0xa72   : > { %vm2715_vm11 = vcmp.ge.f32.partialorder %v7326_v44, %v2693_v11  ;;  %2826 = vmin.xlane.f32.xlu0 %v7414_v56  ;;  %v7422_v54 = vcvt.s32.f32 %v2837_v34  ;;  %v2851_v30 = vshra.s32 %v7418_v17, 16 }
 0xa73   : > { %v7426_v0 = vsel %vm2715_vm11, %v6830_v40, 128  ;;  %v2695_v18 = vpop.xlane.xlu0 %2694 }
 0xa74   : > { %vm2716_vm12 = vcmp.ge.f32.partialorder %v7330_v55, %v2695_v18  ;;  %2840 = vmin.xlane.f32.xlu1 %v7422_v54  ;;  %v7430_v31 = vcvt.s32.f32 %v2851_v30  ;;  %v2865_v51 = vshra.s32 %v7426_v0, 16 }
 0xa75   : > { %v7434_v44 = vsel %vm2716_vm12, %v6830_v40, 128  ;;  %v2697_v38 = vpop.xlane.xlu1 %2696 }
 0xa76   : > { %vm2717_vm13 = vcmp.ge.f32.partialorder %v7333_v22, %v2697_v38  ;;  %2854 = vmin.xlane.f32.xlu0 %v7430_v31  ;;  %v7438_v12 = vcvt.s32.f32 %v2865_v51  ;;  %v2879_v34 = vshra.s32 %v7434_v44, 16 }
 0xa77   : > { %v7442_v55 = vsel %vm2717_vm13, %v6830_v40, 128 }
 0xa78   : > { %2868 = vmin.xlane.f32.xlu1 %v7438_v12  ;;  %v7445_v11 = vcvt.s32.f32 %v2879_v34  ;;  %v2893_v30 = vshra.s32 %v7442_v55, 16 }
 0xa7a   : > { %2882 = vmin.xlane.f32.xlu0 %v7445_v11  ;;  %v7449_v18 = vcvt.s32.f32 %v2893_v30 }
 0xa7c   : > { %2896 = vmin.xlane.f32.xlu1 %v7449_v18 }
 0xa7d   : > { %v2699_v22 = vpop.xlane.xlu0 %2698 }
 0xa7e   : > { %vm2718_vm14 = vcmp.ge.f32.partialorder %v7341_v37, %v2699_v22 }
 0xa7f   : > { %v7454_v51 = vsel %vm2718_vm14, %v6830_v40, 128  ;;  %v2701_v38 = vpop.xlane.xlu1 %2700 }
 0xa80   : > { %vm2719_vm15 = vcmp.ge.f32.partialorder %v7346_v57, %v2701_v38  ;;  %v2907_v34 = vshra.s32 %v7454_v51, 16 }
 0xa81   : > { %v7459_v8 = vsel %vm2719_vm15, %v6830_v40, 128  ;;  %v2703_v33 = vpop.xlane.xlu0 %2702 }
 0xa82   : > { %v2921_v30 = vshra.s32 %v7459_v8, 16  ;;  %vm2720_vm0 = vcmp.ge.f32.partialorder %v7350_v63, %v2703_v33  ;;  %v7463_v16 = vcvt.s32.f32 %v2907_v34  ;;  %v2752_v34 = vand.u32 65535, %v7363_v20 }
 0xa83   : > { %v7466_v37 = vsel %vm2720_vm0, %v6830_v40, 128  ;;  %v2705_v22 = vpop.xlane.xlu1 %2704 }
 0xa84   : > { %vm2721_vm1 = vcmp.ge.f32.partialorder %v7353_v24, %v2705_v22  ;;  %2910 = vmin.xlane.f32.xlu0 %v7463_v16  ;;  %v7470_v57 = vcvt.s32.f32 %v2921_v30  ;;  %v2935_v38 = vshra.s32 %v7466_v37, 16  ;;  %v2738_v24 = vand.u32 65535, %v7358_v60 }
 0xa85   : > { %v7474_v58 = vsel %vm2721_vm1, %v6830_v40, 128  ;;  %v2754_v41 = vcvt.s32.f32 %v2752_v34  ;;  %v2782_v40 = vcvt.s32.f32 %v2780_v49  ;;  %v2822_v49 = vand.u32 65535, %v7402_v36 }
 0xa86   : > { %v2949_v61 = vshra.s32 %v7474_v58, 16  ;;  %2924 = vmin.xlane.f32.xlu1 %v7470_v57  ;;  %v7478_v33 = vcvt.s32.f32 %v2935_v38  ;;  %v2740_v22 = vcvt.s32.f32 %v2738_v24 }
 0xa88   : > { %2938 = vmin.xlane.f32.xlu0 %v7478_v33  ;;  %v7481_v63 = vcvt.s32.f32 %v2949_v61  ;;  %v2766_v61 = vand.u32 65535, %v7378_v19 }
 0xa8a   : > { %2952 = vmin.xlane.f32.xlu1 %v7481_v63 }
 0xae8   : > { %v7486_v30 = vpop.xlane.xlu0 %2742 }
 0xae9   : > { %vm2744_vm2 = vcmp.eq.f32.partialorder %v7366_v35, %v7486_v30  ;;  %v2768_v35 = vcvt.s32.f32 %v2766_v61 }
 0xaea   : > { %v7491_v38 = vpop.xlane.xlu1 %2756  ;;  %v2745_v53 = vsel %vm2744_vm2, %v2740_v22, inf }
 0xaeb   : > { %2746 = vmin.xlane.f32.xlu0 %v2745_v53  ;;  %vm2758_vm3 = vcmp.eq.f32.partialorder %v7374_v4, %v7491_v38  ;;  %v2794_v53 = vand.u32 65535, %v7390_v25  ;;  %v2850_v25 = vand.u32 65535, %v7418_v17 }
 0xaec   : > { %v2759_v60 = vsel %vm2758_vm3, %v2754_v41, inf  ;;  %v2808_v41 = vand.u32 65535, %v7395_v3 }
 0xaed   : > { %2760 = vmin.xlane.f32.xlu1 %v2759_v60  ;;  %v2796_v34 = vcvt.s32.f32 %v2794_v53  ;;  %v2824_v60 = vcvt.s32.f32 %v2822_v49 }
 0xaee   : > { %v7496_v20 = vpop.xlane.xlu1 %2784  ;;  %v7498_v24 = vpop.xlane.xlu0 %2770 }
 0xaef   : > { %vm2786_vm4 = vcmp.eq.f32.partialorder %v7382_v21, %v7496_v20  ;;  %vm2772_vm5 = vcmp.eq.f32.partialorder %v7384_v48, %v7498_v24  ;;  %v2836_v21 = vand.u32 65535, %v7410_v27  ;;  %v2810_v48 = vcvt.s32.f32 %v2808_v41 }
 0xaf0   : > { %v2787_v45 = vsel %vm2786_vm4, %v2782_v40, inf  ;;  %v2773_v19 = vsel %vm2772_vm5, %v2768_v35, inf }
 0xaf1   : > { %2788 = vmin.xlane.f32.xlu1 %v2787_v45  ;;  %2774 = vmin.xlane.f32.xlu0 %v2773_v19  ;;  %v2838_v35 = vcvt.s32.f32 %v2836_v21  ;;  %v2852_v19 = vcvt.s32.f32 %v2850_v25  ;;  %v2934_v25 = vand.u32 65535, %v7466_v37 }
 0xaf3   : > { %v2936_v37 = vcvt.s32.f32 %v2934_v25 }
 0xafb   : > { %v7506_v4 = vpop.xlane.xlu0 %2798 }
 0xafc   : > { %vm2800_vm6 = vcmp.eq.f32.partialorder %v7398_v32, %v7506_v4  ;;  %v2864_v32 = vand.u32 65535, %v7426_v0 }
 0xafd   : > { %v7512_v22 = vpop.xlane.xlu1 %2812  ;;  %v2801_v40 = vsel %vm2800_vm6, %v2796_v34, inf  ;;  %v6207_v34 = vmov 1  }
 0xafe   : > { %2802 = vmin.xlane.f32.xlu0 %v2801_v40  ;;  %vm2814_vm7 = vcmp.eq.f32.partialorder %v7406_v43, %v7512_v22  ;;  %v2878_v43 = vand.u32 65535, %v7434_v44  ;;  %v2866_v41 = vcvt.s32.f32 %v2864_v32  ;;  %5906 = vset.pattern.permute.xlu1 %v6207_v34 }
 0xaff   : > { %v7517_v3 = vpop.xlane.xlu0 %2826  ;;  %v2815_v61 = vsel %vm2814_vm7, %v2810_v48, inf  ;;  %5905 = vset.pattern.permute.xlu0 %v6207_v34  ;;  %v2920_v48 = vand.u32 65535, %v7459_v8  ;;  %v2791_v34 = vcvt.f32.s32 %v7496_v20 }
 0xb00   : > { %2816 = vmin.xlane.f32.xlu1 %v2815_v61  ;;  %vm2828_vm8 = vcmp.eq.f32.partialorder %v7414_v56, %v7517_v3  ;;  %v2892_v56 = vand.u32 65535, %v7442_v55  ;;  %v2880_v49 = vcvt.s32.f32 %v2878_v43 }
 0xb01   : > { %v7522_v36 = vpop.xlane.xlu1 %2840  ;;  %v2829_v27 = vsel %vm2828_vm8, %v2824_v60, inf }
 0xb02   : > { %2830 = vmin.xlane.f32.xlu0 %v2829_v27  ;;  %vm2842_vm9 = vcmp.eq.f32.partialorder %v7422_v54, %v7522_v36  ;;  %v2894_v21 = vcvt.s32.f32 %v2892_v56 }
 0xb03   : > { %v7527_v17 = vpop.xlane.xlu0 %2854  ;;  %v2843_v45 = vsel %vm2842_vm9, %v2838_v35, inf }
 0xb04   : > { %2844 = vmin.xlane.f32.xlu1 %v2843_v45  ;;  %vm2856_vm10 = vcmp.eq.f32.partialorder %v7430_v31, %v7527_v17  ;;  %v5953_v45 = vld [vmem:[%s9070_s28 + $0x88] sm:$0xff]  }
 0xb05   : > { %v7532_v0 = vpop.xlane.xlu1 %2868  ;;  %v2857_v53 = vsel %vm2856_vm10, %v2852_v19, inf }
 0xb06   : > { %2858 = vmin.xlane.f32.xlu0 %v2857_v53  ;;  %vm2870_vm11 = vcmp.eq.f32.partialorder %v7438_v12, %v7532_v0  ;;  %v2906_v12 = vand.u32 65535, %v7454_v51 }
 0xb07   : > { %v7536_v54 = vpop.xlane.xlu0 %2882  ;;  %v2871_v44 = vsel %vm2870_vm11, %v2866_v41, inf  ;;  %v2763_v41 = vcvt.f32.s32 %v7491_v38 }
 0xb08   : > { %2872 = vmin.xlane.f32.xlu1 %v2871_v44  ;;  %vm2884_vm12 = vcmp.eq.f32.partialorder %v7445_v11, %v7536_v54  ;;  %v2908_v60 = vcvt.s32.f32 %v2906_v12  ;;  %v2948_v11 = vand.u32 65535, %v7474_v58 }
 0xb09   : > { %v7540_v31 = vpop.xlane.xlu1 %2896  ;;  %v2885_v55 = vsel %vm2884_vm12, %v2880_v49, inf  ;;  %v2777_v49 = vcvt.f32.s32 %v7498_v24  ;;  %v2764_v12 = vshll.u32 %v2763_v41, 16  ;;  %v5956_v41 = vld [vmem:[%s9070_s28 + $0xa0] sm:$0xff]  }
 0xb0a   : > { %2886 = vmin.xlane.f32.xlu0 %v2885_v55  ;;  %vm2898_vm13 = vcmp.eq.f32.partialorder %v7449_v18, %v7540_v31  ;;  %v2922_v18 = vcvt.s32.f32 %v2920_v48  ;;  %v2950_v58 = vcvt.s32.f32 %v2948_v11  ;;  %v2792_v48 = vshll.u32 %v2791_v34, 16  ;;  %v5985_v11 = vld [vmem:[%s7066_s21] sm:$0xff] }
 0xb0b   : > { %v2899_v40 = vsel %vm2898_vm13, %v2894_v21, inf  ;;  %v2805_v34 = vcvt.f32.s32 %v7506_v4 }
 0xb0c   : > { %2900 = vmin.xlane.f32.xlu1 %v2899_v40 }
 0xb11   : > { %v7547_v61 = vpop.xlane.xlu0 %2910 }
 0xb12   : > { %vm2912_vm14 = vcmp.eq.f32.partialorder %v7463_v16, %v7547_v61 }
 0xb13   : > { %v7552_v32 = vpop.xlane.xlu1 %2924  ;;  %v2913_v27 = vsel %vm2912_vm14, %v2908_v60, inf }
 0xb14   : > { %2914 = vmin.xlane.f32.xlu0 %v2913_v27  ;;  %vm2926_vm15 = vcmp.eq.f32.partialorder %v7470_v57, %v7552_v32  ;;  %v5952_v57 = vld [vmem:[%s9070_s28 + $0x80] sm:$0xff]  }
 0xb15   : > { %v7556_v51 = vpop.xlane.xlu0 %2938  ;;  %v2927_v8 = vsel %vm2926_vm15, %v2922_v18, inf  ;;  %5695 = vmatprep.subr.bf16.mxu1 %v5952_v57 }
 0xb16   : > { %2928 = vmin.xlane.f32.xlu1 %v2927_v8  ;;  %vm2940_vm0 = vcmp.eq.f32.partialorder %v7478_v33, %v7556_v51  ;;  %5696 = vmatpush3.bf16.msra.mxu1 %v5952_v57  ;;  %v5954_v33 = vld [vmem:[%s9070_s28 + $0x90] sm:$0xff]  }
 0xb17   : > { %v7560_v35 = vpop.xlane.xlu1 %2952  ;;  %v2941_v16 = vsel %vm2940_vm0, %v2936_v37, inf  ;;  %5697 = vmatprep.subr.bf16.mxu1 %v5953_v45 }
 0xb18   : > { %2942 = vmin.xlane.f32.xlu0 %v2941_v16  ;;  %vm2954_vm1 = vcmp.eq.f32.partialorder %v7481_v63, %v7560_v35  ;;  %v2749_v63 = vcvt.f32.s32 %v7486_v30  ;;  %v2778_v30 = vshll.u32 %v2777_v49, 16 }
 0xb19   : > { %v2955_v43 = vsel %vm2954_vm1, %v2950_v58, inf }
 0xb1a   : > { %2956 = vmin.xlane.f32.xlu1 %v2955_v43  ;;  %5698 = vmatpush3.bf16.msra.mxu1 %v5953_v45  ;;  %v2750_v56 = vshll.u32 %v2749_v63, 16  ;;  %v5986_v45 = vld [vmem:[%s7066_s21 + $0x18] sm:$0xff]  ;;  %v5987_v63 = vld [vmem:[%s7066_s21 + $0x10] sm:$0xff] }
 0xb1b   : > { %5699 = vmatprep.subr.bf16.mxu1 %v5954_v33 }
 0xb1e   : > { %5700 = vmatpush3.bf16.msra.mxu1 %v5954_v33 }
 0xb78   : > { %v2747_v19 = vpop.xlane.xlu0 %2746 }
 0xb79   : > { %v2748_v53 = vcvt.f32.s32 %v2747_v19 }
 0xb7a   : > { %v2761_v44 = vpop.xlane.xlu1 %2760 }
 0xb7b   : > { %v2751_v55 = vadd.s32 %v2750_v56, %v2748_v53  ;;  %v2762_v40 = vcvt.f32.s32 %v2761_v44  ;;  %v5955_v56 = vld [vmem:[%s9070_s28 + $0x98] sm:$0xff]   ;;  %v5988_v44 = vld [vmem:[%s7066_s21 + $0x8] sm:$0xff] }
 0xb7c   : > { %5701 = vmatprep.subr.bf16.mxu1 %v5955_v56 }
 0xb7d   : > { %v2962_v21 = vcvt.s32.f32 %v2751_v55  ;;  %v2765_v37 = vadd.s32 %v2764_v12, %v2762_v40  ;;  %5702 = vmatpush3.bf16.msra.mxu1 %v5955_v56  ;;  %v2806_v12 = vshll.u32 %v2805_v34, 16  ;;  %v2875_v56 = vcvt.f32.s32 %v7532_v0 }
 0xb7e   : > { %v2789_v25 = vpop.xlane.xlu1 %2788  ;;  %v2775_v60 = vpop.xlane.xlu0 %2774  ;;  %5703 = vmatprep.subr.bf16.mxu1 %v5956_v41 }
 0xb7f   : > { %v2978_v27 = vadd.f32 %v5985_v11, %v2962_v21  ;;  %v2790_v18 = vcvt.f32.s32 %v2789_v25  ;;  %v2776_v8 = vcvt.f32.s32 %v2775_v60  ;;  %v2963_v57 = vcvt.s32.f32 %v2765_v37 }
 0xb80   : > { %v2833_v25 = vcvt.f32.s32 %v7517_v3  ;;  %v2847_v3 = vcvt.f32.s32 %v7522_v36 }
 0xb81   : > { %v2994_v38 = vmul.f32 0.025, %v2978_v27  ;;  %v2793_v20 = vadd.s32 %v2792_v48, %v2790_v18  ;;  %v2779_v16 = vadd.s32 %v2778_v30, %v2776_v8  ;;  %v2979_v49 = vadd.f32 %v5988_v44, %v2963_v57  ;;  %5704 = vmatpush3.bf16.msra.mxu1 %v5956_v41  ;;  %v5957_v27 = vld [vmem:[%s9070_s28 + $0xa8] sm:$0xff]   ;;  %v5958_v57 = vld [vmem:[%s9070_s28 + $0xb0] sm:$0xff]   ;;  %v5989_v44 = vld [vmem:[%s7066_s21 + $0x20] sm:$0xff] }
 0xb82   : > { %v2819_v48 = vcvt.f32.s32 %v7512_v22  ;;  %5705 = vmatprep.subr.bf16.mxu1 %v5957_v27  ;;  %v2834_v22 = vshll.u32 %v2833_v25, 16  ;;  %v2903_v41 = vcvt.f32.s32 %v7540_v31 }
 0xb83   : > { %v7578_v24 = vadd.f32 -1.0, %v2994_v38  ;;  %v2965_v58 = vcvt.s32.f32 %v2793_v20  ;;  %v2964_v43 = vcvt.s32.f32 %v2779_v16  ;;  %v2995_v30 = vmul.f32 0.025, %v2979_v49 }
 0xb84   : > { %v2820_v37 = vshll.u32 %v2819_v48, 16  ;;  %v5990_v48 = vld [vmem:[%s7066_s21 + $0x30] sm:$0xff] }
 0xb85   : > { %v2981_v33 = vadd.f32 %v5986_v45, %v2965_v58  ;;  %v2980_v19 = vadd.f32 %v5987_v63, %v2964_v43  ;;  %3071 = vperm.xlu0 %5905, %v7578_v24   ;;  %5706 = vmatpush3.bf16.msra.mxu1 %v5957_v27  ;;  %v7603_v16 = vadd.f32 -1.0, %v2995_v30  ;;  %v2876_v30 = vshll.u32 %v2875_v56, 16 }
 0xb86   : > { %5707 = vmatprep.subr.bf16.mxu1 %v5958_v57 }
 0xb87   : > { %v2996_v53 = vmul.f32 0.025, %v2980_v19  ;;  %v2997_v55 = vmul.f32 0.025, %v2981_v33  ;;  %v2861_v19 = vcvt.f32.s32 %v7527_v17 }
 0xb89   : > { %v7591_v21 = vadd.f32 -1.0, %v2996_v53  ;;  %v7596_v11 = vadd.f32 -1.0, %v2997_v55  ;;  %v2848_v53 = vshll.u32 %v2847_v3, 16  ;;  %5708 = vmatpush3.bf16.msra.mxu1 %v5958_v57 }
 0xb8b   : > { %3081 = vperm.xlu1 %5906, %v7591_v21   ;;  %v2803_v40 = vpop.xlane.xlu0 %2802 }
 0xb8c   : > { %v2804_v60 = vcvt.f32.s32 %v2803_v40 }
 0xb8d   : > { %v2817_v4 = vpop.xlane.xlu1 %2816 }
 0xb8e   : > { %v2807_v18 = vadd.s32 %v2806_v12, %v2804_v60  ;;  %v2818_v8 = vcvt.f32.s32 %v2817_v4  ;;  %v5959_v12 = vld [vmem:[%s9070_s28 + $0xb8] sm:$0xff]   ;;  %v2862_v60 = vshll.u32 %v2861_v19, 16  ;;  %v2889_v4 = vcvt.f32.s32 %v7536_v54 }
 0xb8f   : > { %3086 = vperm.xlu1 %5906, %v7596_v11   ;;  %v2831_v38 = vpop.xlane.xlu0 %2830  ;;  %5709 = vmatprep.subr.bf16.mxu1 %v5959_v12  ;;  %v2917_v19 = vcvt.f32.s32 %v7547_v61 }
 0xb90   : > { %v2832_v20 = vcvt.f32.s32 %v2831_v38  ;;  %v2966_v58 = vcvt.s32.f32 %v2807_v18  ;;  %v2821_v45 = vadd.s32 %v2820_v37, %v2818_v8  ;;  %v2904_v18 = vshll.u32 %v2903_v41, 16  ;;  %5710 = vmatpush3.bf16.msra.mxu1 %v5959_v12 }
 0xb91   : > { %v2845_v43 = vpop.xlane.xlu1 %2844  ;;  %v2890_v54 = vshll.u32 %v2889_v4, 16 }
 0xb92   : > { %v2835_v33 = vadd.s32 %v2834_v22, %v2832_v20  ;;  %v2846_v63 = vcvt.f32.s32 %v2845_v43  ;;  %v2982_v49 = vadd.f32 %v5989_v44, %v2966_v58  ;;  %v2967_v17 = vcvt.s32.f32 %v2821_v45  ;;  %v5991_v58 = vld [vmem:[%s7066_s21 + $0x28] sm:$0xff] }
 0xb93   : > { %3076 = vperm.xlu1 %5906, %v7603_v16   ;;  %v2859_v36 = vpop.xlane.xlu0 %2858 }
 0xb94   : > { %v2968_v34 = vcvt.s32.f32 %v2835_v33  ;;  %v2860_v55 = vcvt.f32.s32 %v2859_v36  ;;  %v2849_v25 = vadd.s32 %v2848_v53, %v2846_v63  ;;  %v2998_v38 = vmul.f32 0.025, %v2982_v49  ;;  %v5992_v53 = vld [vmem:[%s7066_s21 + $0x48] sm:$0xff] }
 0xb95   : > { %v2873_v40 = vpop.xlane.xlu1 %2872  ;;  %v2983_v43 = vadd.f32 %v5991_v58, %v2967_v17  ;;  %v2931_v17 = vcvt.f32.s32 %v7552_v32 }
 0xb96   : > { %v2984_v0 = vadd.f32 %v5990_v48, %v2968_v34  ;;  %v2874_v31 = vcvt.f32.s32 %v2873_v40  ;;  %v2863_v37 = vadd.s32 %v2862_v60, %v2860_v55  ;;  %v2969_v45 = vcvt.s32.f32 %v2849_v25  ;;  %v5993_v55 = vld [vmem:[%s7066_s21 + $0x38] sm:$0xff] }
 0xb97   : > { %v2887_v27 = vpop.xlane.xlu0 %2886  ;;  %v7624_v44 = vadd.f32 -1.0, %v2998_v38  ;;  %v2999_v49 = vmul.f32 0.025, %v2983_v43  ;;  %v5994_v25 = vld [vmem:[%s7066_s21 + $0x58] sm:$0xff]  ;;  %v2945_v60 = vcvt.f32.s32 %v7556_v51 }
 0xb98   : > { %v3000_v8 = vmul.f32 0.025, %v2984_v0  ;;  %v2877_v22 = vadd.s32 %v2876_v30, %v2874_v31  ;;  %v2888_v3 = vcvt.f32.s32 %v2887_v27  ;;  %v2970_v36 = vcvt.s32.f32 %v2863_v37  ;;  %v5995_v30 = vld [vmem:[%s7066_s21 + $0x40] sm:$0xff] }
 0xb99   : > { %v2901_v20 = vpop.xlane.xlu1 %2900  ;;  %v2985_v40 = vadd.f32 %v5993_v55, %v2969_v45  ;;  %v2918_v0 = vshll.u32 %v2917_v19, 16  ;;  %v2946_v45 = vshll.u32 %v2945_v60, 16 }
 0xb9a   : > { %v7619_v57 = vadd.f32 -1.0, %v3000_v8  ;;  %v2902_v33 = vcvt.f32.s32 %v2901_v20  ;;  %v2971_v63 = vcvt.s32.f32 %v2877_v22  ;;  %v2891_v34 = vadd.s32 %v2890_v54, %v2888_v3  ;;  %v5996_v54 = vld [vmem:[%s7066_s21 + $0x50] sm:$0xff] }
 0xb9b   : > { %v2986_v4 = vadd.f32 %v5995_v30, %v2970_v36  ;;  %v7634_v8 = vadd.f32 -1.0, %v2999_v49  ;;  %v3001_v38 = vmul.f32 0.025, %v2985_v40  ;;  %v2932_v22 = vshll.u32 %v2931_v17, 16 }
 0xb9c   : > { %v2905_v56 = vadd.s32 %v2904_v18, %v2902_v33  ;;  %3101 = vperm.xlu1 %5906, %v7619_v57   ;;  %v2987_v41 = vadd.f32 %v5992_v53, %v2971_v63  ;;  %v2972_v27 = vcvt.s32.f32 %v2891_v34  ;;  %v2959_v20 = vcvt.f32.s32 %v7560_v35 }
 0xb9d   : > { %v3002_v33 = vmul.f32 0.025, %v2986_v4 }
 0xb9e   : > { %v2973_v12 = vcvt.s32.f32 %v2905_v56  ;;  %v3003_v48 = vmul.f32 0.025, %v2987_v41  ;;  %v2988_v63 = vadd.f32 %v5996_v54, %v2972_v27  ;;  %v7642_v56 = vadd.f32 -1.0, %v3001_v38 }
 0xb9f   : > { %v2960_v34 = vshll.u32 %v2959_v20, 16 }
 0xba0   : > { %v2989_v61 = vadd.f32 %v5994_v25, %v2973_v12  ;;  %3091 = vperm.xlu1 %5906, %v7624_v44   ;;  %v7632_v31 = vadd.f32 -1.0, %v3003_v48  ;;  %v7646_v12 = vadd.f32 -1.0, %v3002_v33  ;;  %v3004_v17 = vmul.f32 0.025, %v2988_v63  ;;  %v5997_v48 = vld [vmem:[%s7066_s21 + $0x60] sm:$0xff]  ;;  %v5998_v25 = vld [vmem:[%s7066_s21 + $0x68] sm:$0xff] }
 0xba1   : > { %v2915_v18 = vpop.xlane.xlu0 %2914  ;;  %v5960_v63 = vld [vmem:[%s8940_s8 + $0x80] sm:$0xff]  }
 0xba2   : > { %v3005_v37 = vmul.f32 0.025, %v2989_v61  ;;  %v2916_v32 = vcvt.f32.s32 %v2915_v18  ;;  %3116 = vperm.xlu0 %5905, %v7632_v31   ;;  %v7651_v18 = vadd.f32 -1.0, %v3004_v17  ;;  %5727 = vmatprep.subr.bf16.mxu0 %v5960_v63 }
 0xba3   : > { %v2929_v3 = vpop.xlane.xlu1 %2928  ;;  %5728 = vmatpush3.bf16.msra.mxu0 %v5960_v63 }
 0xba4   : > { %v7638_v58 = vadd.f32 -1.0, %v3005_v37  ;;  %v2919_v51 = vadd.s32 %v2918_v0, %v2916_v32  ;;  %v2930_v43 = vcvt.f32.s32 %v2929_v3  ;;  %3096 = vperm.xlu1 %5906, %v7634_v8   ;;  %v5999_v32 = vld [vmem:[%s7066_s21 + $0x70] sm:$0xff]  ;;  %v6000_v3 = vld [vmem:[%s7066_s21 + $0x78] sm:$0xff] }
 0xba5   : > { %v2943_v19 = vpop.xlane.xlu0 %2942 }
 0xba6   : > { %v2974_v36 = vcvt.s32.f32 %v2919_v51  ;;  %v2933_v53 = vadd.s32 %v2932_v22, %v2930_v43  ;;  %v2944_v41 = vcvt.f32.s32 %v2943_v19  ;;  %3126 = vperm.xlu0 %5905, %v7638_v58   ;;  %v5961_v19 = vld [vmem:[%s8940_s8 + $0x88] sm:$0xff]  }
 0xba7   : > { %v2957_v35 = vpop.xlane.xlu1 %2956  ;;  %5729 = vmatprep.subr.bf16.mxu0 %v5961_v19 }
 0xba8   : > { %v2975_v49 = vcvt.s32.f32 %v2933_v53  ;;  %v2947_v55 = vadd.s32 %v2946_v45, %v2944_v41  ;;  %v2958_v40 = vcvt.f32.s32 %v2957_v35  ;;  %3106 = vperm.xlu1 %5906, %v7642_v56   ;;  %v2990_v0 = vadd.f32 %v5997_v48, %v2974_v36  ;;  %v5962_v36 = vld [vmem:[%s8940_s8 + $0x90] sm:$0xff]   ;;  %5730 = vmatpush3.bf16.msra.mxu0 %v5961_v19  ;;  %v5963_v53 = vld [vmem:[%s8940_s8 + $0x98] sm:$0xff]   ;;  %v5964_v41 = vld [vmem:[%s8940_s8 + $0xa0] sm:$0xff]  }
 0xba9   : > { %5731 = vmatprep.subr.bf16.mxu0 %v5962_v36  ;;  %v5965_v35 = vld [vmem:[%s8940_s8 + $0xa8] sm:$0xff]  }
 0xbaa   : > { %v2991_v61 = vadd.f32 %v5998_v25, %v2975_v49  ;;  %v2976_v60 = vcvt.s32.f32 %v2947_v55  ;;  %v2961_v30 = vadd.s32 %v2960_v34, %v2958_v40  ;;  %v3006_v38 = vmul.f32 0.025, %v2990_v0  ;;  %v5260_v34 = vld [vmem:[%s9088_s25 + $0x4] sm:$0x7] }
 0xbab   : > { %v7692_v55 = vrot.slane %v5260_v34, %v6624_v6  ;;  %v7695_v40 = vrot.slane %v5260_v34, %v7231_v59 }
 0xbac   : > { %v3007_v4 = vmul.f32 0.025, %v2991_v61  ;;  %v2977_v27 = vcvt.s32.f32 %v2961_v30  ;;  %3111 = vperm.xlu1 %5906, %v7646_v12   ;;  %v2992_v22 = vadd.f32 %v5999_v32, %v2976_v60  ;;  %v7659_v43 = vadd.f32 -1.0, %v3006_v38  ;;  %5732 = vmatpush3.bf16.msra.mxu0 %v5962_v36  ;;  %v7712_v30 = vld [vmem:[%s9091_s7 + $0x1] ss:$0 sm:$0xff] }
 0xbad   : > { %5733 = vmatprep.subr.bf16.mxu0 %v5963_v53  ;;  %v3036_v17 = vmul.f32 %v7692_v55, %v7177_v42  ;;  %v3033_v25 = vmul.f32 %v7692_v55, %v7175_v62  ;;  %v3034_v61 = vmul.f32 %v7692_v55, %v7185_v15  ;;  %v3035_v60 = vmul.f32 %v7692_v55, %v7172_v14 }
 0xbae   : > { %v7653_v37 = vadd.f32 -1.0, %v3007_v4  ;;  %v2993_v20 = vadd.f32 %v6000_v3, %v2977_v27  ;;  %v3008_v45 = vmul.f32 0.025, %v2992_v22 }
 0xbaf   : > { %v3056_v32 = vadd.f32 %v7712_v30, %v3036_v17  ;;  %v3053_v3 = vadd.f32 %v7712_v30, %v3033_v25  ;;  %v3037_v25 = vmul.f32 %v7692_v55, %v7190_v13 }
 0xbb0   : > { %v3009_v51 = vmul.f32 0.025, %v2993_v20  ;;  %3136 = vperm.xlu0 %5905, %v7653_v37   ;;  %3121 = vperm.xlu1 %5906, %v7651_v18   ;;  %v7665_v54 = vadd.f32 -1.0, %v3008_v45  ;;  %v3054_v20 = vadd.f32 %v7712_v30, %v3034_v61  ;;  %v3055_v45 = vadd.f32 %v7712_v30, %v3035_v60 }
 0xbb1   : > { %5734 = vmatpush3.bf16.msra.mxu0 %v5963_v53  ;;  %v3038_v61 = vmul.f32 %v7692_v55, %v7193_v2 }
 0xbb2   : > { %v7661_v33 = vadd.f32 -1.0, %v3009_v51  ;;  %5735 = vmatprep.subr.bf16.mxu0 %v5964_v41 }
 0xbb4   : > { %3146 = vperm.xlu0 %5905, %v7661_v33   ;;  %3131 = vperm.xlu1 %5906, %v7659_v43  }
 0xbb5   : > { %5736 = vmatpush3.bf16.msra.mxu0 %v5964_v41 }
 0xbb6   : > { %5737 = vmatprep.subr.bf16.mxu0 %v5965_v35 }
 0xbb8   : > { %3141 = vperm.xlu1 %5906, %v7665_v54  }
 0xbb9   : > { %5738 = vmatpush3.bf16.msra.mxu0 %v5965_v35 }
 0xc04   : > { %v7699_v48 = vpop.permute.xlu0 %3071 }
 0xc05   : > { %v3153_v27 = vmul.f32 %v7695_v40, %v7699_v48 }
 0xc07   : > { %v3169_v19 = vadd.f32 %v3153_v27, %v3053_v3  ;;  %v3058_v3 = vadd.f32 %v7712_v30, %v3038_v61 }
 0xc0a   : > { %v7689_v49 = vpop.permute.xlu1 %3081 }
 0xc0b   : > { %9104 = vst [vmem:[#allocation78_spill] sm:$0xff] %v7689_v49  ;;  %v3155_v38 = vmul.f32 %v7695_v40, %v7689_v49 }
 0xc0d   : > { %v3171_v53 = vadd.f32 %v3155_v38, %v3055_v45  ;;  %v3040_v38 = vmul.f32 %v7692_v55, %v7197_v9 }
 0xc0e   : > { %v7701_v0 = vpop.permute.xlu1 %3086 }
 0xc0f   : > { %9105 = vst [vmem:[#allocation79_spill] sm:$0xff] %v7701_v0  ;;  %v3156_v4 = vmul.f32 %v7695_v40, %v7701_v0 }
 0xc11   : > { %v3172_v63 = vadd.f32 %v3156_v4, %v3056_v32  ;;  %v3039_v4 = vmul.f32 %v7692_v55, %v7188_v50  ;;  %v3057_v32 = vadd.f32 %v7712_v30, %v3037_v25 }
 0xc12   : > { %v7721_v22 = vpop.permute.xlu1 %3076 }
 0xc13   : > { %v3154_v51 = vmul.f32 %v7695_v40, %v7721_v22  ;;  %v3186_v35 = vpack.c.bf16 %v3172_v63, %v3171_v53 }
 0xc15   : > { %v3170_v36 = vadd.f32 %v3154_v51, %v3054_v20 }
 0xc17   : > { %v3185_v41 = vpack.c.bf16 %v3170_v36, %v3169_v19  ;;  %v3059_v36 = vadd.f32 %v7712_v30, %v3039_v4 }
 0xc19   : > { %5711 = vmatprep.mubr.bf16.mxu1 %v3185_v41  ;;  %v3041_v41 = vmul.f32 %v7692_v55, %v7203_v26 }
 0xc1a   : > { %5712 = vmatmul.mubr.bf16.vlgmr.msra.gmra.mrb[88].mxu1 %v3186_v35  ;;  %v3060_v35 = vadd.f32 %v7712_v30, %v3040_v38  ;;  %v3043_v38 = vmul.f32 %v7692_v55, %v7209_v46 }
 0xc1b   : > { %v7728_v34 = vpop.permute.xlu1 %3101 }
 0xc1c   : > { %9106 = vst [vmem:[#allocation80_spill] sm:$0xff] %v7728_v34  ;;  %v3159_v45 = vmul.f32 %v7695_v40, %v7728_v34 }
 0xc1f   : > { %v7730_v17 = vpop.permute.xlu1 %3091 }
 0xc20   : > { %9107 = vst [vmem:[#allocation81_spill] sm:$0xff] %v7730_v17  ;;  %v3157_v60 = vmul.f32 %v7695_v40, %v7730_v17  ;;  %v3175_v17 = vadd.f32 %v3159_v45, %v3059_v36  ;;  %v3044_v45 = vmul.f32 %v7692_v55, %v7206_v1 }
 0xc21   : > { %v7748_v51 = vpop.permute.xlu0 %3116 }
 0xc22   : > { %9109 = vst [vmem:[#allocation83_spill] sm:$0xff] %v7748_v51  ;;  %v3173_v63 = vadd.f32 %v3157_v60, %v3057_v32  ;;  %v3162_v60 = vmul.f32 %v7695_v40, %v7748_v51 }
 0xc23   : > { %v7740_v27 = vpop.permute.xlu1 %3096 }
 0xc24   : > { %9108 = vst [vmem:[#allocation82_spill] sm:$0xff] %v7740_v27  ;;  %v3158_v20 = vmul.f32 %v7695_v40, %v7740_v27  ;;  %v3042_v27 = vmul.f32 %v7692_v55, %v7200_v39 }
 0xc25   : > { %v7764_v4 = vpop.permute.xlu0 %3126 }
 0xc26   : > { %v3174_v19 = vadd.f32 %v3158_v20, %v3058_v3  ;;  %9111 = vst [vmem:[#allocation85_spill] sm:$0xff] %v7764_v4  ;;  %v3061_v3 = vadd.f32 %v7712_v30, %v3041_v41 }
 0xc27   : > { %v7753_v53 = vpop.permute.xlu1 %3106 }
 0xc28   : > { %9110 = vst [vmem:[#allocation84_spill] sm:$0xff] %v7753_v53  ;;  %v3160_v25 = vmul.f32 %v7695_v40, %v7753_v53  ;;  %v3187_v61 = vpack.c.bf16 %v3174_v19, %v3173_v63  ;;  %v3062_v19 = vadd.f32 %v7712_v30, %v3042_v27 }
 0xc2a   : > { %v3176_v34 = vadd.f32 %v3160_v25, %v3060_v35  ;;  %5715 = vmatprep.mubr.bf16.mxu1 %v3187_v61  ;;  %v3045_v35 = vmul.f32 %v7692_v55, %v7212_v29  ;;  %v3178_v25 = vadd.f32 %v3162_v60, %v3062_v19  ;;  %v3164_v61 = vmul.f32 %v7695_v40, %v7764_v4 }
 0xc2b   : > { %v7766_v32 = vpop.permute.xlu1 %3111 }
 0xc2c   : > { %9112 = vst [vmem:[#allocation86_spill] sm:$0xff] %v7766_v32  ;;  %v3161_v20 = vmul.f32 %v7695_v40, %v7766_v32  ;;  %v3188_v63 = vpack.c.bf16 %v3176_v34, %v3175_v17  ;;  %v3046_v34 = vmul.f32 %v7692_v55, %v7215_v52  ;;  %v3063_v17 = vadd.f32 %v7712_v30, %v3043_v38 }
 0xc2d   : > { %v3065_v29 = vadd.f32 %v7712_v30, %v3045_v35  ;;  %v3047_v38 = vmul.f32 %v7692_v55, %v7218_v7  ;;  %v3048_v52 = vmul.f32 %v7692_v55, %v7221_v47 }
 0xc2e   : > { %v3177_v36 = vadd.f32 %v3161_v20, %v3061_v3  ;;  %5716 = vmatmul.mubr.bf16.gmra.mrb[92].mxu1 %v3188_v63  ;;  %v3064_v3 = vadd.f32 %v7712_v30, %v3044_v45  ;;  %v3066_v45 = vadd.f32 %v7712_v30, %v3046_v34 }
 0xc2f   : > { %v7780_v46 = vpop.permute.xlu1 %3121  ;;  %v7782_v41 = vpop.permute.xlu0 %3136 }
 0xc30   : > { %9113 = vst [vmem:[#allocation87_spill] sm:$0xff] %v7780_v46  ;;  %9114 = vst [vmem:[#allocation88_spill] sm:$0xff] %v7782_v41  ;;  %v3163_v27 = vmul.f32 %v7695_v40, %v7780_v46  ;;  %v3189_v20 = vpack.c.bf16 %v3178_v25, %v3177_v36  ;;  %v3166_v60 = vmul.f32 %v7695_v40, %v7782_v41 }
 0xc31   : > { %v3180_v19 = vadd.f32 %v3164_v61, %v3064_v3  ;;  %v3068_v3 = vadd.f32 %v7712_v30, %v3048_v52  ;;  %v5967_v52 = vld [vmem:[%s8940_s8 + $0xb8] sm:$0xff]  }
 0xc32   : > { %v3179_v63 = vadd.f32 %v3163_v27, %v3063_v17  ;;  %5719 = vmatprep.mubr.bf16.mxu1 %v3189_v20  ;;  %v3182_v61 = vadd.f32 %v3166_v60, %v3066_v45  ;;  %v3067_v20 = vadd.f32 %v7712_v30, %v3047_v38  ;;  %v6001_v30 = vld [vmem:[%s8938_s6] sm:$0xf] }
 0xc33   : > { %v7793_v4 = vpop.permute.xlu1 %3131  ;;  %v7795_v1 = vpop.permute.xlu0 %3146 }
 0xc34   : > { %9115 = vst [vmem:[#allocation89_spill] sm:$0xff] %v7793_v4  ;;  %9116 = vst [vmem:[#allocation90_spill] sm:$0xff] %v7795_v1  ;;  %v3165_v36 = vmul.f32 %v7695_v40, %v7793_v4  ;;  %v3190_v25 = vpack.c.bf16 %v3180_v19, %v3179_v63  ;;  %v3168_v35 = vmul.f32 %v7695_v40, %v7795_v1 }
 0xc36   : > { %v3181_v17 = vadd.f32 %v3165_v36, %v3065_v29  ;;  %5720 = vmatmul.mubr.bf16.gmra.mrb[96].mxu1 %v3190_v25  ;;  %v3184_v47 = vadd.f32 %v3168_v35, %v3068_v3  ;;  %v5966_v29 = vld [vmem:[%s8940_s8 + $0xb0] sm:$0xff]   ;;  %v9118_v25 = vld [vmem:[#allocation19_spill] sm:$0xff] }
 0xc37   : > { %v7806_v27 = vpop.permute.xlu1 %3141  ;;  %5739 = vmatprep.subr.bf16.mxu0 %v5966_v29 }
 0xc38   : > { %9117 = vst [vmem:[#allocation91_spill] sm:$0xff] %v7806_v27  ;;  %v3167_v55 = vmul.f32 %v7695_v40, %v7806_v27  ;;  %v3191_v34 = vpack.c.bf16 %v3182_v61, %v3181_v17  ;;  %5740 = vmatpush3.bf16.msra.mxu0 %v5966_v29  ;;  %v8991_v40 = vsub.s32 2, %v6621_v5 }
 0xc39   : > { %5741 = vmatprep.subr.bf16.mxu0 %v5967_v52 }
 0xc3a   : > { %v3183_v7 = vadd.f32 %v3167_v55, %v3067_v20  ;;  %5723 = vmatprep.mubr.bf16.mxu1 %v3191_v34 }
 0xc3c   : > { %v3192_v63 = vpack.c.bf16 %v3184_v47, %v3183_v7  ;;  %5742 = vmatpush3.bf16.msra.mxu0 %v5967_v52  ;;  %v7824_v7 = vrot.slane %v6001_v30, %v8991_v40 }
 0xc3e   : > { %5724 = vmatmul.mubr.bf16.gmra.mrb[100].mxu1 %v3192_v63  ;;  %v1483_v47 = vadd.f32 %v6646_v23, %v7824_v7  ;;  %v1473_v60 = vadd.f32 %v6632_v10, %v7824_v7  ;;  %v1487_v38 = vadd.f32 %v6653_v28, %v7824_v7  ;;  %v1477_v61 = vadd.f32 %v9118_v25, %v7824_v7  ;;  %v9119_v28 = vld [vmem:[#allocation27_spill] sm:$0xff] }
 0xc3f   : > { %v1503_v30 = vadd.f32 %v9119_v28, %v7824_v7  ;;  %v9123_v28 = vld [vmem:[#allocation35_spill] sm:$0xff] }
 0xced   : > { %v5713_v19 = vpop.f32.mrb[88].mxu1 }
 0xcee   : > { %v3357_v45 = vadd.f32 %v5713_v19, %v1483_v47  ;;  %v3292_v36 = vpop.f32.mrb[89].mxu1  ;;  %v9120_v47 = vld [vmem:[#allocation23_spill] sm:$0xff] }
 0xcef   : > { %v3355_v17 = vadd.f32 %v3292_v36, %v1473_v60  ;;  %v5714_v35 = vpop.f32.mrb[90].mxu1  ;;  %v1493_v19 = vadd.f32 %v9120_v47, %v7824_v7  ;;  %v9121_v60 = vld [vmem:[#allocation29_spill] sm:$0xff]  ;;  %v1523_v47 = vadd.f32 %v9123_v28, %v7824_v7  ;;  %v9127_v28 = vld [vmem:[#allocation43_spill] sm:$0xff] }
 0xcf0   : > { %v3358_v3 = vadd.f32 %v5714_v35, %v1487_v38  ;;  %v3295_v20 = vpop.f32.mrb[91].mxu1  ;;  %v3373_v34 = vmax.f32 %v3357_v45, 0.0  ;;  %v1507_v38 = vadd.f32 %v9121_v60, %v7824_v7  ;;  %v9122_v45 = vld [vmem:[#allocation25_spill] sm:$0xff] }
 0xcf1   : > { %v3356_v55 = vadd.f32 %v3295_v20, %v1477_v61  ;;  %v3371_v23 = vmax.f32 %v3355_v17, 0.0  ;;  %v1497_v17 = vadd.f32 %v9122_v45, %v7824_v7  ;;  %v9125_v45 = vld [vmem:[#allocation37_spill] sm:$0xff] }
 0xcf2   : > { %v3374_v63 = vmax.f32 %v3358_v3, 0.0 }
 0xcf3   : > { %v3372_v29 = vmax.f32 %v3356_v55, 0.0 }
 0xcf4   : > { %v3388_v52 = vpack.c.bf16 %v3374_v63, %v3373_v34 }
 0xcf5   : > { %v3387_v10 = vpack.c.bf16 %v3372_v29, %v3371_v23 }
 0xcf7   : > { %5743 = vmatprep.mubr.bf16.mxu0 %v3387_v10 }
 0xcf8   : > { %5744 = vmatmul.mubr.bf16.vlgmr.msra.gmra.mrb[88].mxu0 %v3388_v52 }
 0xd01   : > { %v5717_v25 = vpop.f32.mrb[92].mxu1 }
 0xd02   : > { %v3361_v36 = vadd.f32 %v5717_v25, %v1503_v30  ;;  %v3308_v61 = vpop.f32.mrb[93].mxu1  ;;  %v9124_v30 = vld [vmem:[#allocation31_spill] sm:$0xff] }
 0xd03   : > { %v3359_v35 = vadd.f32 %v3308_v61, %v1493_v19  ;;  %v5718_v3 = vpop.f32.mrb[94].mxu1  ;;  %v1513_v25 = vadd.f32 %v9124_v30, %v7824_v7  ;;  %v1527_v19 = vadd.f32 %v9125_v45, %v7824_v7  ;;  %v1543_v30 = vadd.f32 %v9127_v28, %v7824_v7 }
 0xd04   : > { %v3362_v20 = vadd.f32 %v5718_v3, %v1507_v38  ;;  %v3311_v55 = vpop.f32.mrb[95].mxu1  ;;  %v3377_v63 = vmax.f32 %v3361_v36, 0.0  ;;  %v9126_v36 = vld [vmem:[#allocation33_spill] sm:$0xff] }
 0xd05   : > { %v3360_v34 = vadd.f32 %v3311_v55, %v1497_v17  ;;  %v3375_v29 = vmax.f32 %v3359_v35, 0.0  ;;  %v1517_v17 = vadd.f32 %v9126_v36, %v7824_v7  ;;  %v9130_v36 = vld [vmem:[#allocation41_spill] sm:$0xff] }
 0xd06   : > { %v3378_v23 = vmax.f32 %v3362_v20, 0.0 }
 0xd07   : > { %v3376_v52 = vmax.f32 %v3360_v34, 0.0 }
 0xd08   : > { %v3390_v10 = vpack.c.bf16 %v3378_v23, %v3377_v63 }
 0xd09   : > { %v3389_v40 = vpack.c.bf16 %v3376_v52, %v3375_v29  ;;  %v5721_v60 = vpop.f32.mrb[96].mxu1 }
 0xd0a   : > { %v3365_v61 = vadd.f32 %v5721_v60, %v1523_v47  ;;  %v3324_v38 = vpop.f32.mrb[97].mxu1  ;;  %v9128_v47 = vld [vmem:[#allocation39_spill] sm:$0xff] }
 0xd0b   : > { %5747 = vmatprep.mubr.bf16.mxu0 %v3389_v40  ;;  %v3363_v35 = vadd.f32 %v3324_v38, %v1513_v25  ;;  %v5722_v3 = vpop.f32.mrb[98].mxu1  ;;  %v1533_v40 = vadd.f32 %v9128_v47, %v7824_v7  ;;  %v9129_v25 = vld [vmem:[#allocation45_spill] sm:$0xff] }
 0xd0c   : > { %5748 = vmatmul.mubr.bf16.gmra.mrb[92].mxu0 %v3390_v10  ;;  %v3366_v20 = vadd.f32 %v5722_v3, %v1527_v19  ;;  %v3327_v55 = vpop.f32.mrb[99].mxu1  ;;  %v3381_v63 = vmax.f32 %v3365_v61, 0.0  ;;  %v1547_v38 = vadd.f32 %v9129_v25, %v7824_v7  ;;  %v1537_v61 = vadd.f32 %v9130_v36, %v7824_v7  ;;  %v7861_v7 = vld [vmem:[%s8941_s9 + $0x2] ss:$0 sm:$0xff] }
 0xd0d   : > { %v3364_v34 = vadd.f32 %v3327_v55, %v1517_v17  ;;  %v3379_v29 = vmax.f32 %v3363_v35, 0.0 }
 0xd0e   : > { %v3382_v23 = vmax.f32 %v3366_v20, 0.0 }
 0xd0f   : > { %v3380_v52 = vmax.f32 %v3364_v34, 0.0 }
 0xd10   : > { %v3392_v45 = vpack.c.bf16 %v3382_v23, %v3381_v63 }
 0xd11   : > { %v3391_v60 = vpack.c.bf16 %v3380_v52, %v3379_v29  ;;  %v5725_v27 = vpop.f32.mrb[100].mxu1 }
 0xd12   : > { %v3369_v10 = vadd.f32 %v5725_v27, %v1543_v30  ;;  %v3340_v19 = vpop.f32.mrb[101].mxu1  ;;  %v3564_v30 = vld [vmem:[%s6464_s18 + $0x50] sm:$0xff] }
 0xd13   : > { %v3367_v17 = vadd.f32 %v3340_v19, %v1533_v40  ;;  %v5726_v35 = vpop.f32.mrb[102].mxu1  ;;  %5751 = vmatprep.mubr.bf16.mxu0 %v3391_v60  ;;  %v3562_v40 = vld [vmem:[%s6464_s18 + $0x10] sm:$0xff] }
 0xd14   : > { %v3370_v3 = vadd.f32 %v5726_v35, %v1547_v38  ;;  %v3343_v20 = vpop.f32.mrb[103].mxu1  ;;  %5752 = vmatmul.mubr.bf16.gmra.mrb[96].mxu0 %v3392_v45  ;;  %v3385_v34 = vmax.f32 %v3369_v10, 0.0  ;;  %v3563_v19 = vld [vmem:[%s6464_s18 + $0x30] sm:$0xff] }
 0xd15   : > { %v3368_v55 = vadd.f32 %v3343_v20, %v1537_v61  ;;  %v3383_v23 = vmax.f32 %v3367_v17, 0.0 }
 0xd16   : > { %v3386_v63 = vmax.f32 %v3370_v3, 0.0  ;;  %v3565_v3 = vld [vmem:[%s6464_s18 + $0x70] sm:$0xff] }
 0xd17   : > { %v3384_v29 = vmax.f32 %v3368_v55, 0.0 }
 0xd18   : > { %v3394_v52 = vpack.c.bf16 %v3386_v63, %v3385_v34  ;;  %v3566_v63 = vld [vmem:[%s6464_s18 + $0x90] sm:$0xff] }
 0xd19   : > { %v3393_v27 = vpack.c.bf16 %v3384_v29, %v3383_v23 }
 0xd1b   : > { %5755 = vmatprep.mubr.bf16.mxu0 %v3393_v27  ;;  %v3567_v27 = vld [vmem:[%s6464_s18 + $0xb0] sm:$0xff] }
 0xd1c   : > { %5756 = vmatmul.mubr.bf16.gmra.mrb[100].mxu0 %v3394_v52 }
 0xdcb   : > { %v5745_v28 = vpop.f32.mrb[88].mxu0 }
 0xdcc   : > { %v3508_v45 = vadd.f32 %v5745_v28, %v7861_v7  ;;  %v3499_v47 = vpop.f32.mrb[89].mxu0 }
 0xdcd   : > { %v3500_v60 = vadd.f32 %v7861_v7, %v3499_v47  ;;  %v5746_v25 = vpop.f32.mrb[90].mxu0  ;;  %v3568_v47 = vld [vmem:[%s6464_s18 + $0xd0] sm:$0xff] }
 0xdce   : > { %v7867_v38 = vadd.f32 %v3564_v30, %v3508_v45  ;;  %v3502_v10 = vpop.f32.mrb[91].mxu0  ;;  %v3511_v35 = vadd.f32 %v5746_v25, %v7861_v7  ;;  %v3569_v25 = vld [vmem:[%s6464_s18 + $0xf0] sm:$0xff] }
 0xdcf   : > { %v7870_v36 = vadd.f32 %v3562_v40, %v3500_v60  ;;  %v3503_v61 = vadd.f32 %v7861_v7, %v3502_v10 }
 0xdd0   : > { %3598 = vmax.xlane.f32.xlu0 %v7867_v38  ;;  %v7880_v20 = vadd.f32 %v3565_v3, %v3511_v35  ;;  %v3570_v3 = vld [vmem:[%s6464_s18 + $0x110] sm:$0xff] }
 0xdd1   : > { %v7874_v17 = vadd.f32 %v3563_v19, %v3503_v61  ;;  %3594 = vmax.xlane.f32.xlu1 %v7870_v36 }
 0xdd4   : > { %3596 = vmax.xlane.f32.xlu0 %v7874_v17 }
 0xdd8   : > { %3600 = vmax.xlane.f32.xlu0 %v7880_v20 }
 0xddf   : > { %v5749_v55 = vpop.f32.mrb[92].mxu0 }
 0xde0   : > { %v3515_v34 = vpop.f32.mrb[93].mxu0  ;;  %v3524_v28 = vadd.f32 %v5749_v55, %v7861_v7 }
 0xde1   : > { %v3516_v23 = vadd.f32 %v7861_v7, %v3515_v34  ;;  %v5750_v29 = vpop.f32.mrb[94].mxu0 }
 0xde2   : > { %v3518_v52 = vpop.f32.mrb[95].mxu0  ;;  %v3527_v40 = vadd.f32 %v5750_v29, %v7861_v7  ;;  %v7896_v10 = vadd.f32 %v3568_v47, %v3524_v28  ;;  %v3572_v28 = vld [vmem:[%s6464_s18 + $0x150] sm:$0xff] }
 0xde3   : > { %v7887_v30 = vadd.f32 %v3566_v63, %v3516_v23  ;;  %v3519_v45 = vadd.f32 %v7861_v7, %v3518_v52  ;;  %v3571_v23 = vld [vmem:[%s6464_s18 + $0x130] sm:$0xff] }
 0xde4   : > { %v7899_v61 = vadd.f32 %v3569_v25, %v3527_v40  ;;  %v3573_v40 = vld [vmem:[%s6464_s18 + $0x170] sm:$0xff] }
 0xde5   : > { %v7892_v60 = vadd.f32 %v3567_v27, %v3519_v45  ;;  %3602 = vmax.xlane.f32.xlu1 %v7887_v30 }
 0xde7   : > { %3604 = vmax.xlane.f32.xlu0 %v7892_v60  ;;  %v5753_v19 = vpop.f32.mrb[96].mxu0 }
 0xde8   : > { %v3531_v35 = vpop.f32.mrb[97].mxu0  ;;  %v3540_v29 = vadd.f32 %v5753_v19, %v7861_v7 }
 0xde9   : > { %3606 = vmax.xlane.f32.xlu1 %v7896_v10  ;;  %v3532_v55 = vadd.f32 %v7861_v7, %v3531_v35  ;;  %v5754_v34 = vpop.f32.mrb[98].mxu0 }
 0xdea   : > { %v3534_v63 = vpop.f32.mrb[99].mxu0  ;;  %v3543_v45 = vadd.f32 %v5754_v34, %v7861_v7  ;;  %v7916_v25 = vadd.f32 %v3572_v28, %v3540_v29  ;;  %v3576_v28 = vld [vmem:[%s6464_s18 + $0x1d0] sm:$0xff] }
 0xdeb   : > { %3608 = vmax.xlane.f32.xlu0 %v7899_v61  ;;  %v7907_v52 = vadd.f32 %v3570_v3, %v3532_v55  ;;  %v3535_v27 = vadd.f32 %v7861_v7, %v3534_v63  ;;  %v3574_v3 = vld [vmem:[%s6464_s18 + $0x190] sm:$0xff] }
 0xdec   : > { %v7920_v55 = vadd.f32 %v3573_v40, %v3543_v45  ;;  %v3577_v40 = vld [vmem:[%s6464_s18 + $0x1f0] sm:$0xff] }
 0xded   : > { %v7912_v47 = vadd.f32 %v3571_v23, %v3535_v27  ;;  %3610 = vmax.xlane.f32.xlu1 %v7907_v52  ;;  %v3575_v27 = vld [vmem:[%s6464_s18 + $0x1b0] sm:$0xff] }
 0xdef   : > { %3612 = vmax.xlane.f32.xlu0 %v7912_v47  ;;  %v5757_v35 = vpop.f32.mrb[100].mxu0 }
 0xdf0   : > { %v3547_v19 = vpop.f32.mrb[101].mxu0  ;;  %v3556_v1 = vadd.f32 %v5757_v35, %v7861_v7 }
 0xdf1   : > { %v3548_v63 = vadd.f32 %v7861_v7, %v3547_v19  ;;  %3614 = vmax.xlane.f32.xlu1 %v7916_v25  ;;  %v5758_v34 = vpop.f32.mrb[102].mxu0 }
 0xdf2   : > { %v3550_v23 = vpop.f32.mrb[103].mxu0  ;;  %v3559_v41 = vadd.f32 %v5758_v34, %v7861_v7  ;;  %v7936_v19 = vadd.f32 %v3576_v28, %v3556_v1 }
 0xdf3   : > { %v7926_v4 = vadd.f32 %v3574_v3, %v3548_v63  ;;  %v3551_v29 = vadd.f32 %v7861_v7, %v3550_v23  ;;  %3616 = vmax.xlane.f32.xlu0 %v7920_v55  ;;  %v9131_v7 = vld [vmem:[#allocation47_spill] sm:$0xff] }
 0xdf4   : > { %v7939_v46 = vadd.f32 %v3577_v40, %v3559_v41 }
 0xdf5   : > { %v7932_v45 = vadd.f32 %v3575_v27, %v3551_v29  ;;  %3618 = vmax.xlane.f32.xlu1 %v7926_v4 }
 0xdf7   : > { %3620 = vmax.xlane.f32.xlu0 %v7932_v45 }
 0xdf9   : > { %3622 = vmax.xlane.f32.xlu1 %v7936_v19 }
 0xdfb   : > { %3624 = vmax.xlane.f32.xlu0 %v7939_v46 }
 0xe5d   : > { %v3599_v35 = vpop.xlane.xlu0 %3598 }
 0xe5e   : > { %vm3628_vm2 = vcmp.ge.f32.partialorder %v7867_v38, %v3599_v35  ;;  %v3595_v3 = vpop.xlane.xlu1 %3594 }
 0xe5f   : > { %vm3626_vm3 = vcmp.ge.f32.partialorder %v7870_v36, %v3595_v3  ;;  %v7946_v63 = vsel %vm3628_vm2, %v9131_v7, 128 }
 0xe60   : > { %v7949_v1 = vsel %vm3626_vm3, %v9131_v7, 128  ;;  %v3687_v23 = vshra.s32 %v7946_v63, 16 }
 0xe61   : > { %v3659_v34 = vshra.s32 %v7949_v1, 16  ;;  %v3597_v41 = vpop.xlane.xlu0 %3596 }
 0xe62   : > { %vm3627_vm4 = vcmp.ge.f32.partialorder %v7874_v17, %v3597_v41  ;;  %v7967_v17 = vcvt.s32.f32 %v3687_v23 }
 0xe63   : > { %v7955_v27 = vsel %vm3627_vm4, %v9131_v7, 128  ;;  %v7957_v38 = vcvt.s32.f32 %v3659_v34 }
 0xe64   : > { %v3673_v36 = vshra.s32 %v7955_v27, 16  ;;  %v3672_v49 = vand.u32 65535, %v7955_v27 }
 0xe65   : > { %3662 = vmin.xlane.f32.xlu1 %v7957_v38  ;;  %v3601_v29 = vpop.xlane.xlu0 %3600 }
 0xe66   : > { %vm3629_vm5 = vcmp.ge.f32.partialorder %v7880_v20, %v3601_v29  ;;  %v7962_v28 = vcvt.s32.f32 %v3673_v36  ;;  %v3674_v14 = vcvt.s32.f32 %v3672_v49 }
 0xe67   : > { %v7965_v40 = vsel %vm3629_vm5, %v9131_v7, 128 }
 0xe68   : > { %v3701_v35 = vshra.s32 %v7965_v40, 16  ;;  %3676 = vmin.xlane.f32.xlu0 %v7962_v28  ;;  %v3700_v42 = vand.u32 65535, %v7965_v40 }
 0xe69   : > { %3690 = vmin.xlane.f32.xlu1 %v7967_v17 }
 0xe6a   : > { %v7972_v3 = vcvt.s32.f32 %v3701_v35  ;;  %v3702_v40 = vcvt.s32.f32 %v3700_v42 }
 0xe6c   : > { %3704 = vmin.xlane.f32.xlu0 %v7972_v3 }
 0xe72   : > { %v3603_v34 = vpop.xlane.xlu1 %3602 }
 0xe73   : > { %vm3630_vm6 = vcmp.ge.f32.partialorder %v7887_v30, %v3603_v34 }
 0xe74   : > { %v7977_v20 = vsel %vm3630_vm6, %v9131_v7, 128  ;;  %v3605_v41 = vpop.xlane.xlu0 %3604 }
 0xe75   : > { %v3715_v23 = vshra.s32 %v7977_v20, 16  ;;  %vm3631_vm7 = vcmp.ge.f32.partialorder %v7892_v60, %v3605_v41 }
 0xe76   : > { %v7982_v36 = vsel %vm3631_vm7, %v9131_v7, 128  ;;  %v3607_v29 = vpop.xlane.xlu1 %3606 }
 0xe77   : > { %v3729_v35 = vshra.s32 %v7982_v36, 16  ;;  %vm3632_vm8 = vcmp.ge.f32.partialorder %v7896_v10, %v3607_v29  ;;  %v7986_v32 = vcvt.s32.f32 %v3715_v23 }
 0xe78   : > { %v7989_v30 = vsel %vm3632_vm8, %v9131_v7, 128  ;;  %v3609_v34 = vpop.xlane.xlu0 %3608 }
 0xe79   : > { %v3743_v51 = vshra.s32 %v7989_v30, 16  ;;  %vm3633_vm9 = vcmp.ge.f32.partialorder %v7899_v61, %v3609_v34  ;;  %3718 = vmin.xlane.f32.xlu1 %v7986_v32  ;;  %v7994_v60 = vcvt.s32.f32 %v3729_v35 }
 0xe7a   : > { %v7997_v41 = vsel %vm3633_vm9, %v9131_v7, 128  ;;  %v3611_v10 = vpop.xlane.xlu1 %3610 }
 0xe7b   : > { %v3757_v26 = vshra.s32 %v7997_v41, 16  ;;  %3732 = vmin.xlane.f32.xlu0 %v7994_v60  ;;  %v8001_v23 = vcvt.s32.f32 %v3743_v51  ;;  %vm3634_vm10 = vcmp.ge.f32.partialorder %v7907_v52, %v3611_v10 }
 0xe7c   : > { %v8005_v29 = vsel %vm3634_vm10, %v9131_v7, 128  ;;  %v3613_v61 = vpop.xlane.xlu0 %3612 }
 0xe7d   : > { %3746 = vmin.xlane.f32.xlu1 %v8001_v23  ;;  %v8008_v35 = vcvt.s32.f32 %v3757_v26  ;;  %v3771_v34 = vshra.s32 %v8005_v29, 16  ;;  %vm3635_vm11 = vcmp.ge.f32.partialorder %v7912_v47, %v3613_v61 }
 0xe7e   : > { %v8013_v39 = vsel %vm3635_vm11, %v9131_v7, 128  ;;  %v3615_v53 = vpop.xlane.xlu1 %3614 }
 0xe7f   : > { %3760 = vmin.xlane.f32.xlu0 %v8008_v35  ;;  %v3785_v51 = vshra.s32 %v8013_v39, 16  ;;  %vm3636_vm12 = vcmp.ge.f32.partialorder %v7916_v25, %v3615_v53  ;;  %v8018_v52 = vcvt.s32.f32 %v3771_v34 }
 0xe80   : > { %v8021_v10 = vsel %vm3636_vm12, %v9131_v7, 128  ;;  %v3617_v26 = vpop.xlane.xlu0 %3616 }
 0xe81   : > { %v8023_v50 = vcvt.s32.f32 %v3785_v51  ;;  %v3799_v47 = vshra.s32 %v8021_v10, 16  ;;  %3774 = vmin.xlane.f32.xlu1 %v8018_v52  ;;  %vm3637_vm13 = vcmp.ge.f32.partialorder %v7920_v55, %v3617_v26 }
 0xe82   : > { %v3619_v61 = vpop.xlane.xlu1 %3618  ;;  %v8029_v2 = vsel %vm3637_vm13, %v9131_v7, 128 }
 0xe83   : > { %vm3638_vm14 = vcmp.ge.f32.partialorder %v7926_v4, %v3619_v61  ;;  %3788 = vmin.xlane.f32.xlu0 %v8023_v50  ;;  %v8033_v53 = vcvt.s32.f32 %v3799_v47  ;;  %v3813_v25 = vshra.s32 %v8029_v2, 16 }
 0xe84   : > { %v8037_v34 = vsel %vm3638_vm14, %v9131_v7, 128  ;;  %v3621_v51 = vpop.xlane.xlu0 %3620 }
 0xe85   : > { %v3827_v13 = vshra.s32 %v8037_v34, 16  ;;  %vm3639_vm15 = vcmp.ge.f32.partialorder %v7932_v45, %v3621_v51  ;;  %3802 = vmin.xlane.f32.xlu1 %v8033_v53  ;;  %v8042_v55 = vcvt.s32.f32 %v3813_v25 }
 0xe86   : > { %v8045_v4 = vsel %vm3639_vm15, %v9131_v7, 128  ;;  %v3623_v26 = vpop.xlane.xlu1 %3622 }
 0xe87   : > { %v3841_v47 = vshra.s32 %v8045_v4, 16  ;;  %vm3640_vm0 = vcmp.ge.f32.partialorder %v7936_v19, %v3623_v26  ;;  %v8049_v61 = vcvt.s32.f32 %v3827_v13  ;;  %3816 = vmin.xlane.f32.xlu0 %v8042_v55 }
 0xe88   : > { %v8052_v9 = vsel %vm3640_vm0, %v9131_v7, 128  ;;  %v3625_v45 = vpop.xlane.xlu0 %3624 }
 0xe89   : > { %v8055_v51 = vcvt.s32.f32 %v3841_v47  ;;  %v3855_v25 = vshra.s32 %v8052_v9, 16  ;;  %3830 = vmin.xlane.f32.xlu1 %v8049_v61  ;;  %vm3641_vm1 = vcmp.ge.f32.partialorder %v7939_v46, %v3625_v45  ;;  %v3658_v47 = vand.u32 65535, %v7949_v1 }
 0xe8a   : > { %v8061_v0 = vsel %vm3641_vm1, %v9131_v7, 128  ;;  %v3686_v46 = vand.u32 65535, %v7946_v63 }
 0xe8b   : > { %v8063_v19 = vcvt.s32.f32 %v3855_v25  ;;  %v3869_v13 = vshra.s32 %v8061_v0, 16  ;;  %3844 = vmin.xlane.f32.xlu0 %v8055_v51  ;;  %v3660_v25 = vcvt.s32.f32 %v3658_v47 }
 0xe8c   : > { %v3688_v27 = vcvt.s32.f32 %v3686_v46 }
 0xe8d   : > { %3858 = vmin.xlane.f32.xlu1 %v8063_v19  ;;  %v8068_v26 = vcvt.s32.f32 %v3869_v13 }
 0xe8f   : > { %3872 = vmin.xlane.f32.xlu0 %v8068_v26 }
 0xef2   : > { %v8074_v45 = vpop.xlane.xlu1 %3662 }
 0xef3   : > { %vm3664_vm2 = vcmp.eq.f32.partialorder %v7957_v38, %v8074_v45 }
 0xef4   : > { %v3665_v7 = vsel %vm3664_vm2, %v3660_v25, inf  ;;  %v3756_v25 = vand.u32 65535, %v7997_v41  ;;  %vm4902_vm2 = vcmask 7168  }
 0xef5   : > { %3666 = vmin.xlane.f32.xlu1 %v3665_v7  ;;  %v8079_v13 = vpop.xlane.xlu0 %3676  ;;  %v3714_v7 = vand.u32 65535, %v7977_v20 }
 0xef6   : > { %vm3678_vm3 = vcmp.eq.f32.partialorder %v7962_v28, %v8079_v13  ;;  %v8083_v1 = vpop.xlane.xlu1 %3690  ;;  %v3728_v28 = vand.u32 65535, %v7982_v36 }
 0xef7   : > { %v3679_v63 = vsel %vm3678_vm3, %v3674_v14, inf  ;;  %vm3692_vm4 = vcmp.eq.f32.partialorder %v7967_v17, %v8083_v1  ;;  %v3742_v14 = vand.u32 65535, %v7989_v30  ;;  %v3716_v17 = vcvt.s32.f32 %v3714_v7 }
 0xef8   : > { %3680 = vmin.xlane.f32.xlu0 %v3679_v63  ;;  %v3693_v47 = vsel %vm3692_vm4, %v3688_v27, inf  ;;  %v3770_v63 = vand.u32 65535, %v8005_v29  ;;  %vm4919_vm3 = vcmask 15360  }
 0xef9   : > { %3694 = vmin.xlane.f32.xlu1 %v3693_v47  ;;  %v8087_v38 = vpop.xlane.xlu0 %3704  ;;  %v3744_v30 = vcvt.s32.f32 %v3742_v14  ;;  %v3758_v47 = vcvt.s32.f32 %v3756_v25 }
 0xefa   : > { %vm3706_vm5 = vcmp.eq.f32.partialorder %v7972_v3, %v8087_v38  ;;  %v3730_v3 = vcvt.s32.f32 %v3728_v28  ;;  %v3772_v29 = vcvt.s32.f32 %v3770_v63 }
 0xefb   : > { %v3707_v49 = vsel %vm3706_vm5, %v3702_v40, inf  ;;  %v3784_v40 = vand.u32 65535, %v8013_v39 }
 0xefc   : > { %3708 = vmin.xlane.f32.xlu0 %v3707_v49  ;;  %v3798_v49 = vand.u32 65535, %v8021_v10  ;;  %v3826_v10 = vand.u32 65535, %v8037_v34 }
 0xefd   : > { %v3786_v28 = vcvt.s32.f32 %v3784_v40 }
 0xefe   : > { %v3828_v34 = vcvt.s32.f32 %v3826_v10 }
 0xf06   : > { %v8094_v46 = vpop.xlane.xlu1 %3718 }
 0xf07   : > { %vm3720_vm6 = vcmp.eq.f32.partialorder %v7986_v32, %v8094_v46 }
 0xf08   : > { %v8099_v42 = vpop.xlane.xlu0 %3732  ;;  %v3721_v27 = vsel %vm3720_vm6, %v3716_v17, inf }
 0xf09   : > { %vm3734_vm7 = vcmp.eq.f32.partialorder %v7994_v60, %v8099_v42  ;;  %3722 = vmin.xlane.f32.xlu1 %v3721_v27  ;;  %v3800_v27 = vcvt.s32.f32 %v3798_v49 }
 0xf0a   : > { %v8103_v20 = vpop.xlane.xlu1 %3746  ;;  %v3735_v36 = vsel %vm3734_vm7, %v3730_v3, inf }
 0xf0b   : > { %vm3748_vm8 = vcmp.eq.f32.partialorder %v8001_v23, %v8103_v20  ;;  %3736 = vmin.xlane.f32.xlu0 %v3735_v36  ;;  %v6208_v23 = vmov 2   ;;  %v3840_v36 = vand.u32 65535, %v8045_v4  ;;  %v3868_v4 = vand.u32 65535, %v8061_v0 }
 0xf0c   : > { %v8108_v32 = vpop.xlane.xlu0 %3760  ;;  %v3749_v41 = vsel %vm3748_vm8, %v3744_v30, inf  ;;  %5907 = vset.pattern.permute.xlu1 %v6208_v23  ;;  %5908 = vset.pattern.permute.xlu0 %v6208_v23  ;;  %v5972_v23 = vld [vmem:[%s9070_s28 + $0xe0] sm:$0xff]  }
 0xf0d   : > { %vm3762_vm9 = vcmp.eq.f32.partialorder %v8008_v35, %v8108_v32  ;;  %3750 = vmin.xlane.f32.xlu1 %v3749_v41  ;;  %v3812_v35 = vand.u32 65535, %v8029_v2  ;;  %v3842_v41 = vcvt.s32.f32 %v3840_v36 }
 0xf0e   : > { %v3763_v60 = vsel %vm3762_vm9, %v3758_v47, inf  ;;  %v8114_v7 = vpop.xlane.xlu1 %3774 }
 0xf0f   : > { %3764 = vmin.xlane.f32.xlu0 %v3763_v60  ;;  %vm3776_vm10 = vcmp.eq.f32.partialorder %v8018_v52, %v8114_v7  ;;  %v3814_v3 = vcvt.s32.f32 %v3812_v35  ;;  %v3870_v60 = vcvt.s32.f32 %v3868_v4 }
 0xf10   : > { %v8118_v14 = vpop.xlane.xlu0 %3788  ;;  %v3777_v39 = vsel %vm3776_vm10, %v3772_v29, inf  ;;  %v5970_v29 = vld [vmem:[%s9070_s28 + $0xd0] sm:$0xff]  }
 0xf11   : > { %vm3790_vm11 = vcmp.eq.f32.partialorder %v8023_v50, %v8118_v14  ;;  %3778 = vmin.xlane.f32.xlu1 %v3777_v39  ;;  %v3854_v50 = vand.u32 65535, %v8052_v9  ;;  %v3683_v39 = vcvt.f32.s32 %v8079_v13 }
 0xf12   : > { %v8124_v17 = vpop.xlane.xlu1 %3802  ;;  %v3791_v25 = vsel %vm3790_vm11, %v3786_v28, inf  ;;  %v3669_v28 = vcvt.f32.s32 %v8074_v45 }
 0xf13   : > { %vm3804_vm12 = vcmp.eq.f32.partialorder %v8033_v53, %v8124_v17  ;;  %3792 = vmin.xlane.f32.xlu0 %v3791_v25  ;;  %v3697_v25 = vcvt.f32.s32 %v8083_v1  ;;  %v3684_v36 = vshll.u32 %v3683_v39, 16 }
 0xf14   : > { %v3805_v52 = vsel %vm3804_vm12, %v3800_v27, inf  ;;  %v8129_v30 = vpop.xlane.xlu0 %3816  ;;  %v3670_v10 = vshll.u32 %v3669_v28, 16  ;;  %v6004_v28 = vld [vmem:[%s7066_s21 + $0x10] sm:$0xff] }
 0xf15   : > { %3806 = vmin.xlane.f32.xlu1 %v3805_v52  ;;  %vm3818_vm13 = vcmp.eq.f32.partialorder %v8042_v55, %v8129_v30  ;;  %v3856_v55 = vcvt.s32.f32 %v3854_v50  ;;  %v3711_v50 = vcvt.f32.s32 %v8087_v38  ;;  %v6003_v38 = vld [vmem:[%s7066_s21 + $0x8] sm:$0xff] }
 0xf16   : > { %v8134_v2 = vpop.xlane.xlu1 %3830  ;;  %v3819_v53 = vsel %vm3818_vm13, %v3814_v3, inf }
 0xf17   : > { %vm3832_vm14 = vcmp.eq.f32.partialorder %v8049_v61, %v8134_v2  ;;  %3820 = vmin.xlane.f32.xlu0 %v3819_v53 }
 0xf18   : > { %v3833_v63 = vsel %vm3832_vm14, %v3828_v34, inf  ;;  %v8139_v47 = vpop.xlane.xlu0 %3844 }
 0xf19   : > { %3834 = vmin.xlane.f32.xlu1 %v3833_v63  ;;  %vm3846_vm15 = vcmp.eq.f32.partialorder %v8055_v51, %v8139_v47  ;;  %v5968_v51 = vld [vmem:[%s9070_s28 + $0xc0] sm:$0xff]   ;;  %v3698_v63 = vshll.u32 %v3697_v25, 16 }
 0xf1a   : > { %v8143_v9 = vpop.xlane.xlu1 %3858  ;;  %v3847_v40 = vsel %vm3846_vm15, %v3842_v41, inf  ;;  %5759 = vmatprep.subr.bf16.mxu1 %v5968_v51 }
 0xf1b   : > { %vm3860_vm0 = vcmp.eq.f32.partialorder %v8063_v19, %v8143_v9  ;;  %3848 = vmin.xlane.f32.xlu0 %v3847_v40  ;;  %v5969_v19 = vld [vmem:[%s9070_s28 + $0xc8] sm:$0xff]   ;;  %5760 = vmatpush3.bf16.msra.mxu1 %v5968_v51 }
 0xf1c   : > { %v3861_v61 = vsel %vm3860_vm0, %v3856_v55, inf  ;;  %v8147_v49 = vpop.xlane.xlu0 %3872  ;;  %5761 = vmatprep.subr.bf16.mxu1 %v5969_v19  ;;  %v6002_v55 = vld [vmem:[%s7066_s21] sm:$0xff] }
 0xf1d   : > { %3862 = vmin.xlane.f32.xlu1 %v3861_v61  ;;  %vm3874_vm1 = vcmp.eq.f32.partialorder %v8068_v26, %v8147_v49  ;;  %v5971_v26 = vld [vmem:[%s9070_s28 + $0xd8] sm:$0xff]  }
 0xf1e   : > { %v3875_v0 = vsel %vm3874_vm1, %v3870_v60, inf  ;;  %v3712_v60 = vshll.u32 %v3711_v50, 16  ;;  %v6005_v50 = vld [vmem:[%s7066_s21 + $0x18] sm:$0xff] }
 0xf1f   : > { %3876 = vmin.xlane.f32.xlu0 %v3875_v0  ;;  %5762 = vmatpush3.bf16.msra.mxu1 %v5969_v19 }
 0xf20   : > { %5763 = vmatprep.subr.bf16.mxu1 %v5970_v29 }
 0xf23   : > { %5764 = vmatpush3.bf16.msra.mxu1 %v5970_v29 }
 0xf24   : > { %5765 = vmatprep.subr.bf16.mxu1 %v5971_v26 }
 0xf27   : > { %5766 = vmatpush3.bf16.msra.mxu1 %v5971_v26 }
 0xf28   : > { %5767 = vmatprep.subr.bf16.mxu1 %v5972_v23 }
 0xf2b   : > { %5768 = vmatpush3.bf16.msra.mxu1 %v5972_v23 }
 0xf82   : > { %v3667_v35 = vpop.xlane.xlu1 %3666 }
 0xf83   : > { %v3668_v27 = vcvt.f32.s32 %v3667_v35  ;;  %v9132_v35 = vld [vmem:[#allocation48_spill] sm:$0xff] }
 0xf85   : > { %v3671_v52 = vadd.s32 %v3670_v10, %v3668_v27  ;;  %v3681_v3 = vpop.xlane.xlu0 %3680  ;;  %v4903_v10 = vsel %vm4902_vm2, %v9132_v35, %v7578_v24  ;;  %v9134_v24 = vld [vmem:[#allocation49_spill] sm:$0xff] }
 0xf86   : > { %v3682_v34 = vcvt.f32.s32 %v3681_v3  ;;  %v3695_v53 = vpop.xlane.xlu1 %3694  ;;  %v9136_v35 = vld [vmem:[#allocation53_spill] sm:$0xff] }
 0xf87   : > { %v3882_v41 = vcvt.s32.f32 %v3671_v52  ;;  %v3696_v4 = vcvt.f32.s32 %v3695_v53  ;;  %v9133_v53 = vld [vmem:[#allocation51_spill] sm:$0xff] }
 0xf88   : > { %v3685_v45 = vadd.s32 %v3684_v36, %v3682_v34 }
 0xf89   : > { %v3898_v13 = vadd.f32 %v6002_v55, %v3882_v41  ;;  %v3699_v40 = vadd.s32 %v3698_v63, %v3696_v4  ;;  %v3709_v61 = vpop.xlane.xlu0 %3708  ;;  %v4904_v63 = vsel %vm4902_vm2, %v9133_v53, %v7603_v16  ;;  %v5973_v4 = vld [vmem:[%s9070_s28 + $0xe8] sm:$0xff]  }
 0xf8a   : > { %v3883_v1 = vcvt.s32.f32 %v3685_v45  ;;  %v3710_v0 = vcvt.f32.s32 %v3709_v61  ;;  %v4905_v45 = vsel %vm4902_vm2, %v9134_v24, %v7591_v21  ;;  %5769 = vmatprep.subr.bf16.mxu1 %v5973_v4  ;;  %v3739_v21 = vcvt.f32.s32 %v8099_v42 }
 0xf8b   : > { %v3914_v51 = vmul.f32 0.025, %v3898_v13  ;;  %v3884_v19 = vcvt.s32.f32 %v3699_v40  ;;  %v3725_v40 = vcvt.f32.s32 %v8094_v46  ;;  %5770 = vmatpush3.bf16.msra.mxu1 %v5973_v4 }
 0xf8c   : > { %v3899_v29 = vadd.f32 %v6003_v38, %v3883_v1  ;;  %v3713_v26 = vadd.s32 %v3712_v60, %v3710_v0  ;;  %v9135_v60 = vld [vmem:[#allocation50_spill] sm:$0xff]  ;;  %v3753_v38 = vcvt.f32.s32 %v8103_v20 }
 0xf8d   : > { %v3930_v23 = vadd.f32 -1.0, %v3914_v51  ;;  %v3900_v39 = vadd.f32 %v6004_v28, %v3884_v19  ;;  %v4906_v1 = vsel %vm4902_vm2, %v9135_v60, %v7596_v11  ;;  %v5974_v0 = vld [vmem:[%s9070_s28 + $0xf0] sm:$0xff]   ;;  %v3726_v19 = vshll.u32 %v3725_v40, 16 }
 0xf8e   : > { %v3915_v25 = vmul.f32 0.025, %v3899_v29  ;;  %v3885_v27 = vcvt.s32.f32 %v3713_v26  ;;  %5771 = vmatprep.subr.bf16.mxu1 %v5974_v0  ;;  %v3767_v26 = vcvt.f32.s32 %v8108_v32  ;;  %v3740_v11 = vshll.u32 %v3739_v21, 16  ;;  %v9137_v32 = vld [vmem:[#allocation54_spill] sm:$0xff] }
 0xf8f   : > { %v8177_v52 = vsel %vm4919_vm3, %v4903_v10, %v3930_v23  ;;  %v3916_v3 = vmul.f32 0.025, %v3900_v39  ;;  %4027 = vperm.xlu1 %5907, %v3930_v23   ;;  %5772 = vmatpush3.bf16.msra.mxu1 %v5974_v0  ;;  %v5975_v39 = vld [vmem:[%s9070_s28 + $0xf8] sm:$0xff]   ;;  %v4907_v10 = vsel %vm4902_vm2, %v9136_v35, %v7624_v44  ;;  %v6006_v44 = vld [vmem:[%s7066_s21 + $0x20] sm:$0xff]  ;;  %v3795_v21 = vcvt.f32.s32 %v8118_v14 }
 0xf90   : > { %v3931_v36 = vadd.f32 -1.0, %v3915_v25  ;;  %v3901_v34 = vadd.f32 %v6005_v50, %v3885_v27  ;;  %v3754_v25 = vshll.u32 %v3753_v38, 16  ;;  %5773 = vmatprep.subr.bf16.mxu1 %v5975_v39  ;;  %v4908_v50 = vsel %vm4902_vm2, %v9137_v32, %v7634_v8  ;;  %v9140_v8 = vld [vmem:[#allocation57_spill] sm:$0xff] }
 0xf91   : > { %v3932_v41 = vadd.f32 -1.0, %v3916_v3  ;;  %v3796_v14 = vshll.u32 %v3795_v21, 16 }
 0xf92   : > { %v8190_v55 = vsel %vm4919_vm3, %v4904_v63, %v3931_v36  ;;  %v3917_v13 = vmul.f32 0.025, %v3901_v34  ;;  %4032 = vperm.xlu0 %5908, %v3931_v36   ;;  %v9138_v34 = vld [vmem:[#allocation52_spill] sm:$0xff]  ;;  %v3768_v63 = vshll.u32 %v3767_v26, 16 }
 0xf93   : > { %v8194_v61 = vsel %vm4919_vm3, %v4905_v45, %v3932_v41  ;;  %4037 = vperm.xlu1 %5907, %v3932_v41   ;;  %v4909_v53 = vsel %vm4902_vm2, %v9138_v34, %v7619_v57  ;;  %v3781_v41 = vcvt.f32.s32 %v8114_v7  ;;  %5774 = vmatpush3.bf16.msra.mxu1 %v5975_v39  ;;  %v9141_v57 = vld [vmem:[#allocation56_spill] sm:$0xff]  ;;  %v6008_v39 = vld [vmem:[%s7066_s21 + $0x30] sm:$0xff] }
 0xf94   : > { %v3933_v16 = vadd.f32 -1.0, %v3917_v13  ;;  %v8233_v7 = vsel %vm4902_vm2, %v9141_v57, %v7632_v31 }
 0xf96   : > { %v8204_v51 = vsel %vm4919_vm3, %v4906_v1, %v3933_v16  ;;  %v3723_v46 = vpop.xlane.xlu1 %3722  ;;  %v8228_v1 = vsel %vm4902_vm2, %v9140_v8, %v7646_v12  ;;  %v3823_v12 = vcvt.f32.s32 %v8129_v30  ;;  %v6009_v30 = vld [vmem:[%s7066_s21 + $0x38] sm:$0xff] }
 0xf97   : > { %v3724_v29 = vcvt.f32.s32 %v3723_v46  ;;  %4042 = vperm.xlu1 %5907, %v3933_v16   ;;  %v9139_v16 = vld [vmem:[#allocation55_spill] sm:$0xff]  ;;  %v6007_v46 = vld [vmem:[%s7066_s21 + $0x28] sm:$0xff] }
 0xf98   : > { %v3737_v23 = vpop.xlane.xlu0 %3736  ;;  %v4910_v60 = vsel %vm4902_vm2, %v9139_v16, %v7642_v56  ;;  %v3782_v56 = vshll.u32 %v3781_v41, 16  ;;  %v6010_v16 = vld [vmem:[%s7066_s21 + $0x40] sm:$0xff] }
 0xf99   : > { %v3727_v42 = vadd.s32 %v3726_v19, %v3724_v29  ;;  %v3738_v28 = vcvt.f32.s32 %v3737_v23  ;;  %v3809_v23 = vcvt.f32.s32 %v8124_v17 }
 0xf9a   : > { %v3751_v20 = vpop.xlane.xlu1 %3750 }
 0xf9b   : > { %v3886_v27 = vcvt.s32.f32 %v3727_v42  ;;  %v3741_v3 = vadd.s32 %v3740_v11, %v3738_v28  ;;  %v3752_v36 = vcvt.f32.s32 %v3751_v20  ;;  %v3810_v41 = vshll.u32 %v3809_v23, 16 }
 0xf9c   : > { %v3765_v4 = vpop.xlane.xlu0 %3764 }
 0xf9d   : > { %v3902_v24 = vadd.f32 %v6006_v44, %v3886_v27  ;;  %v3887_v45 = vcvt.s32.f32 %v3741_v3  ;;  %v3755_v13 = vadd.s32 %v3754_v25, %v3752_v36  ;;  %v3766_v40 = vcvt.f32.s32 %v3765_v4 }
 0xf9e   : > { %v3779_v26 = vpop.xlane.xlu1 %3778  ;;  %v3837_v25 = vcvt.f32.s32 %v8134_v2 }
 0xf9f   : > { %v3918_v0 = vmul.f32 0.025, %v3902_v24  ;;  %v3903_v19 = vadd.f32 %v6007_v46, %v3887_v45  ;;  %v3888_v38 = vcvt.s32.f32 %v3755_v13  ;;  %v3769_v29 = vadd.s32 %v3768_v63, %v3766_v40 }
 0xfa0   : > { %v3780_v11 = vcvt.f32.s32 %v3779_v26  ;;  %v3793_v20 = vpop.xlane.xlu0 %3792  ;;  %v3824_v45 = vshll.u32 %v3823_v12, 16  ;;  %v3851_v46 = vcvt.f32.s32 %v8139_v47 }
 0xfa1   : > { %v3934_v42 = vadd.f32 -1.0, %v3918_v0  ;;  %v3919_v28 = vmul.f32 0.025, %v3903_v19  ;;  %v3904_v31 = vadd.f32 %v6008_v39, %v3888_v38  ;;  %v3889_v35 = vcvt.s32.f32 %v3769_v29 }
 0xfa2   : > { %v3783_v27 = vadd.s32 %v3782_v56, %v3780_v11  ;;  %v3794_v3 = vcvt.f32.s32 %v3793_v20  ;;  %v3807_v63 = vpop.xlane.xlu1 %3806  ;;  %v6011_v56 = vld [vmem:[%s7066_s21 + $0x48] sm:$0xff]  ;;  %v3879_v39 = vcvt.f32.s32 %v8147_v49  ;;  %v6012_v20 = vld [vmem:[%s7066_s21 + $0x50] sm:$0xff] }
 0xfa3   : > { %v8242_v36 = vsel %vm4919_vm3, %v4907_v10, %v3934_v42  ;;  %v8244_v17 = vadd.f32 -1.0, %v3919_v28  ;;  %v3920_v32 = vmul.f32 0.025, %v3904_v31  ;;  %v3905_v34 = vadd.f32 %v6009_v30, %v3889_v35 }
 0xfa4   : > { %v3890_v4 = vcvt.s32.f32 %v3783_v27  ;;  %v3797_v44 = vadd.s32 %v3796_v14, %v3794_v3  ;;  %v3808_v24 = vcvt.f32.s32 %v3807_v63  ;;  %v3838_v10 = vshll.u32 %v3837_v25, 16  ;;  %v3821_v0 = vpop.xlane.xlu0 %3820  ;;  %v9142_v3 = vld [vmem:[#allocation59_spill] sm:$0xff] }
 0xfa5   : > { %v8249_v2 = vsel %vm4919_vm3, %v4908_v50, %v8244_v17  ;;  %v3936_v13 = vadd.f32 -1.0, %v3920_v32  ;;  %v3921_v40 = vmul.f32 0.025, %v3905_v34  ;;  %v3822_v29 = vcvt.f32.s32 %v3821_v0 }
 0xfa6   : > { %v3906_v8 = vadd.f32 %v6010_v16, %v3890_v4  ;;  %v3891_v57 = vcvt.s32.f32 %v3797_v44  ;;  %v3811_v21 = vadd.s32 %v3810_v41, %v3808_v24  ;;  %v3835_v26 = vpop.xlane.xlu1 %3834  ;;  %v3865_v28 = vcvt.f32.s32 %v8143_v9  ;;  %v6013_v24 = vld [vmem:[%s7066_s21 + $0x58] sm:$0xff] }
 0xfa7   : > { %v8254_v19 = vsel %vm4919_vm3, %v4909_v53, %v3936_v13  ;;  %v3937_v38 = vadd.f32 -1.0, %v3921_v40  ;;  %4057 = vperm.xlu1 %5907, %v3936_v13   ;;  %v3836_v11 = vcvt.f32.s32 %v3835_v26  ;;  %v3825_v47 = vadd.s32 %v3824_v45, %v3822_v29 }
 0xfa8   : > { %v3922_v50 = vmul.f32 0.025, %v3906_v8  ;;  %v3907_v23 = vadd.f32 %v6011_v56, %v3891_v57  ;;  %v3892_v12 = vcvt.s32.f32 %v3811_v21  ;;  %v3849_v27 = vpop.xlane.xlu0 %3848  ;;  %v4913_v32 = vsel %vm4902_vm2, %v9142_v3, %v7651_v18  ;;  %v6015_v56 = vld [vmem:[%s7066_s21 + $0x68] sm:$0xff] }
 0xfa9   : > { %v8260_v31 = vsel %vm4919_vm3, %v4910_v60, %v3937_v38  ;;  %v3839_v25 = vadd.s32 %v3838_v10, %v3836_v11  ;;  %v3852_v30 = vshll.u32 %v3851_v46, 16  ;;  %v3893_v34 = vcvt.s32.f32 %v3825_v47  ;;  %v9143_v11 = vld [vmem:[#allocation58_spill] sm:$0xff] }
 0xfaa   : > { %v3938_v53 = vadd.f32 -1.0, %v3922_v50  ;;  %v3923_v35 = vmul.f32 0.025, %v3907_v23  ;;  %v3908_v14 = vadd.f32 %v6012_v20, %v3892_v12  ;;  %v3850_v9 = vcvt.f32.s32 %v3849_v27  ;;  %v3863_v49 = vpop.xlane.xlu1 %3862 }
 0xfab   : > { %4047 = vperm.xlu1 %5907, %v3934_v42   ;;  %v3894_v4 = vcvt.s32.f32 %v3839_v25  ;;  %v3866_v44 = vshll.u32 %v3865_v28, 16  ;;  %v3909_v45 = vadd.f32 %v6013_v24, %v3893_v34  ;;  %v3864_v40 = vcvt.f32.s32 %v3863_v49  ;;  %v6014_v42 = vld [vmem:[%s7066_s21 + $0x60] sm:$0xff] }
 0xfac   : > { %v8268_v60 = vsel %vm4919_vm3, %v8228_v1, %v3938_v53  ;;  %v3939_v63 = vadd.f32 -1.0, %v3923_v35  ;;  %v3924_v41 = vmul.f32 0.025, %v3908_v14  ;;  %v3853_v13 = vadd.s32 %v3852_v30, %v3850_v9  ;;  %v3877_v57 = vpop.xlane.xlu0 %3876  ;;  %v6016_v14 = vld [vmem:[%s7066_s21 + $0x70] sm:$0xff]  ;;  %v6017_v30 = vld [vmem:[%s7066_s21 + $0x78] sm:$0xff] }
 0xfad   : > { %v3880_v18 = vshll.u32 %v3879_v39, 16  ;;  %v3910_v8 = vadd.f32 %v6014_v42, %v3894_v4  ;;  %v3925_v1 = vmul.f32 0.025, %v3909_v45  ;;  %v3867_v0 = vadd.s32 %v3866_v44, %v3864_v40  ;;  %v9144_v39 = vld [vmem:[#allocation60_spill] sm:$0xff]  ;;  %v5311_v42 = vld [vmem:[%s9088_s25 + $0x8] sm:$0x7] }
 0xfae   : > { %v8273_v10 = vsel %vm4919_vm3, %v8233_v7, %v3939_v63  ;;  %v3940_v16 = vadd.f32 -1.0, %v3924_v41  ;;  %v3895_v21 = vcvt.s32.f32 %v3853_v13  ;;  %v3878_v46 = vcvt.f32.s32 %v3877_v57  ;;  %v9147_v13 = vld [vmem:[#allocation63_spill] sm:$0xff] }
 0xfaf   : > { %4062 = vperm.xlu1 %5907, %v3937_v38   ;;  %v3926_v26 = vmul.f32 0.025, %v3910_v8  ;;  %v3941_v50 = vadd.f32 -1.0, %v3925_v1  ;;  %v3896_v7 = vcvt.s32.f32 %v3867_v0  ;;  %v4914_v28 = vsel %vm4902_vm2, %v9143_v11, %v7638_v58 }
 0xfb0   : > { %v8277_v29 = vsel %vm4919_vm3, %v4913_v32, %v3940_v16  ;;  %4077 = vperm.xlu0 %5908, %v3940_v16   ;;  %v3911_v23 = vadd.f32 %v6015_v56, %v3895_v21  ;;  %v3881_v12 = vadd.s32 %v3880_v18, %v3878_v46  ;;  %v4915_v47 = vsel %vm4902_vm2, %v9144_v39, %v7659_v43  ;;  %v9145_v43 = vld [vmem:[#allocation61_spill] sm:$0xff]  ;;  %v5980_v18 = vld [vmem:[%s8940_s8 + $0xe0] sm:$0xff]  }
 0xfb1   : > { %v3942_v38 = vadd.f32 -1.0, %v3926_v26  ;;  %v8287_v35 = vsel %vm4919_vm3, %v4914_v28, %v3941_v50  ;;  %v3912_v25 = vadd.f32 %v6016_v14, %v3896_v7  ;;  %v4916_v9 = vsel %vm4902_vm2, %v9145_v43, %v7653_v37  ;;  %v5981_v16 = vld [vmem:[%s8940_s8 + $0xe8] sm:$0xff]   ;;  %v8351_v26 = vld [vmem:[%s9091_s7 + $0x2] ss:$0 sm:$0xff]  ;;  %v9152_v14 = vld [vmem:[#allocation79_spill] sm:$0xff] }
 0xfb2   : > { %v3927_v20 = vmul.f32 0.025, %v3911_v23  ;;  %v3897_v27 = vcvt.s32.f32 %v3881_v12  ;;  %v4918_v40 = vsel %vm4902_vm2, %v9147_v13, %v7661_v33  ;;  %v5978_v33 = vld [vmem:[%s8940_s8 + $0xd0] sm:$0xff]   ;;  %v8335_v8 = vrot.slane %v5311_v42, %v6624_v6  ;;  %v9149_v23 = vld [vmem:[#allocation64_spill] sm:$0xff]  ;;  %v9150_v12 = vld [vmem:[#allocation65_spill] sm:$0xff] }
 0xfb3   : > { %4052 = vperm.xlu1 %5907, %v8244_v17   ;;  %v8292_v3 = vsel %vm4919_vm3, %v4915_v47, %v3942_v38  ;;  %v3928_v58 = vmul.f32 0.025, %v3912_v25  ;;  %v9146_v17 = vld [vmem:[#allocation62_spill] sm:$0xff]  ;;  %v8338_v57 = vrot.slane %v5311_v42, %v7231_v59  ;;  %v9148_v0 = vsub.s32 2, %v6621_v5 }
 0xfb4   : > { %4087 = vperm.xlu0 %5908, %v3942_v38   ;;  %v3943_v32 = vadd.f32 -1.0, %v3927_v20  ;;  %v3913_v34 = vadd.f32 %v6017_v30, %v3897_v27  ;;  %v4917_v44 = vsel %vm4902_vm2, %v9146_v17, %v7665_v54  ;;  %v5976_v54 = vld [vmem:[%s8940_s8 + $0xc0] sm:$0xff]   ;;  %v3953_v1 = vmul.f32 %v8335_v8, %v7175_v62 }
 0xfb5   : > { %v3944_v41 = vadd.f32 -1.0, %v3928_v58  ;;  %5791 = vmatprep.subr.bf16.mxu0 %v5976_v54  ;;  %v3954_v21 = vmul.f32 %v8335_v8, %v7185_v15  ;;  %v8346_v46 = vrot.slane %v5311_v42, %v9148_v0  ;;  %v3993_v6 = vmul.f32 %v8338_v57, %v7699_v48  ;;  %v9157_v0 = vld [vmem:[#allocation84_spill] sm:$0xff] }
 0xfb6   : > { %v8299_v49 = vsel %vm4919_vm3, %v4916_v9, %v3943_v32  ;;  %v3929_v4 = vmul.f32 0.025, %v3913_v34  ;;  %5792 = vmatpush3.bf16.msra.mxu0 %v5976_v54  ;;  %v3994_v59 = vmul.f32 %v8338_v57, %v7721_v22  ;;  %v3973_v62 = vadd.f32 %v8351_v26, %v3953_v1  ;;  %v9151_v22 = vld [vmem:[#allocation78_spill] sm:$0xff] }
 0xfb7   : > { %4067 = vperm.xlu1 %5907, %v3938_v53   ;;  %v8305_v24 = vsel %vm4919_vm3, %v4917_v44, %v3944_v41  ;;  %v5977_v53 = vld [vmem:[%s8940_s8 + $0xc8] sm:$0xff]   ;;  %v3974_v56 = vadd.f32 %v8351_v26, %v3954_v21  ;;  %v3955_v7 = vmul.f32 %v8335_v8, %v9149_v23  ;;  %v3956_v11 = vmul.f32 %v8335_v8, %v9150_v12  ;;  %v9156_v1 = vld [vmem:[#allocation66_spill] sm:$0xff]  ;;  %v9160_v23 = vld [vmem:[#allocation80_spill] sm:$0xff] }
 0xfb8   : > { %v3945_v45 = vadd.f32 -1.0, %v3929_v4  ;;  %4097 = vperm.xlu0 %5908, %v3944_v41   ;;  %5793 = vmatprep.subr.bf16.mxu0 %v5977_v53  ;;  %v4009_v39 = vadd.f32 %v3993_v6, %v3973_v62  ;;  %v3995_v20 = vmul.f32 %v8338_v57, %v9151_v22  ;;  %v3996_v25 = vmul.f32 %v8338_v57, %v9152_v14 }
 0xfb9   : > { %v4010_v47 = vadd.f32 %v3994_v59, %v3974_v56  ;;  %v3975_v58 = vadd.f32 %v8351_v26, %v3955_v7  ;;  %v3976_v34 = vadd.f32 %v8351_v26, %v3956_v11  ;;  %v3959_v21 = vmul.f32 %v8335_v8, %v9156_v1 }
 0xfba   : > { %v8311_v37 = vsel %vm4919_vm3, %v4918_v40, %v3945_v45  ;;  %5794 = vmatpush3.bf16.msra.mxu0 %v5977_v53  ;;  %v9153_v53 = vld [vmem:[#allocation69_spill] sm:$0xff]  ;;  %v4000_v6 = vmul.f32 %v8338_v57, %v9157_v0  ;;  %v3999_v7 = vmul.f32 %v8338_v57, %v9160_v23 }
 0xfbb   : > { %4072 = vperm.xlu1 %5907, %v3939_v63   ;;  %5795 = vmatprep.subr.bf16.mxu0 %v5978_v33  ;;  %v5979_v63 = vld [vmem:[%s8940_s8 + $0xd8] sm:$0xff]   ;;  %v4011_v41 = vadd.f32 %v3995_v20, %v3975_v58  ;;  %v4012_v4 = vadd.f32 %v3996_v25, %v3976_v34 }
 0xfbe   : > { %5796 = vmatpush3.bf16.msra.mxu0 %v5978_v33  ;;  %v3960_v33 = vmul.f32 %v8335_v8, %v9153_v53 }
 0xfbf   : > { %4082 = vperm.xlu1 %5907, %v3941_v50   ;;  %5797 = vmatprep.subr.bf16.mxu0 %v5979_v63 }
 0xfc0   : > { %v3980_v12 = vadd.f32 %v8351_v26, %v3960_v33 }
 0xfc2   : > { %5798 = vmatpush3.bf16.msra.mxu0 %v5979_v63  ;;  %v9154_v63 = vld [vmem:[#allocation67_spill] sm:$0xff]  ;;  %v4016_v22 = vadd.f32 %v4000_v6, %v3980_v12 }
 0xfc3   : > { %4092 = vperm.xlu1 %5907, %v3943_v32   ;;  %5799 = vmatprep.subr.bf16.mxu0 %v5980_v18 }
 0xfc6   : > { %5800 = vmatpush3.bf16.msra.mxu0 %v5980_v18  ;;  %v3957_v18 = vmul.f32 %v8335_v8, %v9154_v63  ;;  %v9165_v63 = vld [vmem:[#allocation72_spill] sm:$0xff] }
 0xfc7   : > { %4102 = vperm.xlu1 %5907, %v3945_v45   ;;  %5801 = vmatprep.subr.bf16.mxu0 %v5981_v16 }
 0xfca   : > { %5802 = vmatpush3.bf16.msra.mxu0 %v5981_v16  ;;  %v9155_v16 = vld [vmem:[#allocation68_spill] sm:$0xff] }
 0xfcb   : > { %v3958_v42 = vmul.f32 %v8335_v8, %v9155_v16 }
0x100e   : > { %v4028_v50 = vpop.permute.xlu1 %4027 }
0x100f   : > { %v4109_v15 = vmul.f32 %v8346_v46, %v4028_v50  ;;  %v9158_v50 = vld [vmem:[#allocation81_spill] sm:$0xff] }
0x1010   : > { %v3997_v62 = vmul.f32 %v8338_v57, %v9158_v50 }
0x1011   : > { %v4033_v28 = vpop.permute.xlu0 %4032  ;;  %v4125_v27 = vadd.f32 %v4109_v15, %v4009_v39  ;;  %v9159_v15 = vld [vmem:[#allocation82_spill] sm:$0xff] }
0x1012   : > { %v4110_v48 = vmul.f32 %v8346_v46, %v4033_v28  ;;  %v4038_v38 = vpop.permute.xlu1 %4037  ;;  %v3998_v56 = vmul.f32 %v8338_v57, %v9159_v15  ;;  %v3977_v28 = vadd.f32 %v8351_v26, %v3957_v18  ;;  %v3964_v18 = vmul.f32 %v8335_v8, %v9165_v63  ;;  %v9168_v15 = vld [vmem:[#allocation87_spill] sm:$0xff] }
0x1013   : > { %v4111_v30 = vmul.f32 %v8346_v46, %v4038_v38 }
0x1014   : > { %v4126_v32 = vadd.f32 %v4110_v48, %v4010_v47  ;;  %v3978_v47 = vadd.f32 %v8351_v26, %v3958_v42  ;;  %v3979_v48 = vadd.f32 %v8351_v26, %v3959_v21  ;;  %v4013_v14 = vadd.f32 %v3997_v62, %v3977_v28  ;;  %v9166_v42 = vld [vmem:[#allocation73_spill] sm:$0xff] }
0x1015   : > { %v4127_v44 = vadd.f32 %v4111_v30, %v4011_v41  ;;  %v9161_v30 = vld [vmem:[#allocation70_spill] sm:$0xff]  ;;  %v3963_v1 = vmul.f32 %v8335_v8, %v9166_v42 }
0x1016   : > { %v4043_v43 = vpop.permute.xlu1 %4042  ;;  %v4141_v9 = vpack.c.bf16 %v4126_v32, %v4125_v27  ;;  %v4014_v25 = vadd.f32 %v3998_v56, %v3978_v47  ;;  %v4015_v32 = vadd.f32 %v3999_v7, %v3979_v48  ;;  %v3962_v34 = vmul.f32 %v8335_v8, %v9161_v30 }
0x1017   : > { %v4112_v17 = vmul.f32 %v8346_v46, %v4043_v43  ;;  %v9162_v43 = vld [vmem:[#allocation71_spill] sm:$0xff]  ;;  %v4003_v56 = vmul.f32 %v8338_v57, %v9168_v15 }
0x1018   : > { %5775 = vmatprep.mubr.bf16.mxu1 %v4141_v9  ;;  %v3961_v9 = vmul.f32 %v8335_v8, %v9162_v43  ;;  %v3982_v6 = vadd.f32 %v8351_v26, %v3962_v34  ;;  %v9172_v34 = vld [vmem:[#allocation89_spill] sm:$0xff] }
0x1019   : > { %v4128_v45 = vadd.f32 %v4112_v17, %v4012_v4  ;;  %v4005_v43 = vmul.f32 %v8338_v57, %v9172_v34  ;;  %v9179_v34 = vld [vmem:[#allocation22_spill] sm:$0xff] }
0x101a   : > { %v3981_v21 = vadd.f32 %v8351_v26, %v3961_v9 }
0x101b   : > { %v4142_v13 = vpack.c.bf16 %v4128_v45, %v4127_v44 }
0x101d   : > { %5776 = vmatmul.mubr.bf16.vlgmr.msra.gmra.mrb[104].mxu1 %v4142_v13  ;;  %v9163_v13 = vld [vmem:[#allocation83_spill] sm:$0xff] }
0x1026   : > { %v4058_v40 = vpop.permute.xlu1 %4057 }
0x1027   : > { %v4115_v38 = vmul.f32 %v8346_v46, %v4058_v40  ;;  %v4002_v40 = vmul.f32 %v8338_v57, %v9163_v13 }
0x1029   : > { %v4131_v17 = vadd.f32 %v4115_v38, %v4015_v32  ;;  %v4018_v7 = vadd.f32 %v4002_v40, %v3982_v6  ;;  %v3984_v38 = vadd.f32 %v8351_v26, %v3964_v18  ;;  %v9174_v40 = vld [vmem:[#allocation77_spill] sm:$0xff]  ;;  %v9175_v18 = vld [vmem:[#allocation90_spill] sm:$0xff] }
0x102a   : > { %v4048_v54 = vpop.permute.xlu1 %4047 }
0x102b   : > { %v4113_v39 = vmul.f32 %v8346_v46, %v4048_v54  ;;  %v9164_v54 = vld [vmem:[#allocation86_spill] sm:$0xff] }
0x102c   : > { %v4001_v53 = vmul.f32 %v8338_v57, %v9164_v54  ;;  %v3968_v54 = vmul.f32 %v8335_v8, %v9174_v40 }
0x102d   : > { %v4129_v41 = vadd.f32 %v4113_v39, %v4013_v14  ;;  %v9170_v39 = vld [vmem:[#allocation75_spill] sm:$0xff] }
0x102e   : > { %v4063_v59 = vpop.permute.xlu1 %4062  ;;  %v4017_v23 = vadd.f32 %v4001_v53, %v3981_v21  ;;  %v3966_v47 = vmul.f32 %v8335_v8, %v9170_v39 }
0x102f   : > { %v4116_v11 = vmul.f32 %v8346_v46, %v4063_v59  ;;  %v4078_v44 = vpop.permute.xlu0 %4077  ;;  %v9167_v59 = vld [vmem:[#allocation85_spill] sm:$0xff] }
0x1030   : > { %v4004_v50 = vmul.f32 %v8338_v57, %v9167_v59 }
0x1031   : > { %v4132_v58 = vadd.f32 %v4116_v11, %v4016_v22  ;;  %v9169_v11 = vld [vmem:[#allocation74_spill] sm:$0xff]  ;;  %v3983_v22 = vadd.f32 %v8351_v26, %v3963_v1 }
0x1032   : > { %v4053_v20 = vpop.permute.xlu1 %4052  ;;  %v3965_v28 = vmul.f32 %v8335_v8, %v9169_v11 }
0x1033   : > { %v4114_v27 = vmul.f32 %v8346_v46, %v4053_v20  ;;  %v4144_v16 = vpack.c.bf16 %v4132_v58, %v4131_v17  ;;  %v4088_v48 = vpop.permute.xlu0 %4087  ;;  %v4119_v20 = vmul.f32 %v8346_v46, %v4078_v44  ;;  %v4020_v58 = vadd.f32 %v4004_v50, %v3984_v38  ;;  %v9173_v17 = vld [vmem:[#allocation76_spill] sm:$0xff] }
0x1034   : > { %v4019_v9 = vadd.f32 %v4003_v56, %v3983_v22  ;;  %v3985_v13 = vadd.f32 %v8351_v26, %v3965_v28  ;;  %v3986_v44 = vadd.f32 %v8351_v26, %v3966_v47  ;;  %v5982_v22 = vld [vmem:[%s8940_s8 + $0xf0] sm:$0xff]  }
0x1035   : > { %v4130_v4 = vadd.f32 %v4114_v27, %v4014_v25  ;;  %v9171_v27 = vld [vmem:[#allocation88_spill] sm:$0xff]  ;;  %5803 = vmatprep.subr.bf16.mxu0 %v5982_v22 }
0x1036   : > { %v4068_v45 = vpop.permute.xlu1 %4067  ;;  %v4006_v32 = vmul.f32 %v8338_v57, %v9171_v27  ;;  %v4135_v53 = vadd.f32 %v4119_v20, %v4019_v9  ;;  %v4021_v59 = vadd.f32 %v4005_v43, %v3985_v13  ;;  %5804 = vmatpush3.bf16.msra.mxu0 %v5982_v22  ;;  %v6018_v20 = vld [vmem:[%s8938_s6] sm:$0xf] }
0x1037   : > { %v4143_v33 = vpack.c.bf16 %v4130_v4, %v4129_v41  ;;  %v4117_v0 = vmul.f32 %v8346_v46, %v4068_v45  ;;  %v3967_v45 = vmul.f32 %v8335_v8, %v9173_v17  ;;  %v4098_v42 = vpop.permute.xlu0 %4097 }
0x1038   : > { %v4022_v1 = vadd.f32 %v4006_v32, %v3986_v44  ;;  %v4123_v56 = vmul.f32 %v8346_v46, %v4098_v42  ;;  %v9178_v32 = vld [vmem:[#allocation18_spill] sm:$0xff]  ;;  %v9181_v42 = vld [vmem:[#allocation28_spill] sm:$0xff] }
0x1039   : > { %5779 = vmatprep.mubr.bf16.mxu1 %v4143_v33  ;;  %v4133_v14 = vadd.f32 %v4117_v0, %v4017_v23  ;;  %v4121_v33 = vmul.f32 %v8346_v46, %v4088_v48  ;;  %v9176_v0 = vld [vmem:[#allocation91_spill] sm:$0xff]  ;;  %v3987_v8 = vadd.f32 %v8351_v26, %v3967_v45 }
0x103a   : > { %v4073_v62 = vpop.permute.xlu1 %4072  ;;  %5780 = vmatmul.mubr.bf16.gmra.mrb[108].mxu1 %v4144_v16  ;;  %v4008_v16 = vmul.f32 %v8338_v57, %v9175_v18  ;;  %v4007_v6 = vmul.f32 %v8338_v57, %v9176_v0 }
0x103b   : > { %v4118_v12 = vmul.f32 %v8346_v46, %v4073_v62  ;;  %v4137_v15 = vadd.f32 %v4121_v33, %v4021_v59  ;;  %v9183_v59 = vld [vmem:[#allocation30_spill] sm:$0xff] }
0x103c   : > { %v4023_v11 = vadd.f32 %v4007_v6, %v3987_v8 }
0x103d   : > { %v4134_v25 = vadd.f32 %v4118_v12, %v4018_v7  ;;  %v3988_v7 = vadd.f32 %v8351_v26, %v3968_v54  ;;  %v5983_v26 = vld [vmem:[%s8940_s8 + $0xf8] sm:$0xff]  }
0x103e   : > { %v4083_v30 = vpop.permute.xlu1 %4082  ;;  %v4139_v57 = vadd.f32 %v4123_v56, %v4023_v11  ;;  %5805 = vmatprep.subr.bf16.mxu0 %v5983_v26 }
0x103f   : > { %v4120_v41 = vmul.f32 %v8346_v46, %v4083_v30  ;;  %v4145_v4 = vpack.c.bf16 %v4134_v25, %v4133_v14  ;;  %v4024_v28 = vadd.f32 %v4008_v16, %v3988_v7  ;;  %5806 = vmatpush3.bf16.msra.mxu0 %v5983_v26  ;;  %v9177_v25 = vld [vmem:[#allocation21_spill] sm:$0xff]  ;;  %v9185_v26 = vld [vmem:[#allocation36_spill] sm:$0xff] }
0x1041   : > { %v4136_v63 = vadd.f32 %v4120_v41, %v4020_v58  ;;  %5783 = vmatprep.mubr.bf16.mxu1 %v4145_v4 }
0x1042   : > { %v4093_v21 = vpop.permute.xlu1 %4092 }
0x1043   : > { %v4122_v50 = vmul.f32 %v8346_v46, %v4093_v21  ;;  %v4146_v62 = vpack.c.bf16 %v4136_v63, %v4135_v53  ;;  %v9182_v21 = vld [vmem:[#allocation24_spill] sm:$0xff] }
0x1045   : > { %v4138_v23 = vadd.f32 %v4122_v50, %v4022_v1  ;;  %5784 = vmatmul.mubr.bf16.gmra.mrb[112].mxu1 %v4146_v62 }
0x1046   : > { %v4103_v12 = vpop.permute.xlu1 %4102 }
0x1047   : > { %v4124_v39 = vmul.f32 %v8346_v46, %v4103_v12  ;;  %v4147_v47 = vpack.c.bf16 %v4138_v23, %v4137_v15  ;;  %v1255_v46 = vsub.s32 3, %v6621_v5  ;;  %v9180_v5 = vld [vmem:[#allocation20_spill] sm:$0xff]  ;;  %v9184_v15 = vld [vmem:[#allocation26_spill] sm:$0xff] }
0x1049   : > { %v4140_v48 = vadd.f32 %v4124_v39, %v4024_v28  ;;  %5787 = vmatprep.mubr.bf16.mxu1 %v4147_v47  ;;  %v8455_v14 = vrot.slane %v6018_v20, %v1255_v46  ;;  %v9186_v20 = vld [vmem:[#allocation32_spill] sm:$0xff] }
0x104b   : > { %v4148_v38 = vpack.c.bf16 %v4140_v48, %v4139_v57  ;;  %v1485_v27 = vadd.f32 %v9177_v25, %v8455_v14  ;;  %v1475_v58 = vadd.f32 %v9178_v32, %v8455_v14  ;;  %v1489_v43 = vadd.f32 %v9179_v34, %v8455_v14  ;;  %v9187_v32 = vld [vmem:[#allocation38_spill] sm:$0xff] }
0x104c   : > { %v1479_v4 = vadd.f32 %v9180_v5, %v8455_v14  ;;  %v1505_v1 = vadd.f32 %v9181_v42, %v8455_v14  ;;  %v1495_v0 = vadd.f32 %v9182_v21, %v8455_v14  ;;  %v1509_v50 = vadd.f32 %v9183_v59, %v8455_v14  ;;  %v9191_v21 = vld [vmem:[#allocation46_spill] sm:$0xff] }
0x104d   : > { %5788 = vmatmul.mubr.bf16.gmra.mrb[116].mxu1 %v4148_v38  ;;  %v1499_v56 = vadd.f32 %v9184_v15, %v8455_v14  ;;  %v1525_v46 = vadd.f32 %v9185_v26, %v8455_v14  ;;  %v1515_v25 = vadd.f32 %v9186_v20, %v8455_v14 }
0x10f0   : > { %v5777_v30 = vpop.f32.mrb[104].mxu1 }
0x10f1   : > { %v4313_v9 = vadd.f32 %v5777_v30, %v1485_v27  ;;  %v4248_v41 = vpop.f32.mrb[105].mxu1 }
0x10f2   : > { %v4311_v17 = vadd.f32 %v4248_v41, %v1475_v58  ;;  %v5778_v45 = vpop.f32.mrb[106].mxu1  ;;  %v1529_v58 = vadd.f32 %v9187_v32, %v8455_v14  ;;  %v4519_v32 = vld [vmem:[%s6464_s18 + $0x38] sm:$0xff] }
0x10f3   : > { %v4314_v13 = vadd.f32 %v5778_v45, %v1489_v43  ;;  %v4251_v44 = vpop.f32.mrb[107].mxu1  ;;  %v4329_v54 = vmax.f32 %v4313_v9, 0.0  ;;  %v9188_v43 = vld [vmem:[#allocation34_spill] sm:$0xff] }
0x10f4   : > { %v4312_v40 = vadd.f32 %v4251_v44, %v1479_v4  ;;  %v4327_v33 = vmax.f32 %v4311_v17, 0.0  ;;  %v1519_v9 = vadd.f32 %v9188_v43, %v8455_v14 }
0x10f5   : > { %v4330_v53 = vmax.f32 %v4314_v13, 0.0 }
0x10f6   : > { %v4328_v63 = vmax.f32 %v4312_v40, 0.0 }
0x10f7   : > { %v4344_v18 = vpack.c.bf16 %v4330_v53, %v4329_v54  ;;  %v9189_v53 = vld [vmem:[#allocation44_spill] sm:$0xff] }
0x10f8   : > { %v4343_v16 = vpack.c.bf16 %v4328_v63, %v4327_v33  ;;  %v1545_v33 = vadd.f32 %v9189_v53, %v8455_v14 }
0x10fa   : > { %5807 = vmatprep.mubr.bf16.mxu0 %v4343_v16 }
0x10fb   : > { %5808 = vmatmul.mubr.bf16.vlgmr.msra.gmra.mrb[104].mxu0 %v4344_v18  ;;  %v9190_v18 = vld [vmem:[#allocation40_spill] sm:$0xff] }
0x10fc   : > { %v1535_v16 = vadd.f32 %v9190_v18, %v8455_v14  ;;  %v4522_v18 = vld [vmem:[%s6464_s18 + $0x98] sm:$0xff] }
0x110d   : > { %v5781_v6 = vpop.f32.mrb[108].mxu1 }
0x110e   : > { %v4317_v62 = vadd.f32 %v5781_v6, %v1505_v1  ;;  %v4264_v8 = vpop.f32.mrb[109].mxu1 }
0x110f   : > { %v4315_v23 = vadd.f32 %v4264_v8, %v1495_v0  ;;  %v5782_v7 = vpop.f32.mrb[110].mxu1  ;;  %v1549_v0 = vadd.f32 %v9191_v21, %v8455_v14 }
0x1110   : > { %v4318_v12 = vadd.f32 %v5782_v7, %v1509_v50  ;;  %v4267_v11 = vpop.f32.mrb[111].mxu1  ;;  %v4333_v39 = vmax.f32 %v4317_v62, 0.0  ;;  %v9192_v50 = vld [vmem:[#allocation42_spill] sm:$0xff] }
0x1111   : > { %v4316_v28 = vadd.f32 %v4267_v11, %v1499_v56  ;;  %v4331_v57 = vmax.f32 %v4315_v23, 0.0  ;;  %v1539_v62 = vadd.f32 %v9192_v50, %v8455_v14  ;;  %v8492_v14 = vld [vmem:[%s8941_s9 + $0x3] ss:$0 sm:$0xff] }
0x1112   : > { %v4334_v47 = vmax.f32 %v4318_v12, 0.0 }
0x1113   : > { %v4332_v48 = vmax.f32 %v4316_v28, 0.0 }
0x1114   : > { %v4346_v38 = vpack.c.bf16 %v4334_v47, %v4333_v39 }
0x1115   : > { %v4345_v22 = vpack.c.bf16 %v4332_v48, %v4331_v57 }
0x1117   : > { %5811 = vmatprep.mubr.bf16.mxu0 %v4345_v22 }
0x1118   : > { %v5785_v27 = vpop.f32.mrb[112].mxu1  ;;  %5812 = vmatmul.mubr.bf16.gmra.mrb[108].mxu0 %v4346_v38  ;;  %v4520_v38 = vld [vmem:[%s6464_s18 + $0x58] sm:$0xff] }
0x1119   : > { %v4321_v30 = vadd.f32 %v5785_v27, %v1525_v46  ;;  %v4280_v34 = vpop.f32.mrb[113].mxu1 }
0x111a   : > { %v4319_v41 = vadd.f32 %v4280_v34, %v1515_v25  ;;  %v5786_v5 = vpop.f32.mrb[114].mxu1 }
0x111b   : > { %v4322_v4 = vadd.f32 %v5786_v5, %v1529_v58  ;;  %v4283_v17 = vpop.f32.mrb[115].mxu1  ;;  %v4337_v13 = vmax.f32 %v4321_v30, 0.0  ;;  %v4518_v58 = vld [vmem:[%s6464_s18 + $0x18] sm:$0xff] }
0x111c   : > { %v4320_v45 = vadd.f32 %v4283_v17, %v1519_v9  ;;  %v4335_v40 = vmax.f32 %v4319_v41, 0.0  ;;  %v4521_v41 = vld [vmem:[%s6464_s18 + $0x78] sm:$0xff] }
0x111d   : > { %v4338_v44 = vmax.f32 %v4322_v4, 0.0  ;;  %v4524_v17 = vld [vmem:[%s6464_s18 + $0xd8] sm:$0xff] }
0x111e   : > { %v4336_v54 = vmax.f32 %v4320_v45, 0.0 }
0x111f   : > { %v4348_v63 = vpack.c.bf16 %v4338_v44, %v4337_v13 }
0x1120   : > { %v4347_v42 = vpack.c.bf16 %v4336_v54, %v4335_v40  ;;  %v5789_v1 = vpop.f32.mrb[116].mxu1  ;;  %v4525_v40 = vld [vmem:[%s6464_s18 + $0xf8] sm:$0xff] }
0x1121   : > { %v4325_v6 = vadd.f32 %v5789_v1, %v1545_v33  ;;  %v4296_v59 = vpop.f32.mrb[117].mxu1  ;;  %v4523_v1 = vld [vmem:[%s6464_s18 + $0xb8] sm:$0xff] }
0x1122   : > { %v4323_v8 = vadd.f32 %v4296_v59, %v1535_v16  ;;  %v5790_v15 = vpop.f32.mrb[118].mxu1  ;;  %5815 = vmatprep.mubr.bf16.mxu0 %v4347_v42  ;;  %v4528_v59 = vld [vmem:[%s6464_s18 + $0x158] sm:$0xff] }
0x1123   : > { %v4326_v56 = vadd.f32 %v5790_v15, %v1549_v0  ;;  %v4299_v23 = vpop.f32.mrb[119].mxu1  ;;  %5816 = vmatmul.mubr.bf16.gmra.mrb[112].mxu0 %v4348_v63  ;;  %v4341_v12 = vmax.f32 %v4325_v6, 0.0  ;;  %v4529_v15 = vld [vmem:[%s6464_s18 + $0x178] sm:$0xff] }
0x1124   : > { %v4324_v7 = vadd.f32 %v4299_v23, %v1539_v62  ;;  %v4339_v28 = vmax.f32 %v4323_v8, 0.0 }
0x1125   : > { %v4342_v11 = vmax.f32 %v4326_v56, 0.0 }
0x1126   : > { %v4340_v39 = vmax.f32 %v4324_v7, 0.0 }
0x1127   : > { %v4350_v47 = vpack.c.bf16 %v4342_v11, %v4341_v12  ;;  %v4526_v11 = vld [vmem:[%s6464_s18 + $0x118] sm:$0xff] }
0x1128   : > { %v4349_v57 = vpack.c.bf16 %v4340_v39, %v4339_v28 }
0x112a   : > { %5819 = vmatprep.mubr.bf16.mxu0 %v4349_v57 }
0x112b   : > { %5820 = vmatmul.mubr.bf16.gmra.mrb[116].mxu0 %v4350_v47  ;;  %v4527_v47 = vld [vmem:[%s6464_s18 + $0x138] sm:$0xff] }
0x11ce   : > { %v5809_v48 = vpop.f32.mrb[104].mxu0 }
0x11cf   : > { %v4464_v22 = vadd.f32 %v5809_v48, %v8492_v14  ;;  %v4455_v26 = vpop.f32.mrb[105].mxu0 }
0x11d0   : > { %v5810_v46 = vpop.f32.mrb[106].mxu0  ;;  %v4456_v25 = vadd.f32 %v8492_v14, %v4455_v26  ;;  %v4530_v26 = vld [vmem:[%s6464_s18 + $0x198] sm:$0xff] }
0x11d1   : > { %v8496_v20 = vadd.f32 %v4520_v38, %v4464_v22  ;;  %v4458_v27 = vpop.f32.mrb[107].mxu0  ;;  %v4467_v9 = vadd.f32 %v5810_v46, %v8492_v14 }
0x11d2   : > { %v4459_v30 = vadd.f32 %v8492_v14, %v4458_v27  ;;  %v8505_v43 = vadd.f32 %v4518_v58, %v4456_v25 }
0x11d3   : > { %4554 = vmax.xlane.f32.xlu0 %v8496_v20  ;;  %v8511_v5 = vadd.f32 %v4521_v41, %v4467_v9  ;;  %v4532_v41 = vld [vmem:[%s6464_s18 + $0x1d8] sm:$0xff] }
0x11d4   : > { %v8503_v34 = vadd.f32 %v4519_v32, %v4459_v30  ;;  %v4531_v32 = vld [vmem:[%s6464_s18 + $0x1b8] sm:$0xff] }
0x11d6   : > { %4552 = vmax.xlane.f32.xlu1 %v8503_v34 }
0x11d7   : > { %4550 = vmax.xlane.f32.xlu0 %v8505_v43 }
0x11db   : > { %4556 = vmax.xlane.f32.xlu0 %v8511_v5 }
0x11eb   : > { %v5813_v4 = vpop.f32.mrb[108].mxu0 }
0x11ec   : > { %v4480_v45 = vadd.f32 %v5813_v4, %v8492_v14  ;;  %v4471_v13 = vpop.f32.mrb[109].mxu0 }
0x11ed   : > { %v5814_v44 = vpop.f32.mrb[110].mxu0  ;;  %v4472_v53 = vadd.f32 %v8492_v14, %v4471_v13 }
0x11ee   : > { %v8517_v54 = vadd.f32 %v4524_v17, %v4480_v45  ;;  %v4483_v33 = vadd.f32 %v5814_v44, %v8492_v14  ;;  %v4474_v63 = vpop.f32.mrb[111].mxu0  ;;  %v4533_v45 = vld [vmem:[%s6464_s18 + $0x1f8] sm:$0xff]  ;;  %s5129_s18 = sshll.u32 %s6461_s3, 7 }
0x11ef   : > { %v4475_v42 = vadd.f32 %v8492_v14, %v4474_v63  ;;  %v8527_v21 = vadd.f32 %v4522_v18, %v4472_v53  ;;  %v9193_v53 = vld [vmem:[#allocation47_spill] sm:$0xff]  ;;  %s8792_s24 = scalar_lea.vmem [#allocation8], %s5129_s18 }
0x11f0   : > { %v8522_v16 = vadd.f32 %v4525_v40, %v4483_v33  ;;  %4562 = vmax.xlane.f32.xlu1 %v8517_v54  ;;  %s5000_s22 = sshll.u32 %s8792_s24, 4  ;;  %s8883_s22 = int_to_ptr.vmem [resolvable:$true] %s5000_s22 }
0x11f1   : > { %v8530_v0 = vadd.f32 %v4523_v1, %v4475_v42  ;;  %s6121_s20 = scalar_lea.vmem %s8883_s22, 2048  ;;  %p6128_p5 = scmp.lt.s32.totalorder %s8883_s22, %s6126_s11 }
0x11f2   : > { %4564 = vmax.xlane.f32.xlu0 %v8522_v16  ;;  %p6122_p1 = scmp.ne.s32.totalorder %s8883_s22, %s6121_s20  ;;  %p6129_p11 = scmp.lt.s32.totalorder %s6127_s29, %s6121_s20 }
0x11f4   : > { %4558 = vmax.xlane.f32.xlu1 %v8527_v21  ;;  %p6123_p4 = pnand %p6122_p1, %p9196_p0  ;;  %p6130_p12 = por %p6129_p11, %p6128_p5 }
0x11f6   : > { %4560 = vmax.xlane.f32.xlu0 %v8530_v0  ;;  %v5817_v6 = vpop.f32.mrb[112].mxu0  ;;  %p6124_p2 = pneg %p6123_p4 }
0x11f7   : > { %v4496_v50 = vadd.f32 %v5817_v6, %v8492_v14  ;;  %v4487_v62 = vpop.f32.mrb[113].mxu0 }
0x11f8   : > { %v5818_v8 = vpop.f32.mrb[114].mxu0  ;;  %v4488_v23 = vadd.f32 %v8492_v14, %v4487_v62  ;;  %p6131_p3 = pnand %p6130_p12, %p6124_p2 }
0x11f9   : > { %v8537_v56 = vadd.f32 %v4528_v59, %v4496_v50  ;;  %v4499_v7 = vadd.f32 %v5818_v8, %v8492_v14  ;;  %v4490_v12 = vpop.f32.mrb[115].mxu0 }
0x11fa   : > { %v4491_v39 = vadd.f32 %v8492_v14, %v4490_v12  ;;  %v8547_v57 = vadd.f32 %v4526_v11, %v4488_v23 }
0x11fb   : > { %v8542_v28 = vadd.f32 %v4529_v15, %v4499_v7  ;;  %4570 = vmax.xlane.f32.xlu1 %v8537_v56 }
0x11fc   : > { %v8550_v38 = vadd.f32 %v4527_v47, %v4491_v39 }
0x11fd   : > { %4572 = vmax.xlane.f32.xlu0 %v8542_v28 }
0x11fe   : > { %v5821_v48 = vpop.f32.mrb[116].mxu0 }
0x11ff   : > { %4566 = vmax.xlane.f32.xlu1 %v8547_v57  ;;  %v4503_v22 = vpop.f32.mrb[117].mxu0  ;;  %v4512_v58 = vadd.f32 %v5821_v48, %v8492_v14 }
0x1200   : > { %v4504_v46 = vadd.f32 %v8492_v14, %v4503_v22  ;;  %v5822_v25 = vpop.f32.mrb[118].mxu0 }
0x1201   : > { %4568 = vmax.xlane.f32.xlu0 %v8550_v38  ;;  %v4506_v27 = vpop.f32.mrb[119].mxu0  ;;  %v4515_v4 = vadd.f32 %v5822_v25, %v8492_v14  ;;  %v8567_v13 = vadd.f32 %v4532_v41, %v4512_v58 }
0x1202   : > { %v8558_v30 = vadd.f32 %v4530_v26, %v4504_v46  ;;  %v4507_v9 = vadd.f32 %v8492_v14, %v4506_v27 }
0x1203   : > { %v8570_v44 = vadd.f32 %v4533_v45, %v4515_v4 }
0x1204   : > { %v8563_v17 = vadd.f32 %v4531_v32, %v4507_v9  ;;  %4574 = vmax.xlane.f32.xlu1 %v8558_v30 }
0x1206   : > { %4576 = vmax.xlane.f32.xlu0 %v8563_v17 }
0x1208   : > { %4578 = vmax.xlane.f32.xlu1 %v8567_v13 }
0x120a   : > { %4580 = vmax.xlane.f32.xlu0 %v8570_v44 }
0x1260   : > { %v4555_v40 = vpop.xlane.xlu0 %4554 }
0x1261   : > { %vm4584_vm4 = vcmp.ge.f32.partialorder %v8496_v20, %v4555_v40 }
0x1262   : > { %v8576_v14 = vsel %vm4584_vm4, %v9193_v53, 128 }
0x1263   : > { %v4643_v33 = vshra.s32 %v8576_v14, 16  ;;  %v4553_v63 = vpop.xlane.xlu1 %4552 }
0x1264   : > { %v4551_v18 = vpop.xlane.xlu0 %4550  ;;  %vm4583_vm6 = vcmp.ge.f32.partialorder %v8503_v34, %v4553_v63 }
0x1265   : > { %v8579_v42 = vcvt.s32.f32 %v4643_v33  ;;  %vm4582_vm5 = vcmp.ge.f32.partialorder %v8505_v43, %v4551_v18  ;;  %v8592_v50 = vsel %vm4583_vm6, %v9193_v53, 128 }
0x1266   : > { %v8583_v1 = vsel %vm4582_vm5, %v9193_v53, 128  ;;  %v4629_v34 = vshra.s32 %v8592_v50, 16 }
0x1267   : > { %v4615_v6 = vshra.s32 %v8583_v1, 16  ;;  %4646 = vmin.xlane.f32.xlu1 %v8579_v42 }
0x1268   : > { %v4557_v20 = vpop.xlane.xlu0 %4556  ;;  %v8603_v15 = vcvt.s32.f32 %v4629_v34 }
0x1269   : > { %v8588_v59 = vcvt.s32.f32 %v4615_v6  ;;  %vm4585_vm7 = vcmp.ge.f32.partialorder %v8511_v5, %v4557_v20 }
0x126a   : > { %v8595_v62 = vsel %vm4585_vm7, %v9193_v53, 128 }
0x126b   : > { %v4657_v43 = vshra.s32 %v8595_v62, 16  ;;  %4618 = vmin.xlane.f32.xlu1 %v8588_v59 }
0x126d   : > { %v8600_v8 = vcvt.s32.f32 %v4657_v43 }
0x126f   : > { %4660 = vmin.xlane.f32.xlu0 %v8600_v8 }
0x1273   : > { %4632 = vmin.xlane.f32.xlu0 %v8603_v15 }
0x127d   : > { %v4563_v5 = vpop.xlane.xlu1 %4562 }
0x127e   : > { %vm4588_vm8 = vcmp.ge.f32.partialorder %v8517_v54, %v4563_v5 }
0x127f   : > { %v8608_v23 = vsel %vm4588_vm8, %v9193_v53, 128  ;;  %v4565_v7 = vpop.xlane.xlu0 %4564 }
0x1280   : > { %v4699_v12 = vshra.s32 %v8608_v23, 16  ;;  %vm4589_vm9 = vcmp.ge.f32.partialorder %v8522_v16, %v4565_v7 }
0x1281   : > { %v8613_v11 = vsel %vm4589_vm9, %v9193_v53, 128  ;;  %v4559_v39 = vpop.xlane.xlu1 %4558 }
0x1282   : > { %v8615_v47 = vcvt.s32.f32 %v4699_v12  ;;  %v4713_v48 = vshra.s32 %v8613_v11, 16  ;;  %vm4586_vm10 = vcmp.ge.f32.partialorder %v8527_v21, %v4559_v39 }
0x1283   : > { %v4561_v22 = vpop.xlane.xlu0 %4560  ;;  %v8622_v26 = vsel %vm4586_vm10, %v9193_v53, 128 }
0x1284   : > { %v8619_v54 = vcvt.s32.f32 %v4713_v48  ;;  %vm4587_vm11 = vcmp.ge.f32.partialorder %v8530_v0, %v4561_v22  ;;  %4702 = vmin.xlane.f32.xlu1 %v8615_v47  ;;  %v4671_v16 = vshra.s32 %v8622_v26, 16 }
0x1285   : > { %v8628_v46 = vsel %vm4587_vm11, %v9193_v53, 128 }
0x1286   : > { %v4685_v25 = vshra.s32 %v8628_v46, 16  ;;  %4716 = vmin.xlane.f32.xlu0 %v8619_v54  ;;  %v8632_v21 = vcvt.s32.f32 %v4671_v16 }
0x1288   : > { %v8634_v27 = vcvt.s32.f32 %v4685_v25  ;;  %v4571_v32 = vpop.xlane.xlu1 %4570  ;;  %4674 = vmin.xlane.f32.xlu1 %v8632_v21 }
0x1289   : > { %vm4592_vm12 = vcmp.ge.f32.partialorder %v8537_v56, %v4571_v32 }
0x128a   : > { %v8639_v0 = vsel %vm4592_vm12, %v9193_v53, 128  ;;  %4688 = vmin.xlane.f32.xlu0 %v8634_v27  ;;  %v4573_v58 = vpop.xlane.xlu0 %4572 }
0x128b   : > { %v4755_v9 = vshra.s32 %v8639_v0, 16  ;;  %vm4593_vm13 = vcmp.ge.f32.partialorder %v8542_v28, %v4573_v58 }
0x128c   : > { %v8645_v41 = vsel %vm4593_vm13, %v9193_v53, 128  ;;  %v4567_v4 = vpop.xlane.xlu1 %4566 }
0x128d   : > { %v8647_v45 = vcvt.s32.f32 %v4755_v9  ;;  %v4769_v56 = vshra.s32 %v8645_v41, 16  ;;  %vm4590_vm14 = vcmp.ge.f32.partialorder %v8547_v57, %v4567_v4  ;;  %v4614_v4 = vand.u32 65535, %v8583_v1 }
0x128e   : > { %v4569_v40 = vpop.xlane.xlu0 %4568  ;;  %v8654_v63 = vsel %vm4590_vm14, %v9193_v53, 128 }
0x128f   : > { %v8651_v33 = vcvt.s32.f32 %v4769_v56  ;;  %vm4591_vm15 = vcmp.ge.f32.partialorder %v8550_v38, %v4569_v40  ;;  %4758 = vmin.xlane.f32.xlu1 %v8647_v45  ;;  %v4727_v28 = vshra.s32 %v8654_v63, 16  ;;  %v4616_v40 = vcvt.s32.f32 %v4614_v4 }
0x1290   : > { %v8660_v18 = vsel %vm4591_vm15, %v9193_v53, 128 }
0x1291   : > { %v4741_v6 = vshra.s32 %v8660_v18, 16  ;;  %v4575_v20 = vpop.xlane.xlu1 %4574  ;;  %4772 = vmin.xlane.f32.xlu0 %v8651_v33  ;;  %v8664_v57 = vcvt.s32.f32 %v4727_v28  ;;  %v4656_v28 = vand.u32 65535, %v8595_v62 }
0x1292   : > { %vm4594_vm0 = vcmp.ge.f32.partialorder %v8558_v30, %v4575_v20 }
0x1293   : > { %v8667_v43 = vcvt.s32.f32 %v4741_v6  ;;  %v8670_v38 = vsel %vm4594_vm0, %v9193_v53, 128  ;;  %v4577_v34 = vpop.xlane.xlu0 %4576  ;;  %4730 = vmin.xlane.f32.xlu1 %v8664_v57  ;;  %v4658_v1 = vcvt.s32.f32 %v4656_v28 }
0x1294   : > { %v4783_v5 = vshra.s32 %v8670_v38, 16  ;;  %vm4595_vm1 = vcmp.ge.f32.partialorder %v8563_v17, %v4577_v34 }
0x1295   : > { %v8676_v7 = vsel %vm4595_vm1, %v9193_v53, 128  ;;  %v4579_v12 = vpop.xlane.xlu1 %4578  ;;  %4744 = vmin.xlane.f32.xlu0 %v8667_v43 }
0x1296   : > { %v8679_v39 = vcvt.s32.f32 %v4783_v5  ;;  %v4797_v30 = vshra.s32 %v8676_v7, 16  ;;  %vm4596_vm2 = vcmp.ge.f32.partialorder %v8567_v13, %v4579_v12 }
0x1297   : > { %v4581_v48 = vpop.xlane.xlu0 %4580  ;;  %v8686_v16 = vsel %vm4596_vm2, %v9193_v53, 128 }
0x1298   : > { %v8683_v22 = vcvt.s32.f32 %v4797_v30  ;;  %vm4597_vm3 = vcmp.ge.f32.partialorder %v8570_v44, %v4581_v48  ;;  %4786 = vmin.xlane.f32.xlu1 %v8679_v39  ;;  %v4811_v17 = vshra.s32 %v8686_v16, 16  ;;  %v4642_v44 = vand.u32 65535, %v8576_v14 }
0x1299   : > { %v8692_v25 = vsel %vm4597_vm3, %v9193_v53, 128  ;;  %v4628_v14 = vand.u32 65535, %v8592_v50  ;;  %v4712_v50 = vand.u32 65535, %v8613_v11 }
0x129a   : > { %v4825_v32 = vshra.s32 %v8692_v25, 16  ;;  %4800 = vmin.xlane.f32.xlu0 %v8683_v22  ;;  %v8696_v13 = vcvt.s32.f32 %v4811_v17  ;;  %v4644_v9 = vcvt.s32.f32 %v4642_v44  ;;  %v4670_v17 = vand.u32 65535, %v8622_v26 }
0x129b   : > { %v4630_v5 = vcvt.s32.f32 %v4628_v14  ;;  %v4754_v26 = vand.u32 65535, %v8639_v0  ;;  %v4740_v0 = vand.u32 65535, %v8660_v18  ;;  %v4796_v18 = vand.u32 65535, %v8676_v7 }
0x129c   : > { %v8698_v58 = vcvt.s32.f32 %v4825_v32  ;;  %4814 = vmin.xlane.f32.xlu1 %v8696_v13  ;;  %v4684_v32 = vand.u32 65535, %v8628_v46  ;;  %v4672_v11 = vcvt.s32.f32 %v4670_v17 }
0x129e   : > { %4828 = vmin.xlane.f32.xlu0 %v8698_v58  ;;  %v4686_v4 = vcvt.s32.f32 %v4684_v32 }
0x12f4   : > { %v8704_v56 = vpop.xlane.xlu1 %4646 }
0x12f5   : > { %vm4648_vm4 = vcmp.eq.f32.partialorder %v8579_v42, %v8704_v56 }
0x12f6   : > { %v4649_v53 = vsel %vm4648_vm4, %v4644_v9, inf  ;;  %vm4936_vm4 = vcmask 23552  }
0x12f7   : > { %4650 = vmin.xlane.f32.xlu1 %v4649_v53  ;;  %v4768_v53 = vand.u32 65535, %v8645_v41 }
0x12f8   : > { %v8709_v6 = vpop.xlane.xlu1 %4618 }
0x12f9   : > { %vm4620_vm5 = vcmp.eq.f32.partialorder %v8588_v59, %v8709_v6  ;;  %v4698_v59 = vand.u32 65535, %v8608_v23 }
0x12fa   : > { %v4621_v20 = vsel %vm4620_vm5, %v4616_v40, inf  ;;  %v4756_v40 = vcvt.s32.f32 %v4754_v26  ;;  %vm4953_vm5 = vcmask 31744  }
0x12fb   : > { %4622 = vmin.xlane.f32.xlu1 %v4621_v20  ;;  %v4700_v30 = vcvt.s32.f32 %v4698_v59  ;;  %v4726_v20 = vand.u32 65535, %v8654_v63  ;;  %v4742_v63 = vcvt.s32.f32 %v4740_v0 }
0x12fc   : > { %v8714_v34 = vpop.xlane.xlu0 %4660 }
0x12fd   : > { %vm4662_vm6 = vcmp.eq.f32.partialorder %v8600_v8, %v8714_v34  ;;  %v4714_v8 = vcvt.s32.f32 %v4712_v50 }
0x12fe   : > { %v4663_v42 = vsel %vm4662_vm6, %v4658_v1, inf  ;;  %v4728_v1 = vcvt.s32.f32 %v4726_v20  ;;  %v6019_v20 = vld [vmem:[%s7066_s21 + $0x10] sm:$0xff] }
0x12ff   : > { %4664 = vmin.xlane.f32.xlu0 %v4663_v42  ;;  %v4782_v42 = vand.u32 65535, %v8670_v38  ;;  %v4810_v38 = vand.u32 65535, %v8686_v16 }
0x1300   : > { %v8718_v12 = vpop.xlane.xlu0 %4632 }
0x1301   : > { %vm4634_vm7 = vcmp.eq.f32.partialorder %v8603_v15, %v8718_v12  ;;  %v4784_v59 = vcvt.s32.f32 %v4782_v42 }
0x1302   : > { %v4635_v62 = vsel %vm4634_vm7, %v4630_v5, inf }
0x1303   : > { %4636 = vmin.xlane.f32.xlu0 %v4635_v62 }
0x1311   : > { %v8724_v48 = vpop.xlane.xlu1 %4702 }
0x1312   : > { %vm4704_vm8 = vcmp.eq.f32.partialorder %v8615_v47, %v8724_v48 }
0x1313   : > { %v8730_v44 = vpop.xlane.xlu0 %4716  ;;  %v4705_v15 = vsel %vm4704_vm8, %v4700_v30, inf  ;;  %v4824_v30 = vand.u32 65535, %v8692_v25 }
0x1314   : > { %vm4718_vm9 = vcmp.eq.f32.partialorder %v8619_v54, %v8730_v44  ;;  %4706 = vmin.xlane.f32.xlu1 %v4705_v15 }
0x1315   : > { %v4719_v23 = vsel %vm4718_vm9, %v4714_v8, inf  ;;  %v8734_v9 = vpop.xlane.xlu1 %4674  ;;  %v4812_v8 = vcvt.s32.f32 %v4810_v38  ;;  %v4826_v15 = vcvt.s32.f32 %v4824_v30 }
0x1316   : > { %4720 = vmin.xlane.f32.xlu0 %v4719_v23  ;;  %vm4676_vm10 = vcmp.eq.f32.partialorder %v8632_v21, %v8734_v9  ;;  %v4770_v21 = vcvt.s32.f32 %v4768_v53  ;;  %v4667_v53 = vcvt.f32.s32 %v8714_v34 }
0x1317   : > { %v8738_v47 = vpop.xlane.xlu0 %4688  ;;  %v4677_v46 = vsel %vm4676_vm10, %v4672_v11, inf }
0x1318   : > { %vm4690_vm11 = vcmp.eq.f32.partialorder %v8634_v27, %v8738_v47  ;;  %4678 = vmin.xlane.f32.xlu1 %v4677_v46 }
0x1319   : > { %v4691_v54 = vsel %vm4690_vm11, %v4686_v4, inf  ;;  %v4625_v4 = vcvt.f32.s32 %v8709_v6 }
0x131a   : > { %4692 = vmin.xlane.f32.xlu0 %v4691_v54 }
0x131b   : > { %v4626_v54 = vshll.u32 %v4625_v4, 16  ;;  %v6022_v4 = vld [vmem:[%s7066_s21 + $0x8] sm:$0xff] }
0x131c   : > { %v8744_v28 = vpop.xlane.xlu1 %4758 }
0x131d   : > { %vm4760_vm12 = vcmp.eq.f32.partialorder %v8647_v45, %v8744_v28 }
0x131e   : > { %v8750_v14 = vpop.xlane.xlu0 %4772  ;;  %v4761_v27 = vsel %vm4760_vm12, %v4756_v40, inf }
0x131f   : > { %vm4774_vm13 = vcmp.eq.f32.partialorder %v8651_v33, %v8750_v14  ;;  %4762 = vmin.xlane.f32.xlu1 %v4761_v27  ;;  %v4639_v27 = vcvt.f32.s32 %v8718_v12 }
0x1320   : > { %v4775_v41 = vsel %vm4774_vm13, %v4770_v21, inf  ;;  %v8755_v5 = vpop.xlane.xlu1 %4730 }
0x1321   : > { %4776 = vmin.xlane.f32.xlu0 %v4775_v41  ;;  %vm4732_vm14 = vcmp.eq.f32.partialorder %v8664_v57, %v8755_v5  ;;  %v4798_v57 = vcvt.s32.f32 %v4796_v18  ;;  %v4668_v41 = vshll.u32 %v4667_v53, 16  ;;  %v6020_v18 = vld [vmem:[%s7066_s21] sm:$0xff] }
0x1322   : > { %v8759_v45 = vpop.xlane.xlu0 %4744  ;;  %v4733_v33 = vsel %vm4732_vm14, %v4728_v1, inf }
0x1323   : > { %vm4746_vm15 = vcmp.eq.f32.partialorder %v8667_v43, %v8759_v45  ;;  %4734 = vmin.xlane.f32.xlu1 %v4733_v33 }
0x1324   : > { %v4747_v62 = vsel %vm4746_vm15, %v4742_v63, inf }
0x1325   : > { %v8764_v50 = vpop.xlane.xlu1 %4786  ;;  %4748 = vmin.xlane.f32.xlu0 %v4747_v62  ;;  %v4640_v62 = vshll.u32 %v4639_v27, 16 }
0x1326   : > { %vm4788_vm0 = vcmp.eq.f32.partialorder %v8679_v39, %v8764_v50 }
0x1327   : > { %v8770_v17 = vpop.xlane.xlu0 %4800  ;;  %v4789_v7 = vsel %vm4788_vm0, %v4784_v59, inf }
0x1328   : > { %vm4802_vm1 = vcmp.eq.f32.partialorder %v8683_v22, %v8770_v17  ;;  %4790 = vmin.xlane.f32.xlu1 %v4789_v7  ;;  %v4653_v22 = vcvt.f32.s32 %v8704_v56 }
0x1329   : > { %v4803_v43 = vsel %vm4802_vm1, %v4798_v57, inf  ;;  %v8774_v32 = vpop.xlane.xlu1 %4814 }
0x132a   : > { %4804 = vmin.xlane.f32.xlu0 %v4803_v43  ;;  %vm4816_vm2 = vcmp.eq.f32.partialorder %v8696_v13, %v8774_v32  ;;  %v4654_v11 = vshll.u32 %v4653_v22, 16 }
0x132b   : > { %v8778_v39 = vpop.xlane.xlu0 %4828  ;;  %v4817_v16 = vsel %vm4816_vm2, %v4812_v8, inf  ;;  %v6021_v8 = vld [vmem:[%s7066_s21 + $0x18] sm:$0xff] }
0x132c   : > { %vm4830_vm3 = vcmp.eq.f32.partialorder %v8698_v58, %v8778_v39  ;;  %4818 = vmin.xlane.f32.xlu1 %v4817_v16 }
0x132d   : > { %v4831_v25 = vsel %vm4830_vm3, %v4826_v15, inf }
0x132e   : > { %4832 = vmin.xlane.f32.xlu0 %v4831_v25 }
0x1384   : > { %v4651_v23 = vpop.xlane.xlu1 %4650 }
0x1385   : > { %v4652_v26 = vcvt.f32.s32 %v4651_v23 }
0x1387   : > { %v4655_v46 = vadd.s32 %v4654_v11, %v4652_v26 }
0x1388   : > { %v4623_v13 = vpop.xlane.xlu1 %4622 }
0x1389   : > { %v4840_v58 = vcvt.s32.f32 %v4655_v46  ;;  %v4624_v40 = vcvt.f32.s32 %v4623_v13 }
0x138b   : > { %v4856_v21 = vadd.f32 %v6019_v20, %v4840_v58  ;;  %v4627_v0 = vadd.s32 %v4626_v54, %v4624_v40  ;;  %v4709_v58 = vcvt.f32.s32 %v8724_v48  ;;  %v4723_v20 = vcvt.f32.s32 %v8730_v44 }
0x138c   : > { %v4665_v56 = vpop.xlane.xlu0 %4664 }
0x138d   : > { %v4872_v1 = vmul.f32 0.025, %v4856_v21  ;;  %v4838_v42 = vcvt.s32.f32 %v4627_v0  ;;  %v4666_v6 = vcvt.f32.s32 %v4665_v56  ;;  %v4710_v0 = vshll.u32 %v4709_v58, 16 }
0x138f   : > { %v4888_v63 = vadd.f32 -1.0, %v4872_v1  ;;  %v4854_v34 = vadd.f32 %v6020_v18, %v4838_v42  ;;  %v4669_v33 = vadd.s32 %v4668_v41, %v4666_v6  ;;  %v4724_v41 = vshll.u32 %v4723_v20, 16 }
0x1390   : > { %v4637_v59 = vpop.xlane.xlu0 %4636  ;;  %v4695_v1 = vcvt.f32.s32 %v8738_v47 }
0x1391   : > { %v4939_v38 = vsel %vm4936_vm4, %v8194_v61, %v4888_v63  ;;  %v4870_v57 = vmul.f32 0.025, %v4854_v34  ;;  %v4841_v12 = vcvt.s32.f32 %v4669_v33  ;;  %v4638_v30 = vcvt.f32.s32 %v4637_v59 }
0x1392   : > { %v4956_v7 = vsel %vm4953_vm5, %v4939_v38, 0.0  ;;  %v4696_v44 = vshll.u32 %v4695_v1, 16 }
0x1393   : > { %4972 = vst [vmem:[%s8792_s24 + $0x10] sm:$0xff] %v4956_v7  ;;  %v4886_v43 = vadd.f32 -1.0, %v4870_v57  ;;  %v4857_v15 = vadd.f32 %v6021_v8, %v4841_v12  ;;  %v4641_v16 = vadd.s32 %v4640_v62, %v4638_v30  ;;  %v6023_v62 = vld [vmem:[%s7066_s21 + $0x30] sm:$0xff]  ;;  %v4779_v12 = vcvt.f32.s32 %v8750_v14  ;;  %v6024_v7 = vld [vmem:[%s7066_s21 + $0x38] sm:$0xff] }
0x1394   : > { %v4751_v14 = vcvt.f32.s32 %v8759_v45 }
0x1395   : > { %v4937_v25 = vsel %vm4936_vm4, %v8177_v52, %v4886_v43  ;;  %v4873_v61 = vmul.f32 0.025, %v4857_v15  ;;  %v4839_v22 = vcvt.s32.f32 %v4641_v16  ;;  %v4737_v16 = vcvt.f32.s32 %v8755_v5 }
0x1396   : > { %v4954_v23 = vsel %vm4953_vm5, %v4937_v25, 0.0 }
0x1397   : > { %4970 = vst [vmem:[%s8792_s24] sm:$0xff] %v4954_v23  ;;  %v4889_v11 = vadd.f32 -1.0, %v4873_v61  ;;  %v4855_v26 = vadd.f32 %v6022_v4, %v4839_v22  ;;  %v4780_v4 = vshll.u32 %v4779_v12, 16  ;;  %v6028_v12 = vld [vmem:[%s7066_s21 + $0x58] sm:$0xff] }
0x1399   : > { %v4940_v46 = vsel %vm4936_vm4, %v8204_v51, %v4889_v11  ;;  %v4871_v13 = vmul.f32 0.025, %v4855_v26  ;;  %v4681_v51 = vcvt.f32.s32 %v8734_v9  ;;  %v4765_v9 = vcvt.f32.s32 %v8744_v28  ;;  %v6025_v26 = vld [vmem:[%s7066_s21 + $0x20] sm:$0xff] }
0x139a   : > { %v4957_v54 = vsel %vm4953_vm5, %v4940_v46, 0.0 }
0x139b   : > { %4973 = vst [vmem:[%s8792_s24 + $0x18] sm:$0xff] %v4957_v54  ;;  %v4887_v53 = vadd.f32 -1.0, %v4871_v13  ;;  %v4682_v18 = vshll.u32 %v4681_v51, 16  ;;  %v4766_v11 = vshll.u32 %v4765_v9, 16 }
0x139d   : > { %v4938_v52 = vsel %vm4936_vm4, %v8190_v55, %v4887_v53  ;;  %v6026_v53 = vld [vmem:[%s7066_s21 + $0x28] sm:$0xff] }
0x139e   : > { %v4955_v40 = vsel %vm4953_vm5, %v4938_v52, 0.0 }
0x139f   : > { %4971 = vst [vmem:[%s8792_s24 + $0x8] sm:$0xff] %v4955_v40 }
0x13a1   : > { %v4707_v21 = vpop.xlane.xlu1 %4706 }
0x13a2   : > { %v4708_v27 = vcvt.f32.s32 %v4707_v21 }
0x13a3   : > { %v4721_v56 = vpop.xlane.xlu0 %4720 }
0x13a4   : > { %v4711_v42 = vadd.s32 %v4710_v0, %v4708_v27  ;;  %v4722_v6 = vcvt.f32.s32 %v4721_v56  ;;  %v4738_v0 = vshll.u32 %v4737_v16, 16 }
0x13a5   : > { %v4679_v63 = vpop.xlane.xlu1 %4678 }
0x13a6   : > { %v4844_v55 = vcvt.s32.f32 %v4711_v42  ;;  %v4725_v48 = vadd.s32 %v4724_v41, %v4722_v6  ;;  %v4680_v34 = vcvt.f32.s32 %v4679_v63  ;;  %v4752_v42 = vshll.u32 %v4751_v14, 16  ;;  %v6030_v14 = vld [vmem:[%s7066_s21 + $0x48] sm:$0xff] }
0x13a7   : > { %v4693_v33 = vpop.xlane.xlu0 %4692  ;;  %v4793_v6 = vcvt.f32.s32 %v8764_v50 }
0x13a8   : > { %v4860_v59 = vadd.f32 %v6023_v62, %v4844_v55  ;;  %v4845_v38 = vcvt.s32.f32 %v4725_v48  ;;  %v4694_v57 = vcvt.f32.s32 %v4693_v33  ;;  %v4683_v47 = vadd.s32 %v4682_v18, %v4680_v34 }
0x13a9   : > { %v4807_v62 = vcvt.f32.s32 %v8770_v17 }
0x13aa   : > { %v4876_v30 = vmul.f32 0.025, %v4860_v59  ;;  %v4861_v43 = vadd.f32 %v6024_v7, %v4845_v38  ;;  %v4697_v8 = vadd.s32 %v4696_v44, %v4694_v57  ;;  %v4842_v15 = vcvt.s32.f32 %v4683_v47 }
0x13ab   : > { %v4794_v7 = vshll.u32 %v4793_v6, 16  ;;  %v6032_v6 = vld [vmem:[%s7066_s21 + $0x68] sm:$0xff] }
0x13ac   : > { %v4892_v25 = vadd.f32 -1.0, %v4876_v30  ;;  %v4877_v61 = vmul.f32 0.025, %v4861_v43  ;;  %v4843_v22 = vcvt.s32.f32 %v4697_v8  ;;  %v4763_v23 = vpop.xlane.xlu1 %4762  ;;  %v4858_v28 = vadd.f32 %v6025_v26, %v4842_v15 }
0x13ad   : > { %v4764_v46 = vcvt.f32.s32 %v4763_v23  ;;  %v4821_v8 = vcvt.f32.s32 %v8774_v32  ;;  %v4835_v26 = vcvt.f32.s32 %v8778_v39 }
0x13ae   : > { %v4943_v13 = vsel %vm4936_vm4, %v8254_v19, %v4892_v25  ;;  %v4893_v54 = vadd.f32 -1.0, %v4877_v61  ;;  %v4859_v52 = vadd.f32 %v6026_v53, %v4843_v22  ;;  %v4777_v58 = vpop.xlane.xlu0 %4776  ;;  %v4874_v40 = vmul.f32 0.025, %v4858_v28  ;;  %v6029_v22 = vld [vmem:[%s7066_s21 + $0x40] sm:$0xff] }
0x13af   : > { %v4960_v5 = vsel %vm4953_vm5, %v4943_v13, 0.0  ;;  %v4767_v20 = vadd.s32 %v4766_v11, %v4764_v46  ;;  %v4778_v21 = vcvt.f32.s32 %v4777_v58  ;;  %v4808_v61 = vshll.u32 %v4807_v62, 16 }
0x13b0   : > { %4976 = vst [vmem:[%s8792_s24 + $0x30] sm:$0xff] %v4960_v5  ;;  %v4944_v27 = vsel %vm4936_vm4, %v8260_v31, %v4893_v54  ;;  %v4875_v45 = vmul.f32 0.025, %v4859_v52  ;;  %v4890_v19 = vadd.f32 -1.0, %v4874_v40  ;;  %v4735_v1 = vpop.xlane.xlu1 %4734  ;;  %v6027_v31 = vld [vmem:[%s7066_s21 + $0x50] sm:$0xff]  ;;  %v4822_v5 = vshll.u32 %v4821_v8, 16 }
0x13b1   : > { %v4961_v51 = vsel %vm4953_vm5, %v4944_v27, 0.0  ;;  %v4848_v56 = vcvt.s32.f32 %v4767_v20  ;;  %v4781_v41 = vadd.s32 %v4780_v4, %v4778_v21  ;;  %v4736_v48 = vcvt.f32.s32 %v4735_v1  ;;  %v6031_v27 = vld [vmem:[%s7066_s21 + $0x60] sm:$0xff] }
0x13b2   : > { %4977 = vst [vmem:[%s8792_s24 + $0x38] sm:$0xff] %v4961_v51  ;;  %v4891_v55 = vadd.f32 -1.0, %v4875_v45  ;;  %v4749_v63 = vpop.xlane.xlu0 %4748  ;;  %v4941_v18 = vsel %vm4936_vm4, %v8242_v36, %v4890_v19  ;;  %v4836_v19 = vshll.u32 %v4835_v26, 16 }
0x13b3   : > { %v4864_v34 = vadd.f32 %v6027_v31, %v4848_v56  ;;  %v4849_v33 = vcvt.s32.f32 %v4781_v41  ;;  %v4750_v44 = vcvt.f32.s32 %v4749_v63  ;;  %v4958_v59 = vsel %vm4953_vm5, %v4941_v18, 0.0 }
0x13b4   : > { %v4942_v50 = vsel %vm4936_vm4, %v8249_v2, %v4891_v55  ;;  %v4739_v38 = vadd.s32 %v4738_v0, %v4736_v48  ;;  %4974 = vst [vmem:[%s8792_s24 + $0x20] sm:$0xff] %v4958_v59 }
0x13b5   : > { %v4959_v57 = vsel %vm4953_vm5, %v4942_v50, 0.0  ;;  %v4880_v9 = vmul.f32 0.025, %v4864_v34  ;;  %v4865_v36 = vadd.f32 %v6028_v12, %v4849_v33  ;;  %v4753_v47 = vadd.s32 %v4752_v42, %v4750_v44  ;;  %v4791_v30 = vpop.xlane.xlu1 %4790 }
0x13b6   : > { %4975 = vst [vmem:[%s8792_s24 + $0x28] sm:$0xff] %v4959_v57  ;;  %v4846_v43 = vcvt.s32.f32 %v4739_v38  ;;  %v4792_v17 = vcvt.f32.s32 %v4791_v30 }
0x13b7   : > { %v4896_v15 = vadd.f32 -1.0, %v4880_v9  ;;  %v4881_v16 = vmul.f32 0.025, %v4865_v36  ;;  %v4847_v2 = vcvt.s32.f32 %v4753_v47  ;;  %v4805_v25 = vpop.xlane.xlu0 %4804  ;;  %v6034_v9 = vld [vmem:[%s7066_s21 + $0x78] sm:$0xff] }
0x13b8   : > { %v4862_v23 = vadd.f32 %v6029_v22, %v4846_v43  ;;  %v4795_v11 = vadd.s32 %v4794_v7, %v4792_v17  ;;  %v4806_v4 = vcvt.f32.s32 %v4805_v25 }
0x13b9   : > { %v4947_v28 = vsel %vm4936_vm4, %v8277_v29, %v4896_v15  ;;  %v4897_v46 = vadd.f32 -1.0, %v4881_v16  ;;  %v4863_v13 = vadd.f32 %v6030_v14, %v4847_v2  ;;  %v4819_v58 = vpop.xlane.xlu1 %4818 }
0x13ba   : > { %v4964_v32 = vsel %vm4953_vm5, %v4947_v28, 0.0  ;;  %v4878_v54 = vmul.f32 0.025, %v4862_v23  ;;  %v4850_v53 = vcvt.s32.f32 %v4795_v11  ;;  %v4809_v52 = vadd.s32 %v4808_v61, %v4806_v4 }
0x13bb   : > { %4980 = vst [vmem:[%s8792_s24 + $0x50] sm:$0xff] %v4964_v32  ;;  %v4948_v40 = vsel %vm4936_vm4, %v8287_v35, %v4897_v46  ;;  %v4879_v39 = vmul.f32 0.025, %v4863_v13  ;;  %v4820_v20 = vcvt.f32.s32 %v4819_v58  ;;  %v4833_v29 = vpop.xlane.xlu0 %4832 }
0x13bc   : > { %v4965_v21 = vsel %vm4953_vm5, %v4948_v40, 0.0  ;;  %v4894_v0 = vadd.f32 -1.0, %v4878_v54  ;;  %v4866_v45 = vadd.f32 %v6031_v27, %v4850_v53  ;;  %v4851_v51 = vcvt.s32.f32 %v4809_v52 }
0x13bd   : > { %4981 = vst [vmem:[%s8792_s24 + $0x58] sm:$0xff] %v4965_v21  ;;  %v4895_v56 = vadd.f32 -1.0, %v4879_v39  ;;  %v4823_v41 = vadd.s32 %v4822_v5, %v4820_v20  ;;  %v4834_v1 = vcvt.f32.s32 %v4833_v29 }
0x13be   : > { %v4945_v35 = vsel %vm4936_vm4, %v8268_v60, %v4894_v0  ;;  %v4882_v42 = vmul.f32 0.025, %v4866_v45  ;;  %v4867_v55 = vadd.f32 %v6032_v6, %v4851_v51  ;;  %v6033_v60 = vld [vmem:[%s7066_s21 + $0x70] sm:$0xff] }
0x13bf   : > { %v4962_v48 = vsel %vm4953_vm5, %v4945_v35, 0.0  ;;  %v4946_v63 = vsel %vm4936_vm4, %v8273_v10, %v4895_v56  ;;  %v4852_v18 = vcvt.s32.f32 %v4823_v41  ;;  %v4837_v31 = vadd.s32 %v4836_v19, %v4834_v1 }
0x13c0   : > { %4978 = vst [vmem:[%s8792_s24 + $0x40] sm:$0xff] %v4962_v48  ;;  %v4963_v34 = vsel %vm4953_vm5, %v4946_v63, 0.0  ;;  %v4898_v33 = vadd.f32 -1.0, %v4882_v42  ;;  %v4883_v44 = vmul.f32 0.025, %v4867_v55 }
0x13c1   : > { %4979 = vst [vmem:[%s8792_s24 + $0x48] sm:$0xff] %v4963_v34  ;;  %v4868_v62 = vadd.f32 %v6033_v60, %v4852_v18  ;;  %v4853_v59 = vcvt.s32.f32 %v4837_v31 }
0x13c2   : > { %v4949_v50 = vsel %vm4936_vm4, %v8292_v3, %v4898_v33  ;;  %v4899_v38 = vadd.f32 -1.0, %v4883_v44 }
0x13c3   : > { %v4966_v10 = vsel %vm4953_vm5, %v4949_v50, 0.0  ;;  %v4884_v57 = vmul.f32 0.025, %v4868_v62  ;;  %v4869_v12 = vadd.f32 %v6034_v9, %v4853_v59 }
0x13c4   : > { %4982 = vst [vmem:[%s8792_s24 + $0x60] sm:$0xff] %v4966_v10  ;;  %v4950_v36 = vsel %vm4936_vm4, %v8299_v49, %v4899_v38 }
0x13c5   : > { %v4967_v47 = vsel %vm4953_vm5, %v4950_v36, 0.0  ;;  %v4900_v30 = vadd.f32 -1.0, %v4884_v57  ;;  %v4885_v7 = vmul.f32 0.025, %v4869_v12 }
0x13c6   : > { %4983 = vst [vmem:[%s8792_s24 + $0x68] sm:$0xff] %v4967_v47 }
0x13c7   : > { %v4951_v3 = vsel %vm4936_vm4, %v8305_v24, %v4900_v30  ;;  %v4901_v43 = vadd.f32 -1.0, %v4885_v7 }
0x13c8   : > { %v4968_v17 = vsel %vm4953_vm5, %v4951_v3, 0.0 }
0x13c9   : > { %4984 = vst [vmem:[%s8792_s24 + $0x70] sm:$0xff] %v4968_v17  ;;  %v4952_v49 = vsel %vm4936_vm4, %v8311_v37, %v4901_v43 }
0x13ca   : > { %v4969_v8 = vsel %vm4953_vm5, %v4952_v49, 0.0 }
0x13cb   : > { %4985 = vst [vmem:[%s8792_s24 + $0x78] sm:$0xff] %v4969_v8 }
0x13cc   : > { %6134 = shalt.err (!%p6131_p3)
}
0x13cd   : > { %s6135_s26 = scalar_lea.hbm %s8881_s27, 2048  ;;  %s6139_s13 = scalar_lea.hbm %s9195_s14, 4096 }
0x13ce   : > { %p6136_p6 = scmp.ne.s32.totalorder %s8881_s27, %s6135_s26  ;;  %p6140_p9 = scmp.lt.u32.totalorder %s8881_s27, %s9195_s14 }
0x13cf   : > { %p6141_p8 = scmp.lt.u32.totalorder %s6139_s13, %s6135_s26  ;;  %p6143_p1 = scmp.lt.u32.totalorder %s6135_s26, %s8881_s27 }
0x13d0   : > { %p6137_p13 = pnand %p6136_p6, %p9196_p0 }
0x13d1   : > { %p6142_p10 = por %p6141_p8, %p6140_p9 }
0x13d2   : > { %p6138_p7 = pneg %p6137_p13 }
0x13d3   : > { %p6144_p4 = por %p6143_p1, %p6142_p10 }
0x13d5   : > { %p6145_p2 = pnand %p6144_p4, %p6138_p7 }
0x13d7   : > { %6148 = shalt.err (!%p6145_p2)
}
0x13d8   : > { %s6210_s20 = smov 128   ;;  %s6211_s10 = smov 8  }
0x13d9   : > { %5835 = dma.vmem_to_hbm [thread:$0]  (%p9196_p0), %s8883_s22, 2048, %s8881_s27, %s4987_s17, %s6210_s20, %s6210_s20, %s6211_s10  }
0x13da PF: > { %s9197_s11 = sld [smem:[#allocation13_spill]]  ;;  %s9198_s29 = sld [smem:[#allocation17_spill]] }
0x13db   : > { %p9200_p11 = scmp.ge.s32.totalorder %s6195_s16, 2 }
0x13e0   : > { %s5015_s18 = sand.u32 1, %s9197_s11   ;;  %p9199_p5 = scmp.ne.s32.totalorder %s9198_s29, 0 }
0x13e1   : > { %s5016_s26 = scalar_lea.sflag [#allocation4], %s5015_s18 }
0x13e2   : > { %p5849_p12 = pnand %p9200_p11, %p9199_p5 }
0x13e4   : > { %6178 = dma.done.wait (!%p5849_p12), %s5016_s26, 2048  }
0x13e5   : > { %6180 = vsyncadd (!%p5849_p12), %s5016_s26, 4294965248  ;;  %s9201_s16 = sld [smem:[#allocation14_spill]]  ;;  %s9202_s24 = sld [smem:[#allocation15_spill]] }
0x13e6   : > { %s9203_s29 = smov %s6187_s30  ;;  %s9204_s30 = smov %s6191_s15 }
0x13eb   : > { %p26_p3 = scmp.ge.s32.totalorder %s9201_s16, 4   ;;  %s9205_s15 = smov %s9202_s24 }
0x13ed   :  { %28 = sbr.rel (!%p26_p3) target bundleno = 12 (0xc), region = 144 }
0x13f4   :  { %5021 = vsyncpa [#allocation3], 1 }
0x13f5   :  { %5023 = vsyncpa [#allocation3 + $0x1], 1 }
0x13f6   :  { %5024 = vsyncpa [#allocation6], 1 }
0x13f7   :  { %5025 = vsyncpa [#allocation4], 1 }
0x13f8   :  { %5027 = vsyncpa [#allocation4 + $0x1], 1 }

</bundles_post_ra>
